<compile_context>
chip_gen: v6e
topology: v6e:2x2x1
jax: 0.10.0
libtpu: 0.0.40
codegen_flags: <defaults>
</compile_context>

<pallas_src>
import jax
import jax.numpy as jnp
from jax.experimental import pallas as pl
from jax.experimental.pallas import tpu as pltpu


def _round_up(x, m):
    return (x + m - 1) // m * m


# ----------------------------- Pallas kernel ------------------------------ #
def netreg_kernel(p_ref, wc_ref, bc_ref, w1a_ref, w1b_ref, b1_ref,
                  w2_ref, b2_ref, w3_ref, b3_ref, out_ref):
    tb = out_ref.shape[0]                      # batch tile size (static)
    ohwp = p_ref.shape[0] // tb                # padded spatial size (static)

    # conv1 for the whole batch tile as ONE MXU matmul:
    #   (TB*OHWp, P) bf16 @ (P, K) bf16 -> (TB*OHWp, K) f32
    h = jnp.dot(p_ref[...], wc_ref[...], preferred_element_type=jnp.float32)
    h = h + bc_ref[...]                        # conv bias (1, K) broadcast

    # global max / min pooling per sample.  OHWp is a multiple of 8 so this
    # reshape is tile-aligned (no relayout) and the reduce is a sublane reduce.
    h3 = h.reshape(tb, ohwp, h.shape[-1])      # (TB, OHWp, K)
    hmax = jnp.max(h3, axis=1)                 # (TB, K)
    hmin = jnp.min(h3, axis=1)                 # (TB, K)

    # fc1 without lane-axis concat: feat @ w1 == hmax @ w1[:K] + hmin @ w1[K:]
    z1 = (jnp.dot(hmax.astype(jnp.bfloat16), w1a_ref[...],
                  preferred_element_type=jnp.float32)
          + jnp.dot(hmin.astype(jnp.bfloat16), w1b_ref[...],
                    preferred_element_type=jnp.float32)
          + b1_ref[...])
    h1 = jnp.maximum(z1, 0.0)

    # fc2 (dominant matmul) in bf16 with f32 accumulation.
    z2 = jnp.dot(h1.astype(jnp.bfloat16), w2_ref[...],
                 preferred_element_type=jnp.float32) + b2_ref[...]
    h2 = jnp.maximum(z2, 0.0)

    # fc3 (tiny) in f32.
    q = jnp.dot(h2, w3_ref[...], preferred_element_type=jnp.float32) + b3_ref[...]
    out_ref[...] = q.astype(out_ref.dtype)     # per-step (TB, 1) output block


# ------------------------------ glue (JAX) -------------------------------- #
def im2col(x_nchw, kh, kw):
    """x (B, 1, H, W) -> patches (B, OH*OW, KH*KW); pure layout plumbing."""
    B, C, H, W = x_nchw.shape
    assert C == 1
    oh, ow = H - kh + 1, W - kw + 1
    cols = []
    for di in range(kh):
        for dj in range(kw):
            cols.append(x_nchw[:, 0, di:di + oh, dj:dj + ow].reshape(B, oh * ow, 1))
    return jnp.concatenate(cols, axis=2)


def init_params(key, ker_size=7, n_kers=50, n1_nodes=800, n2_nodes=800):
    """Deterministic synthetic parameters (shapes from netReg.__init__)."""
    ks = jax.random.split(key, 8)
    s = 0.05
    wconv = jax.random.normal(ks[0], (n_kers, 1, ker_size, ker_size), jnp.float32) * s
    bconv = jax.random.normal(ks[1], (n_kers,), jnp.float32) * s
    wc = wconv.reshape(n_kers, ker_size * ker_size).T          # (KH*KW, n_kers)
    bc = bconv.reshape(1, n_kers)
    w1 = jax.random.normal(ks[2], (2 * n_kers, n1_nodes), jnp.float32) * s
    b1 = jax.random.normal(ks[3], (1, n1_nodes), jnp.float32) * s
    w2 = jax.random.normal(ks[4], (n1_nodes, n2_nodes), jnp.float32) * s
    b2 = jax.random.normal(ks[5], (1, n2_nodes), jnp.float32) * s
    w3 = jax.random.normal(ks[6], (n2_nodes, 1), jnp.float32) * s
    b3 = jax.random.normal(ks[7], (1, 1), jnp.float32) * s
    return (wc, bc, w1, b1, w2, b2, w3, b3)


def netreg_forward(x, params, ker_size=7, batch_tile=128):
    wc, bc, w1, b1, w2, b2, w3, b3 = params
    # x.view(-1, C, H, W)
    x = x.reshape(-1, x.shape[-3], x.shape[-2], x.shape[-1])
    B = x.shape[0]

    patches = im2col(x, ker_size, ker_size)                    # (B, OHW, P) f32
    OHW, P = patches.shape[1], patches.shape[2]

    # ---- wrapper-side layout plumbing ----
    # Spatial padded to a multiple of 8 by edge replication (duplicates do not
    # change the max/min pooling result).
    ohwp = _round_up(OHW, 8)
    if ohwp != OHW:
        patches = jnp.pad(patches, ((0, 0), (0, ohwp - OHW), (0, 0)), mode="edge")

    # Batch tile: multiple of 8, capped at batch_tile (128 keeps VMEM use well
    # under the 32 MiB scoped default on v6e/v7x; padded extra rows are junk
    # that gets sliced off).
    tb = max(8, min(_round_up(batch_tile, 8), _round_up(B, 8)))
    Bp = _round_up(B, tb)
    if Bp != B:
        patches = jnp.pad(patches, ((0, Bp - B), (0, 0), (0, 0)))

    patches_flat = patches.reshape(Bp * ohwp, P).astype(jnp.bfloat16)

    # Pad n_kers -> multiple of 64 (so 2*Kp is a multiple of 128), split fc1's
    # weight into max/min halves, cast the MXU-heavy weights to bf16.
    K = wc.shape[1]
    Kp = _round_up(K, 64)
    wc_p = jnp.pad(wc, ((0, 0), (0, Kp - K))).astype(jnp.bfloat16)   # (P, Kp)
    bc_p = jnp.pad(bc, ((0, 0), (0, Kp - K)))                        # (1, Kp)
    w1a = jnp.pad(w1[:K], ((0, Kp - K), (0, 0))).astype(jnp.bfloat16)  # (Kp, n1)
    w1b = jnp.pad(w1[K:], ((0, Kp - K), (0, 0))).astype(jnp.bfloat16)  # (Kp, n1)
    w2b = w2.astype(jnp.bfloat16)
    n1, n2 = w1.shape[1], w2.shape[1]

    grid = (Bp // tb,)
    flops = 2 * Bp * (ohwp * P * Kp + 2 * Kp * n1 + n1 * n2 + n2)
    bytes_accessed = int(
        patches_flat.size * 2 + Bp * 4
        + (wc_p.size + w1a.size + w1b.size + w2b.size) * 2
        + (bc_p.size + b1.size + b2.size + w3.size + b3.size) * 4)

    out = pl.pallas_call(
        netreg_kernel,
        out_shape=jax.ShapeDtypeStruct((Bp, 1), jnp.float32),
        grid_spec=pltpu.PrefetchScalarGridSpec(
            num_scalar_prefetch=0,
            grid=grid,
            in_specs=[
                pl.BlockSpec((tb * ohwp, P), lambda i: (i, 0)),   # patches (per tile)
                pl.BlockSpec((P, Kp), lambda i: (0, 0)),          # conv W (resident)
                pl.BlockSpec((1, Kp), lambda i: (0, 0)),          # conv b
                pl.BlockSpec((Kp, n1), lambda i: (0, 0)),         # fc1 W (max half)
                pl.BlockSpec((Kp, n1), lambda i: (0, 0)),         # fc1 W (min half)
                pl.BlockSpec((1, n1), lambda i: (0, 0)),          # fc1 b
                pl.BlockSpec((n1, n2), lambda i: (0, 0)),         # fc2 W
                pl.BlockSpec((1, n2), lambda i: (0, 0)),          # fc2 b
                pl.BlockSpec((n2, 1), lambda i: (0, 0)),          # fc3 W
                pl.BlockSpec((1, 1), lambda i: (0, 0)),           # fc3 b
            ],
            out_specs=pl.BlockSpec((tb, 1), lambda i: (i, 0)),    # per-step block
        ),
        compiler_params=pltpu.CompilerParams(
            dimension_semantics=("parallel",),          # safe: no resident output
            vmem_limit_bytes=48 * 1024 * 1024),         # headroom for TB=128 on v5e
        cost_estimate=pl.CostEstimate(
            flops=flops, transcendentals=0, bytes_accessed=bytes_accessed),
    )(patches_flat, wc_p, bc_p, w1a, w1b, b1, w2b, b2, w3, b3)

    return out[:B]


# --------------------------- pure-JAX reference ---------------------------- #
def netreg_reference(x, params, ker_size=7):
    wc, bc, w1, b1, w2, b2, w3, b3 = params
    hp = jax.lax.Precision.HIGHEST
    x = x.reshape(-1, x.shape[-3], x.shape[-2], x.shape[-1])
    patches = im2col(x, ker_size, ker_size)                        # (B, OH*OW, P)
    h = jnp.einsum("bpq,qk->bpk", patches, wc, precision=hp) + bc[None]
    feat = jnp.concatenate([h.max(axis=1), h.min(axis=1)], axis=1)  # (B, 2K)
    h1 = jax.nn.relu(jnp.dot(feat, w1, precision=hp) + b1)
    h2 = jax.nn.relu(jnp.dot(h1, w2, precision=hp) + b2)
    return jnp.dot(h2, w3, precision=hp) + b3


# ----------------------------------- main ---------------------------------- #
if __name__ == "__main__":
    key = jax.random.PRNGKey(0)
    kx, kp = jax.random.split(key)

    B, H, W = 2, 16, 16            # small input; conv output is 10x10
    x = jax.random.normal(kx, (B, 1, H, W), jnp.float32)
    params = init_params(kp, ker_size=7, n_kers=50, n1_nodes=800, n2_nodes=800)

    out = netreg_forward(x, params, ker_size=7)
    out = jax.block_until_ready(out)

    ref = netreg_reference(x, params, ker_size=7)
    assert out.shape == (B, 1), out.shape
    if not bool(jnp.allclose(out, ref, rtol=2e-2, atol=2e-2)):
        raise AssertionError(f"mismatch: kernel={out} ref={ref}")

    print("KERNEL_OK")
</pallas_src>

<mosaic_0001>
module attributes {stable_mosaic.version = 11 : i64} {
  func.func @netreg_kernel(%arg0: i32, %arg1: memref<832x49xbf16, #tpu.memory_space<vmem>>, %arg2: memref<49x64xbf16, #tpu.memory_space<vmem>>, %arg3: memref<1x64xf32, #tpu.memory_space<vmem>>, %arg4: memref<64x800xbf16, #tpu.memory_space<vmem>>, %arg5: memref<64x800xbf16, #tpu.memory_space<vmem>>, %arg6: memref<1x800xf32, #tpu.memory_space<vmem>>, %arg7: memref<800x800xbf16, #tpu.memory_space<vmem>>, %arg8: memref<1x800xf32, #tpu.memory_space<vmem>>, %arg9: memref<800x1xf32, #tpu.memory_space<vmem>>, %arg10: memref<1x1xf32, #tpu.memory_space<vmem>>, %arg11: memref<8x1xf32, #tpu.memory_space<vmem>>) attributes {dimension_semantics = [#tpu.dimension_semantics<parallel>], iteration_bounds = array<i64: 1>, scalar_prefetch = 0 : i64, scratch_operands = 0 : i64, tpu.core_type = #tpu.core_type<tc>, window_params = [{transform_indices = @transform_0, window_bounds = array<i64: 832, 49>}, {pipeline_mode = #tpu.pipeline_mode<synchronous>, transform_indices = @transform_1, window_bounds = array<i64: 49, 64>}, {pipeline_mode = #tpu.pipeline_mode<synchronous>, transform_indices = @transform_2, window_bounds = array<i64: 1, 64>}, {pipeline_mode = #tpu.pipeline_mode<synchronous>, transform_indices = @transform_3, window_bounds = array<i64: 64, 800>}, {pipeline_mode = #tpu.pipeline_mode<synchronous>, transform_indices = @transform_4, window_bounds = array<i64: 64, 800>}, {pipeline_mode = #tpu.pipeline_mode<synchronous>, transform_indices = @transform_5, window_bounds = array<i64: 1, 800>}, {pipeline_mode = #tpu.pipeline_mode<synchronous>, transform_indices = @transform_6, window_bounds = array<i64: 800, 800>}, {pipeline_mode = #tpu.pipeline_mode<synchronous>, transform_indices = @transform_7, window_bounds = array<i64: 1, 800>}, {pipeline_mode = #tpu.pipeline_mode<synchronous>, transform_indices = @transform_8, window_bounds = array<i64: 800, 1>}, {pipeline_mode = #tpu.pipeline_mode<synchronous>, transform_indices = @transform_9, window_bounds = array<i64: 1, 1>}, {transform_indices = @transform_10, window_bounds = array<i64: 8, 1>}]} {
    %c0 = arith.constant 0 : index
    %c0_0 = arith.constant 0 : index
    %0 = vector.load %arg1[%c0, %c0_0] : memref<832x49xbf16, #tpu.memory_space<vmem>>, vector<832x49xbf16>
    %c0_1 = arith.constant 0 : index
    %c0_2 = arith.constant 0 : index
    %1 = vector.load %arg2[%c0_1, %c0_2] : memref<49x64xbf16, #tpu.memory_space<vmem>>, vector<49x64xbf16>
    %cst = arith.constant dense<0.000000e+00> : vector<832x64xf32>
    %2 = tpu.matmul %0, %1, %cst {dimension_numbers = #tpu.dot_dimension_numbers<[1], [0], [0], [1], [0, 0, 1, 1], [], []>} : vector<832x49xbf16>, vector<49x64xbf16>, vector<832x64xf32> -> vector<832x64xf32>
    %c0_3 = arith.constant 0 : index
    %c0_4 = arith.constant 0 : index
    %3 = vector.load %arg3[%c0_3, %c0_4] : memref<1x64xf32, #tpu.memory_space<vmem>>, vector<1x64xf32>
    %4 = vector.broadcast %3 : vector<1x64xf32> to vector<832x64xf32>
    %5 = arith.addf %2, %4 : vector<832x64xf32>
    %6 = vector.shape_cast %5 : vector<832x64xf32> to vector<8x104x64xf32>
    %cst_5 = arith.constant dense<0xFF800000> : vector<8x64xf32>
    %7 = vector.multi_reduction <maximumf>, %6, %cst_5 [1] : vector<8x104x64xf32> to vector<8x64xf32>
    %cst_6 = arith.constant dense<0x7F800000> : vector<8x64xf32>
    %8 = vector.multi_reduction <minimumf>, %6, %cst_6 [1] : vector<8x104x64xf32> to vector<8x64xf32>
    %9 = arith.truncf %7 : vector<8x64xf32> to vector<8x64xbf16>
    %c0_7 = arith.constant 0 : index
    %c0_8 = arith.constant 0 : index
    %10 = vector.load %arg4[%c0_7, %c0_8] : memref<64x800xbf16, #tpu.memory_space<vmem>>, vector<64x800xbf16>
    %cst_9 = arith.constant dense<0.000000e+00> : vector<8x800xf32>
    %11 = tpu.matmul %9, %10, %cst_9 {dimension_numbers = #tpu.dot_dimension_numbers<[1], [0], [0], [1], [0, 0, 1, 1], [], []>} : vector<8x64xbf16>, vector<64x800xbf16>, vector<8x800xf32> -> vector<8x800xf32>
    %12 = arith.truncf %8 : vector<8x64xf32> to vector<8x64xbf16>
    %c0_10 = arith.constant 0 : index
    %c0_11 = arith.constant 0 : index
    %13 = vector.load %arg5[%c0_10, %c0_11] : memref<64x800xbf16, #tpu.memory_space<vmem>>, vector<64x800xbf16>
    %cst_12 = arith.constant dense<0.000000e+00> : vector<8x800xf32>
    %14 = tpu.matmul %12, %13, %cst_12 {dimension_numbers = #tpu.dot_dimension_numbers<[1], [0], [0], [1], [0, 0, 1, 1], [], []>} : vector<8x64xbf16>, vector<64x800xbf16>, vector<8x800xf32> -> vector<8x800xf32>
    %15 = arith.addf %11, %14 : vector<8x800xf32>
    %c0_13 = arith.constant 0 : index
    %c0_14 = arith.constant 0 : index
    %16 = vector.load %arg6[%c0_13, %c0_14] : memref<1x800xf32, #tpu.memory_space<vmem>>, vector<1x800xf32>
    %17 = vector.broadcast %16 : vector<1x800xf32> to vector<8x800xf32>
    %18 = arith.addf %15, %17 : vector<8x800xf32>
    %cst_15 = arith.constant 0.000000e+00 : f32
    %19 = vector.broadcast %cst_15 : f32 to vector<8x800xf32>
    %20 = arith.maximumf %18, %19 : vector<8x800xf32>
    %21 = arith.truncf %20 : vector<8x800xf32> to vector<8x800xbf16>
    %c0_16 = arith.constant 0 : index
    %c0_17 = arith.constant 0 : index
    %22 = vector.load %arg7[%c0_16, %c0_17] : memref<800x800xbf16, #tpu.memory_space<vmem>>, vector<800x800xbf16>
    %cst_18 = arith.constant dense<0.000000e+00> : vector<8x800xf32>
    %23 = tpu.matmul %21, %22, %cst_18 {dimension_numbers = #tpu.dot_dimension_numbers<[1], [0], [0], [1], [0, 0, 1, 1], [], []>} : vector<8x800xbf16>, vector<800x800xbf16>, vector<8x800xf32> -> vector<8x800xf32>
    %c0_19 = arith.constant 0 : index
    %c0_20 = arith.constant 0 : index
    %24 = vector.load %arg8[%c0_19, %c0_20] : memref<1x800xf32, #tpu.memory_space<vmem>>, vector<1x800xf32>
    %25 = vector.broadcast %24 : vector<1x800xf32> to vector<8x800xf32>
    %26 = arith.addf %23, %25 : vector<8x800xf32>
    %cst_21 = arith.constant 0.000000e+00 : f32
    %27 = vector.broadcast %cst_21 : f32 to vector<8x800xf32>
    %28 = arith.maximumf %26, %27 : vector<8x800xf32>
    %c0_22 = arith.constant 0 : index
    %c0_23 = arith.constant 0 : index
    %29 = vector.load %arg9[%c0_22, %c0_23] : memref<800x1xf32, #tpu.memory_space<vmem>>, vector<800x1xf32>
    %cst_24 = arith.constant dense<0.000000e+00> : vector<8x1xf32>
    %30 = tpu.matmul %28, %29, %cst_24 {dimension_numbers = #tpu.dot_dimension_numbers<[1], [0], [0], [1], [0, 0, 1, 1], [], []>} : vector<8x800xf32>, vector<800x1xf32>, vector<8x1xf32> -> vector<8x1xf32>
    %c0_25 = arith.constant 0 : index
    %c0_26 = arith.constant 0 : index
    %31 = vector.load %arg10[%c0_25, %c0_26] : memref<1x1xf32, #tpu.memory_space<vmem>>, vector<1x1xf32>
    %32 = vector.broadcast %31 : vector<1x1xf32> to vector<8x1xf32>
    %33 = arith.addf %30, %32 : vector<8x1xf32>
    %c0_27 = arith.constant 0 : index
    %c0_28 = arith.constant 0 : index
    %34 = vector.load %arg11[%c0_27, %c0_28] : memref<8x1xf32, #tpu.memory_space<vmem>>, vector<8x1xf32>
    tpu.vector_store %arg11[%c0_27, %c0_28], %33 {strides = array<i32>} : memref<8x1xf32, #tpu.memory_space<vmem>>, vector<8x1xf32>,
    return
  }
  func.func @transform_0(%arg0: i32) -> (i32, i32) {
    %c0_i32 = arith.constant 0 : i32
    %c0_i32_0 = arith.constant 0 : i32
    return %arg0, %c0_i32 : i32, i32
  }
  func.func @transform_1(%arg0: i32) -> (i32, i32) {
    %c0_i32 = arith.constant 0 : i32
    %c0_i32_0 = arith.constant 0 : i32
    %c0_i32_1 = arith.constant 0 : i32
    return %c0_i32, %c0_i32_0 : i32, i32
  }
  func.func @transform_2(%arg0: i32) -> (i32, i32) {
    %c0_i32 = arith.constant 0 : i32
    %c0_i32_0 = arith.constant 0 : i32
    %c0_i32_1 = arith.constant 0 : i32
    return %c0_i32, %c0_i32_0 : i32, i32
  }
  func.func @transform_3(%arg0: i32) -> (i32, i32) {
    %c0_i32 = arith.constant 0 : i32
    %c0_i32_0 = arith.constant 0 : i32
    %c0_i32_1 = arith.constant 0 : i32
    return %c0_i32, %c0_i32_0 : i32, i32
  }
  func.func @transform_4(%arg0: i32) -> (i32, i32) {
    %c0_i32 = arith.constant 0 : i32
    %c0_i32_0 = arith.constant 0 : i32
    %c0_i32_1 = arith.constant 0 : i32
    return %c0_i32, %c0_i32_0 : i32, i32
  }
  func.func @transform_5(%arg0: i32) -> (i32, i32) {
    %c0_i32 = arith.constant 0 : i32
    %c0_i32_0 = arith.constant 0 : i32
    %c0_i32_1 = arith.constant 0 : i32
    return %c0_i32, %c0_i32_0 : i32, i32
  }
  func.func @transform_6(%arg0: i32) -> (i32, i32) {
    %c0_i32 = arith.constant 0 : i32
    %c0_i32_0 = arith.constant 0 : i32
    %c0_i32_1 = arith.constant 0 : i32
    return %c0_i32, %c0_i32_0 : i32, i32
  }
  func.func @transform_7(%arg0: i32) -> (i32, i32) {
    %c0_i32 = arith.constant 0 : i32
    %c0_i32_0 = arith.constant 0 : i32
    %c0_i32_1 = arith.constant 0 : i32
    return %c0_i32, %c0_i32_0 : i32, i32
  }
  func.func @transform_8(%arg0: i32) -> (i32, i32) {
    %c0_i32 = arith.constant 0 : i32
    %c0_i32_0 = arith.constant 0 : i32
    %c0_i32_1 = arith.constant 0 : i32
    return %c0_i32, %c0_i32_0 : i32, i32
  }
  func.func @transform_9(%arg0: i32) -> (i32, i32) {
    %c0_i32 = arith.constant 0 : i32
    %c0_i32_0 = arith.constant 0 : i32
    %c0_i32_1 = arith.constant 0 : i32
    return %c0_i32, %c0_i32_0 : i32, i32
  }
  func.func @transform_10(%arg0: i32) -> (i32, i32) {
    %c0_i32 = arith.constant 0 : i32
    %c0_i32_0 = arith.constant 0 : i32
    return %arg0, %c0_i32 : i32, i32
  }
}

</mosaic_0001>

<bundles_post_ra>
// kernel: tpu_custom_call.1
= control target key start
LH: loop header
LB: loop body
LE: loop exit
PB: predicated region body
PF: predicated region fallthrough
CT: control target
= control target key end

     0   :  { %s8663_s0 = inlined_call_operand.vmem [shape: bf16[832,49], index: 0, kind: input, shape index: {}]   ;;  %s8664_s1 = inlined_call_operand.hbm [shape: bf16[49,64], index: 1, kind: input, shape index: {}]   ;;  %s8665_s2 = inlined_call_operand.hbm [shape: f32[1,64], index: 2, kind: input, shape index: {}]   ;;  %s8666_s3 = inlined_call_operand.hbm [shape: bf16[64,800], index: 3, kind: input, shape index: {}]   ;;  %s8667_s4 = inlined_call_operand.hbm [shape: bf16[64,800], index: 4, kind: input, shape index: {}]   ;;  %s8668_s5 = inlined_call_operand.hbm [shape: f32[1,800], index: 5, kind: input, shape index: {}]   ;;  %s8669_s6 = inlined_call_operand.hbm [shape: bf16[800,800], index: 6, kind: input, shape index: {}]   ;;  %s8670_s7 = inlined_call_operand.hbm [shape: f32[1,800], index: 7, kind: input, shape index: {}]   ;;  %s8671_s8 = inlined_call_operand.vmem [shape: f32[800,1], index: 8, kind: input, shape index: {}]   ;;  %s8672_s9 = inlined_call_operand.<no memory space> [shape: f32[1,1], index: 9, kind: input, shape index: {}]   ;;  %s8673_s10 = inlined_call_operand.vmem [shape: f32[8,1], index: 10, kind: output, shape index: {}]  }
   0x1   :  { %v15_v0 = vstv %s8672_s9 }
   0x2   :  { %16 = vst [vmem:[#allocation2] sm:$0x1] %v15_v0 }
   0x3   :  { %17 = vsyncpa [#allocation4], 0 }
   0x4   :  { %18 = vsyncpa [#allocation6], 0 }
   0x5   :  { %19 = vsyncpa [#allocation9], 0 }
   0x6   :  { %20 = vsyncpa [#allocation12], 0  ;;  %s7476_s15 = smov [#allocation5]  }
   0x7   :  { %s41_s16 = sshll.u32 %s7476_s15, 4  ;;  %s42_s16 = int_to_ptr.vmem [resolvable:$true] %s41_s16 }
   0x8   :  { %s7336_s17 = scalar_lea.vmem %s42_s16, 16  ;;  %s7340_s18 = scalar_lea.vmem %s42_s16, 32 }
   0x9   :  { %p7337_p0 = scmp.ne.s32.totalorder %s42_s16, %s7336_s17  ;;  %p7341_p1 = scmp.lt.s32.totalorder %s42_s16, %s42_s16 }
   0xa   :  { %p7342_p2 = scmp.lt.s32.totalorder %s7340_s18, %s7336_s17 }
   0xc   :  { %p7343_p3 = por %p7342_p2, %p7341_p1 }
   0xe   :  { %p7344_p4 = pnand %p7343_p3, %p7337_p0 }
  0x10   :  { %7347 = shalt.err (!%p7344_p4)
}
  0x11   :  { %44 = dma.hbm_to_vmem [thread:$0]  %s8665_s2, 16, %s42_s16, [#allocation6]  }
  0x12   :  { %s7477_s9 = smov [#allocation8]   ;;  %s7478_s22 = smov [#allocation11]  }
  0x13   :  { %s62_s21 = sshll.u32 %s7477_s9, 4  ;;  %s84_s23 = sshll.u32 %s7478_s22, 4  ;;  %s63_s21 = int_to_ptr.vmem [resolvable:$true] %s62_s21  ;;  %s85_s23 = int_to_ptr.vmem [resolvable:$true] %s84_s23 }
  0x14   :  { %s7356_s24 = scalar_lea.vmem %s63_s21, 3584  ;;  %p7361_p6 = scmp.lt.s32.totalorder %s63_s21, %s63_s21 }
  0x15   :  { %p7357_p5 = scmp.ne.s32.totalorder %s63_s21, %s7356_s24  ;;  %p7362_p7 = scmp.lt.s32.totalorder %s7356_s24, %s7356_s24 }
  0x17   :  { %p7363_p8 = por %p7362_p7, %p7361_p6 }
  0x19   :  { %p7364_p9 = pnand %p7363_p8, %p7357_p5 }
  0x1b   :  { %7367 = shalt.err (!%p7364_p9)
}
  0x1c   :  { %s7479_s25 = smov 448   ;;  %s7480_s26 = smov 28  }
  0x1d   :  { %68 = dma.hbm_to_vmem [thread:$0]  %s8667_s4, 3584, %s63_s21, [#allocation9], %s7479_s25, %s7479_s25, %s7480_s26  }
  0x1e   :  { %s7376_s2 = scalar_lea.vmem %s85_s23, 44800  ;;  %p7381_p11 = scmp.lt.s32.totalorder %s85_s23, %s85_s23 }
  0x1f   :  { %p7377_p10 = scmp.ne.s32.totalorder %s85_s23, %s7376_s2  ;;  %p7382_p12 = scmp.lt.s32.totalorder %s7376_s2, %s7376_s2 }
  0x21   :  { %p7383_p13 = por %p7382_p12, %p7381_p11 }
  0x23   :  { %p7384_p0 = pnand %p7383_p13, %p7377_p10 }
  0x25   :  { %7387 = shalt.err (!%p7384_p0)
}
  0x26   :  { %90 = dma.hbm_to_vmem [thread:$0]  %s8669_s6, 44800, %s85_s23, [#allocation12], %s7479_s25, %s7479_s25, %s7480_s26  }
  0x27   :  { %s7481_s11 = smov [#allocation3]  }
  0x28   :  { %s28_s12 = sshll.u32 %s7481_s11, 4  ;;  %s29_s12 = int_to_ptr.vmem [resolvable:$true] %s28_s12 }
  0x29   :  { %s7396_s13 = scalar_lea.vmem %s29_s12, 448  ;;  %p7401_p2 = scmp.lt.s32.totalorder %s29_s12, %s29_s12 }
  0x2a   :  { %p7397_p1 = scmp.ne.s32.totalorder %s29_s12, %s7396_s13  ;;  %p7402_p3 = scmp.lt.s32.totalorder %s7396_s13, %s7396_s13 }
  0x2c   :  { %p7403_p4 = por %p7402_p3, %p7401_p2 }
  0x2e   :  { %p7404_p5 = pnand %p7403_p4, %p7397_p1 }
  0x30   :  { %7407 = shalt.err (!%p7404_p5)
}
  0x31   :  { %s7482_s4 = smov 64   ;;  %s7483_s14 = smov 4  }
  0x32   :  { %34 = dma.hbm_to_vmem [thread:$0]  %s8664_s1, 448, %s29_s12, [#allocation4], %s7482_s4, %s7482_s4, %s7483_s14  }
  0x33   :  { %s7484_s17 = smov [#allocation7]   ;;  %s7485_s19 = smov [#allocation10]  }
  0x34   :  { %s50_s18 = sshll.u32 %s7484_s17, 4  ;;  %s75_s6 = sshll.u32 %s7485_s19, 4  ;;  %s51_s18 = int_to_ptr.vmem [resolvable:$true] %s50_s18  ;;  %s76_s6 = int_to_ptr.vmem [resolvable:$true] %s75_s6 }
  0x35   :  { %s7416_s20 = scalar_lea.vmem %s51_s18, 3584  ;;  %p7421_p7 = scmp.lt.s32.totalorder %s51_s18, %s51_s18 }
  0x36   :  { %p7417_p6 = scmp.ne.s32.totalorder %s51_s18, %s7416_s20  ;;  %p7422_p8 = scmp.lt.s32.totalorder %s7416_s20, %s7416_s20 }
  0x38   :  { %p7423_p9 = por %p7422_p8, %p7421_p7 }
  0x3a   :  { %p7424_p10 = pnand %p7423_p9, %p7417_p6 }
  0x3c   :  { %7427 = shalt.err (!%p7424_p10)
}
  0x3d   :  { %56 = dma.hbm_to_vmem [thread:$0]  %s8666_s3, 3584, %s51_s18, [#allocation6], %s7479_s25, %s7479_s25, %s7480_s26  }
  0x3e   :  { %s7436_s1 = scalar_lea.vmem %s76_s6, 112  ;;  %s7440_s22 = scalar_lea.vmem %s76_s6, 128 }
  0x3f   :  { %p7437_p11 = scmp.ne.s32.totalorder %s76_s6, %s7436_s1  ;;  %p7441_p12 = scmp.lt.s32.totalorder %s76_s6, %s76_s6 }
  0x40   :  { %p7442_p13 = scmp.lt.s32.totalorder %s7440_s22, %s7436_s1 }
  0x42   :  { %p7443_p0 = por %p7442_p13, %p7441_p12 }
  0x44   :  { %p7444_p1 = pnand %p7443_p0, %p7437_p11 }
  0x46   :  { %7447 = shalt.err (!%p7444_p1)
}
  0x47   :  { %78 = dma.hbm_to_vmem [thread:$0]  %s8668_s5, 112, %s76_s6, [#allocation9]  }
  0x48   :  { %s7486_s27 = smov [#allocation13]  }
  0x49   :  { %s97_s28 = sshll.u32 %s7486_s27, 4  ;;  %s98_s28 = int_to_ptr.vmem [resolvable:$true] %s97_s28 }
  0x4a   :  { %s7456_s2 = scalar_lea.vmem %s98_s28, 112  ;;  %s7460_s29 = scalar_lea.vmem %s98_s28, 128 }
  0x4b   :  { %p7457_p2 = scmp.ne.s32.totalorder %s98_s28, %s7456_s2  ;;  %p7461_p3 = scmp.lt.s32.totalorder %s98_s28, %s98_s28 }
  0x4c   :  { %p7462_p4 = scmp.lt.s32.totalorder %s7460_s29, %s7456_s2 }
  0x4e   :  { %p7463_p5 = por %p7462_p4, %p7461_p3 }
  0x50   :  { %p7464_p6 = pnand %p7463_p5, %p7457_p2 }
  0x52   :  { %7467 = shalt.err (!%p7464_p6)
}
  0x53   :  { %100 = dma.hbm_to_vmem [thread:$0]  %s8670_s7, 112, %s98_s28, [#allocation12]  }
  0x54   :  { %7468 = dma.done.wait [#allocation4], 448  }
  0x55   :  { %7469 = vsyncadd [#allocation4], 4294966848 }
  0x56   :  { %7470 = dma.done.wait [#allocation6], 3600  }
  0x57   :  { %7471 = vsyncadd [#allocation6], 4294963696 }
  0x58   :  { %7472 = dma.done.wait [#allocation9], 3696  }
  0x59   :  { %7473 = vsyncadd [#allocation9], 4294963600 }
  0x5a   :  { %7474 = dma.done.wait [#allocation12], 44912  }
  0x5b   :  { %7475 = vsyncadd [#allocation12], 4294922384  ;;  %v7487_v1 = vmov 0   ;;  %vm683_vm0 = vcmask 1040384   ;;  %v6692_v5 = vld [vmem:[#allocation3 + $0x10] sm:$0xff]   ;;  %vm526_vm1 = vcmask 400384  }
  0x5c   :  { %1925 = vmatprep.mubr.bf16.mxu1 %v7487_v1  ;;  %v685_v2 = vsel %vm683_vm0, 65535, %v7487_v1  ;;  %v6691_v3 = vld [vmem:[#allocation3 + $0x18] ss:$0 sps:$4 sm:$0x11]   ;;  %v6695_v6 = vld [vmem:[%s8663_s0] sm:$0xff]   ;;  %v6693_v7 = vld [vmem:[#allocation3 + $0x8] sm:$0xff]  }
  0x5d   :  { %v687_v4 = vand.u32 %v6691_v3, %v685_v2  ;;  %6530 = vmatprep.mubr.msk.bf16.mxu0 %vm526_vm1, %v6695_v6  ;;  %v6694_v8 = vld [vmem:[#allocation3] sm:$0xff]   ;;  %v6697_v10 = vld [vmem:[%s8663_s0 + $0x10] sm:$0xff]   ;;  %v6698_v11 = vld [vmem:[%s8663_s0 + $0x18] sm:$0xff]   ;;  %vm1138_vm2 = vcmask 523264   ;;  %vm1731_vm3 = vcmask 1041409   ;;  %vm1733_vm4 = vcmask 1042434  }
  0x5e   :  { %v6696_v9 = vld [vmem:[%s8663_s0 + $0x8] sm:$0xff]   ;;  %v6699_v12 = vld [vmem:[%s8663_s0 + $0x20] sm:$0xff]   ;;  %v6701_v14 = vld [vmem:[%s8663_s0 + $0x30] sm:$0xff]   ;;  %vm1735_vm5 = vcmask 1043459   ;;  %vm1737_vm6 = vcmask 1044484   ;;  %vm1739_vm7 = vcmask 1045509  }
  0x5f   :  { %6522 = vmatprep.subr.bf16.mxu0 %v687_v4  ;;  %v6700_v13 = vld [vmem:[%s8663_s0 + $0x28] sm:$0xff]   ;;  %v6702_v15 = vld [vmem:[%s8663_s0 + $0x38] sm:$0xff]   ;;  %v6703_v16 = vld [vmem:[%s8663_s0 + $0x40] sm:$0xff]   ;;  %vm1741_vm8 = vcmask 1046534   ;;  %vm1743_vm9 = vcmask 1047559   ;;  %vm7489_vm10 = vmmov 0  }
  0x60   :  { %6523 = vmatpush3.bf16.msra.mxu0 %v687_v4  ;;  %v6704_v17 = vld [vmem:[%s8663_s0 + $0x48] sm:$0xff]   ;;  %v6705_v18 = vld [vmem:[%s8663_s0 + $0x50] sm:$0xff]   ;;  %v6706_v19 = vld [vmem:[%s8663_s0 + $0x58] sm:$0xff]   ;;  %vm4685_vm11 = vcmask 261120   ;;  %vm5738_vm12 = vcmask 7168  }
  0x61   :  { %6524 = vmatprep.subr.bf16.mxu0 %v6692_v5  ;;  %v6707_v20 = vld [vmem:[%s8663_s0 + $0x60] sm:$0xff]   ;;  %v6708_v21 = vld [vmem:[%s8663_s0 + $0x68] sm:$0xff]   ;;  %v6709_v22 = vld [vmem:[%s8663_s0 + $0x70] sm:$0xff]  }
  0x62   :  { %v6710_v23 = vld [vmem:[%s8663_s0 + $0x78] sm:$0xff]   ;;  %v6711_v24 = vld [vmem:[%s8663_s0 + $0x80] sm:$0xff]   ;;  %v6712_v25 = vld [vmem:[%s8663_s0 + $0x88] sm:$0xff]  }
  0x63   :  { %v6713_v26 = vld [vmem:[%s8663_s0 + $0x90] sm:$0xff]   ;;  %v6714_v27 = vld [vmem:[%s8663_s0 + $0x98] sm:$0xff]   ;;  %v6715_v28 = vld [vmem:[%s8663_s0 + $0xa0] sm:$0xff]  }
  0x64   :  { %6525 = vmatpush3.bf16.msra.mxu0 %v6692_v5  ;;  %v6716_v29 = vld [vmem:[%s8663_s0 + $0xa8] sm:$0xff]   ;;  %v6717_v30 = vld [vmem:[%s8663_s0 + $0xb0] sm:$0xff]   ;;  %v6718_v31 = vld [vmem:[%s8663_s0 + $0xb8] sm:$0xff]  }
  0x65   :  { %6526 = vmatprep.subr.bf16.mxu0 %v6693_v7  ;;  %v6719_v32 = vld [vmem:[%s8663_s0 + $0xc0] sm:$0xff]   ;;  %v6720_v33 = vld [vmem:[%s8663_s0 + $0xc8] sm:$0xff]   ;;  %v6721_v34 = vld [vmem:[%s8663_s0 + $0xd0] sm:$0xff]  }
  0x66   :  { %v6722_v35 = vld [vmem:[%s8663_s0 + $0xd8] sm:$0xff]   ;;  %v6723_v36 = vld [vmem:[%s8663_s0 + $0xe0] sm:$0xff]   ;;  %v6724_v37 = vld [vmem:[%s8663_s0 + $0xe8] sm:$0xff]  }
  0x67   :  { %v6725_v38 = vld [vmem:[%s8663_s0 + $0xf0] sm:$0xff]   ;;  %v6726_v39 = vld [vmem:[%s8663_s0 + $0xf8] sm:$0xff]   ;;  %v6727_v40 = vld [vmem:[%s8663_s0 + $0x100] sm:$0xff]  }
  0x68   :  { %6527 = vmatpush3.bf16.msra.mxu0 %v6693_v7  ;;  %v6728_v41 = vld [vmem:[%s8663_s0 + $0x108] sm:$0xff]   ;;  %v6729_v42 = vld [vmem:[%s8663_s0 + $0x110] sm:$0xff]   ;;  %v6730_v43 = vld [vmem:[%s8663_s0 + $0x118] sm:$0xff]  }
  0x69   :  { %6528 = vmatprep.subr.bf16.mxu0 %v6694_v8  ;;  %v6731_v44 = vld [vmem:[%s8663_s0 + $0x120] sm:$0xff]   ;;  %v6732_v45 = vld [vmem:[%s8663_s0 + $0x128] sm:$0xff]   ;;  %v6733_v46 = vld [vmem:[%s8663_s0 + $0x130] sm:$0xff]  }
  0x6a   :  { %v6734_v47 = vld [vmem:[%s8663_s0 + $0x138] sm:$0xff]   ;;  %v6735_v48 = vld [vmem:[%s8663_s0 + $0x140] sm:$0xff]   ;;  %v6736_v49 = vld [vmem:[%s8663_s0 + $0x148] sm:$0xff]  }
  0x6b   :  { %v6737_v50 = vld [vmem:[%s8663_s0 + $0x150] sm:$0xff]   ;;  %v6738_v51 = vld [vmem:[%s8663_s0 + $0x158] sm:$0xff]   ;;  %v6739_v52 = vld [vmem:[%s8663_s0 + $0x160] sm:$0xff]  }
  0x6c   :  { %6529 = vmatpush3.bf16.msra.mxu0 %v6694_v8  ;;  %v6740_v53 = vld [vmem:[%s8663_s0 + $0x168] sm:$0xff]   ;;  %v6741_v54 = vld [vmem:[%s8663_s0 + $0x170] sm:$0xff]   ;;  %v6742_v55 = vld [vmem:[%s8663_s0 + $0x178] sm:$0xff]  }
  0x6d   :  { %v6743_v56 = vld [vmem:[%s8663_s0 + $0x180] sm:$0xff]   ;;  %v6744_v57 = vld [vmem:[%s8663_s0 + $0x188] sm:$0xff]   ;;  %v6745_v58 = vld [vmem:[%s8663_s0 + $0x190] sm:$0xff]  }
  0x6e   :  { %v7784_v61 = vld [vmem:[#allocation5] ss:$0 sm:$0xff] }
  0x6f   :  { %6531 = vmatmul.mubr.msk.bf16.vlgmr.msra.gmra.mxu0 %vm526_vm1, %v6696_v9  ;;  %v6746_v0 = vld [vmem:[%s8663_s0 + $0x198] sm:$0xff]  }
  0x70   :  { %6534 = vmatprep.mubr.msk.bf16.mxu0 %vm526_vm1, %v6697_v10 }
  0x77   :  { %6535 = vmatmul.mubr.msk.bf16.gmra.mxu0 %vm526_vm1, %v6698_v11 }
  0x78   :  { %6538 = vmatprep.mubr.msk.bf16.mxu0 %vm526_vm1, %v6699_v12 }
  0x7f   :  { %6539 = vmatmul.mubr.msk.bf16.gmra.mxu0 %vm526_vm1, %v6700_v13 }
  0x80   :  { %6542 = vmatprep.mubr.msk.bf16.mxu0 %vm526_vm1, %v6701_v14 }
  0x87   :  { %6543 = vmatmul.mubr.msk.bf16.gmra.mxu0 %vm526_vm1, %v6702_v15 }
  0x88   :  { %6546 = vmatprep.mubr.msk.bf16.mxu0 %vm526_vm1, %v6703_v16 }
  0x8f   :  { %6547 = vmatmul.mubr.msk.bf16.gmra.mxu0 %vm526_vm1, %v6704_v17 }
  0x90   :  { %6550 = vmatprep.mubr.msk.bf16.mxu0 %vm526_vm1, %v6705_v18 }
  0x97   :  { %6551 = vmatmul.mubr.msk.bf16.gmra.mxu0 %vm526_vm1, %v6706_v19 }
  0x98   :  { %6554 = vmatprep.mubr.msk.bf16.mxu0 %vm526_vm1, %v6707_v20 }
  0x9f   :  { %6555 = vmatmul.mubr.msk.bf16.gmra.mxu0 %vm526_vm1, %v6708_v21 }
  0xa0   :  { %6558 = vmatprep.mubr.msk.bf16.mxu0 %vm526_vm1, %v6709_v22 }
  0xa7   :  { %6559 = vmatmul.mubr.msk.bf16.gmra.mxu0 %vm526_vm1, %v6710_v23 }
  0xa8   :  { %6562 = vmatprep.mubr.msk.bf16.mxu0 %vm526_vm1, %v6711_v24 }
  0xaf   :  { %6563 = vmatmul.mubr.msk.bf16.gmra.mxu0 %vm526_vm1, %v6712_v25 }
  0xb0   :  { %6566 = vmatprep.mubr.msk.bf16.mxu0 %vm526_vm1, %v6713_v26 }
  0xb7   :  { %6567 = vmatmul.mubr.msk.bf16.gmra.mxu0 %vm526_vm1, %v6714_v27 }
  0xb8   :  { %6570 = vmatprep.mubr.msk.bf16.mxu0 %vm526_vm1, %v6715_v28 }
  0xbf   :  { %6571 = vmatmul.mubr.msk.bf16.gmra.mxu0 %vm526_vm1, %v6716_v29 }
  0xc0   :  { %6574 = vmatprep.mubr.msk.bf16.mxu0 %vm526_vm1, %v6717_v30 }
  0xc7   :  { %6575 = vmatmul.mubr.msk.bf16.gmra.mxu0 %vm526_vm1, %v6718_v31 }
  0xc8   :  { %6578 = vmatprep.mubr.msk.bf16.mxu0 %vm526_vm1, %v6719_v32 }
  0xcf   :  { %6579 = vmatmul.mubr.msk.bf16.gmra.mxu0 %vm526_vm1, %v6720_v33 }
  0xd0   :  { %6582 = vmatprep.mubr.msk.bf16.mxu0 %vm526_vm1, %v6721_v34 }
  0xd7   :  { %6583 = vmatmul.mubr.msk.bf16.gmra.mxu0 %vm526_vm1, %v6722_v35 }
  0xd8   :  { %6586 = vmatprep.mubr.msk.bf16.mxu0 %vm526_vm1, %v6723_v36 }
  0xdf   :  { %6587 = vmatmul.mubr.msk.bf16.gmra.mxu0 %vm526_vm1, %v6724_v37 }
  0xe0   :  { %6590 = vmatprep.mubr.msk.bf16.mxu0 %vm526_vm1, %v6725_v38 }
  0xe7   :  { %6591 = vmatmul.mubr.msk.bf16.gmra.mxu0 %vm526_vm1, %v6726_v39 }
  0xe8   :  { %6594 = vmatprep.mubr.msk.bf16.mxu0 %vm526_vm1, %v6727_v40 }
  0xef   :  { %6595 = vmatmul.mubr.msk.bf16.gmra.mxu0 %vm526_vm1, %v6728_v41 }
  0xf0   :  { %6598 = vmatprep.mubr.msk.bf16.mxu0 %vm526_vm1, %v6729_v42 }
  0xf7   :  { %6599 = vmatmul.mubr.msk.bf16.gmra.mxu0 %vm526_vm1, %v6730_v43 }
  0xf8   :  { %6602 = vmatprep.mubr.msk.bf16.mxu0 %vm526_vm1, %v6731_v44 }
  0xff   :  { %6603 = vmatmul.mubr.msk.bf16.gmra.mxu0 %vm526_vm1, %v6732_v45 }
 0x100   :  { %6606 = vmatprep.mubr.msk.bf16.mxu0 %vm526_vm1, %v6733_v46 }
 0x107   :  { %6607 = vmatmul.mubr.msk.bf16.gmra.mxu0 %vm526_vm1, %v6734_v47 }
 0x108   :  { %6610 = vmatprep.mubr.msk.bf16.mxu0 %vm526_vm1, %v6735_v48 }
 0x10f   :  { %6611 = vmatmul.mubr.msk.bf16.gmra.mxu0 %vm526_vm1, %v6736_v49 }
 0x110   :  { %6614 = vmatprep.mubr.msk.bf16.mxu0 %vm526_vm1, %v6737_v50 }
 0x117   :  { %6615 = vmatmul.mubr.msk.bf16.gmra.mxu0 %vm526_vm1, %v6738_v51 }
 0x118   :  { %6618 = vmatprep.mubr.msk.bf16.mxu0 %vm526_vm1, %v6739_v52 }
 0x11f   :  { %6619 = vmatmul.mubr.msk.bf16.gmra.mxu0 %vm526_vm1, %v6740_v53 }
 0x120   :  { %6622 = vmatprep.mubr.msk.bf16.mxu0 %vm526_vm1, %v6741_v54 }
 0x127   :  { %6623 = vmatmul.mubr.msk.bf16.gmra.mxu0 %vm526_vm1, %v6742_v55 }
 0x128   :  { %6626 = vmatprep.mubr.msk.bf16.mxu0 %vm526_vm1, %v6743_v56 }
 0x12f   :  { %v6532_v59 = vpop.f32.mrf.mxu0  ;;  %6627 = vmatmul.mubr.msk.bf16.gmra.mxu0 %vm526_vm1, %v6744_v57 }
 0x130   :  { %6630 = vmatprep.mubr.msk.bf16.mxu0 %vm526_vm1, %v6745_v58  ;;  %v732_v3 = vadd.f32 %v6532_v59, %v7784_v61 }
 0x131   :  { %v723_v60 = vpop.f32.mrf.mxu0 }
 0x132   :  { %v724_v62 = vadd.f32 %v7784_v61, %v723_v60  ;;  %v1142_v14 = vsel %vm1138_vm2, %v732_v3, -inf  ;;  %v1390_v15 = vsel %vm1138_vm2, %v732_v3, inf }
 0x133   :  { %v6533_v63 = vpop.f32.mrf.mxu0 }
 0x134   :  { %v1139_v5 = vsel %vm1138_vm2, %v724_v62, -inf  ;;  %v1387_v7 = vsel %vm1138_vm2, %v724_v62, inf  ;;  %v735_v8 = vadd.f32 %v6533_v63, %v7784_v61 }
 0x135   :  { %v726_v2 = vpop.f32.mrf.mxu0 }
 0x136   :  { %v727_v4 = vadd.f32 %v7784_v61, %v726_v2  ;;  %v1144_v20 = vsel %vm1138_vm2, %v735_v8, -inf  ;;  %v1392_v21 = vsel %vm1138_vm2, %v735_v8, inf }
 0x137   :  { %v6536_v6 = vpop.f32.mrf.mxu0  ;;  %6631 = vmatmul.mubr.msk.bf16.gmra.mxu0 %vm526_vm1, %v6746_v0 }
 0x138   :  { %v1140_v9 = vsel %vm1138_vm2, %v727_v4, -inf  ;;  %v1388_v10 = vsel %vm1138_vm2, %v727_v4, inf  ;;  %v748_v25 = vadd.f32 %v6536_v6, %v7784_v61 }
 0x139   :  { %v1141_v11 = vmax.f32 %v1139_v5, %v1140_v9  ;;  %v1389_v12 = vmin.f32 %v1387_v7, %v1388_v10  ;;  %v739_v13 = vpop.f32.mrf.mxu0 }
 0x13a   :  { %v740_v16 = vadd.f32 %v7784_v61, %v739_v13  ;;  %v1150_v38 = vsel %vm1138_vm2, %v748_v25, -inf  ;;  %v1398_v39 = vsel %vm1138_vm2, %v748_v25, inf }
 0x13b   :  { %v1143_v17 = vmax.f32 %v1141_v11, %v1142_v14  ;;  %v1391_v18 = vmin.f32 %v1389_v12, %v1390_v15  ;;  %v6537_v19 = vpop.f32.mrf.mxu0 }
 0x13c   :  { %v1146_v26 = vsel %vm1138_vm2, %v740_v16, -inf  ;;  %v1394_v27 = vsel %vm1138_vm2, %v740_v16, inf  ;;  %v751_v32 = vadd.f32 %v6537_v19, %v7784_v61 }
 0x13d   :  { %v1145_v22 = vmax.f32 %v1143_v17, %v1144_v20  ;;  %v1393_v23 = vmin.f32 %v1391_v18, %v1392_v21  ;;  %v742_v24 = vpop.f32.mrf.mxu0 }
 0x13e   :  { %v743_v28 = vadd.f32 %v7784_v61, %v742_v24  ;;  %v1152_v44 = vsel %vm1138_vm2, %v751_v32, -inf  ;;  %v1400_v45 = vsel %vm1138_vm2, %v751_v32, inf }
 0x13f   :  { %v1147_v29 = vmax.f32 %v1145_v22, %v1146_v26  ;;  %v1395_v30 = vmin.f32 %v1393_v23, %v1394_v27  ;;  %v6540_v31 = vpop.f32.mrf.mxu0 }
 0x140   :  { %v1148_v33 = vsel %vm1138_vm2, %v743_v28, -inf  ;;  %v1396_v34 = vsel %vm1138_vm2, %v743_v28, inf  ;;  %v764_v49 = vadd.f32 %v6540_v31, %v7784_v61 }
 0x141   :  { %v1149_v35 = vmax.f32 %v1147_v29, %v1148_v33  ;;  %v1397_v36 = vmin.f32 %v1395_v30, %v1396_v34  ;;  %v755_v37 = vpop.f32.mrf.mxu0 }
 0x142   :  { %v756_v40 = vadd.f32 %v7784_v61, %v755_v37  ;;  %v1158_v63 = vsel %vm1138_vm2, %v764_v49, -inf  ;;  %v1406_v0 = vsel %vm1138_vm2, %v764_v49, inf }
 0x143   :  { %v1151_v41 = vmax.f32 %v1149_v35, %v1150_v38  ;;  %v1399_v42 = vmin.f32 %v1397_v36, %v1398_v39  ;;  %v6541_v43 = vpop.f32.mrf.mxu0 }
 0x144   :  { %v1154_v50 = vsel %vm1138_vm2, %v756_v40, -inf  ;;  %v1402_v51 = vsel %vm1138_vm2, %v756_v40, inf  ;;  %v767_v56 = vadd.f32 %v6541_v43, %v7784_v61 }
 0x145   :  { %v1153_v46 = vmax.f32 %v1151_v41, %v1152_v44  ;;  %v1401_v47 = vmin.f32 %v1399_v42, %v1400_v45  ;;  %v758_v48 = vpop.f32.mrf.mxu0 }
 0x146   :  { %v759_v52 = vadd.f32 %v7784_v61, %v758_v48  ;;  %v1160_v6 = vsel %vm1138_vm2, %v767_v56, -inf  ;;  %v1408_v7 = vsel %vm1138_vm2, %v767_v56, inf }
 0x147   :  { %v1155_v53 = vmax.f32 %v1153_v46, %v1154_v50  ;;  %v1403_v54 = vmin.f32 %v1401_v47, %v1402_v51  ;;  %v6544_v55 = vpop.f32.mrf.mxu0 }
 0x148   :  { %v1156_v57 = vsel %vm1138_vm2, %v759_v52, -inf  ;;  %v1404_v58 = vsel %vm1138_vm2, %v759_v52, inf  ;;  %v780_v8 = vadd.f32 %v6544_v55, %v7784_v61 }
 0x149   :  { %v1157_v59 = vmax.f32 %v1155_v53, %v1156_v57  ;;  %v1405_v60 = vmin.f32 %v1403_v54, %v1404_v58  ;;  %v771_v62 = vpop.f32.mrf.mxu0 }
 0x14a   :  { %v772_v2 = vadd.f32 %v7784_v61, %v771_v62  ;;  %v1171_v19 = vsel %vm1138_vm2, %v780_v8, -inf  ;;  %v1419_v20 = vsel %vm1138_vm2, %v780_v8, inf }
 0x14b   :  { %v1159_v3 = vmax.f32 %v1157_v59, %v1158_v63  ;;  %v1407_v4 = vmin.f32 %v1405_v60, %v1406_v0  ;;  %v6545_v5 = vpop.f32.mrf.mxu0 }
 0x14c   :  { %v1162_v12 = vsel %vm1138_vm2, %v772_v2, -inf  ;;  %v1410_v13 = vsel %vm1138_vm2, %v772_v2, inf  ;;  %v783_v14 = vadd.f32 %v6545_v5, %v7784_v61 }
 0x14d   :  { %v1161_v9 = vmax.f32 %v1159_v3, %v1160_v6  ;;  %v1409_v10 = vmin.f32 %v1407_v4, %v1408_v7  ;;  %v774_v11 = vpop.f32.mrf.mxu0 }
 0x14e   :  { %v775_v15 = vadd.f32 %v7784_v61, %v774_v11  ;;  %v1173_v26 = vsel %vm1138_vm2, %v783_v14, -inf  ;;  %v1421_v27 = vsel %vm1138_vm2, %v783_v14, inf }
 0x14f   :  { %v1163_v16 = vmax.f32 %v1161_v9, %v1162_v12  ;;  %v1411_v17 = vmin.f32 %v1409_v10, %v1410_v13  ;;  %v6548_v18 = vpop.f32.mrf.mxu0 }
 0x150   :  { %v1170_v21 = vsel %vm1138_vm2, %v775_v15, -inf  ;;  %v1418_v22 = vsel %vm1138_vm2, %v775_v15, inf  ;;  %v796_v37 = vadd.f32 %v6548_v18, %v7784_v61 }
 0x151   :  { %v1172_v23 = vmax.f32 %v1170_v21, %v1171_v19  ;;  %v1420_v24 = vmin.f32 %v1418_v22, %v1419_v20  ;;  %v787_v25 = vpop.f32.mrf.mxu0  ;;  %v1164_v39 = vrot.slane %v1163_v16, 4  ;;  %v1412_v40 = vrot.slane %v1411_v17, 4 }
 0x152   :  { %v788_v28 = vadd.f32 %v7784_v61, %v787_v25  ;;  %v1179_v48 = vsel %vm1138_vm2, %v796_v37, -inf  ;;  %v1427_v49 = vsel %vm1138_vm2, %v796_v37, inf }
 0x153   :  { %v1174_v29 = vmax.f32 %v1172_v23, %v1173_v26  ;;  %v1422_v30 = vmin.f32 %v1420_v24, %v1421_v27  ;;  %v6549_v31 = vpop.f32.mrf.mxu0  ;;  %v1165_v51 = vmax.f32 %v1163_v16, %v1164_v39  ;;  %v1413_v52 = vmin.f32 %v1411_v17, %v1412_v40 }
 0x154   :  { %v1175_v32 = vsel %vm1138_vm2, %v788_v28, -inf  ;;  %v1423_v33 = vsel %vm1138_vm2, %v788_v28, inf  ;;  %v799_v42 = vadd.f32 %v6549_v31, %v7784_v61 }
 0x155   :  { %v1176_v34 = vmax.f32 %v1174_v29, %v1175_v32  ;;  %v1424_v35 = vmin.f32 %v1422_v30, %v1423_v33  ;;  %v790_v36 = vpop.f32.mrf.mxu0  ;;  %v1166_v3 = vrot.slane %v1165_v51, 2  ;;  %v1414_v4 = vrot.slane %v1413_v52, 2 }
 0x156   :  { %v791_v38 = vadd.f32 %v7784_v61, %v790_v36  ;;  %v1181_v56 = vsel %vm1138_vm2, %v799_v42, -inf  ;;  %v1429_v57 = vsel %vm1138_vm2, %v799_v42, inf }
 0x157   :  { %v6552_v41 = vpop.f32.mrf.mxu0  ;;  %v1167_v18 = vmax.f32 %v1165_v51, %v1166_v3  ;;  %v1415_v19 = vmin.f32 %v1413_v52, %v1414_v4 }
 0x158   :  { %v1177_v43 = vsel %vm1138_vm2, %v791_v38, -inf  ;;  %v1425_v44 = vsel %vm1138_vm2, %v791_v38, inf  ;;  %v812_v62 = vadd.f32 %v6552_v41, %v7784_v61 }
 0x159   :  { %v1178_v45 = vmax.f32 %v1176_v34, %v1177_v43  ;;  %v1426_v46 = vmin.f32 %v1424_v35, %v1425_v44  ;;  %v803_v47 = vpop.f32.mrf.mxu0  ;;  %v1416_v41 = vrot.slane %v1415_v19, 1 }
 0x15a   :  { %v804_v50 = vadd.f32 %v7784_v61, %v803_v47  ;;  %v1187_v15 = vsel %vm1138_vm2, %v812_v62, -inf  ;;  %v1435_v16 = vsel %vm1138_vm2, %v812_v62, inf }
 0x15b   :  { %v1180_v53 = vmax.f32 %v1178_v45, %v1179_v48  ;;  %v1428_v54 = vmin.f32 %v1426_v46, %v1427_v49  ;;  %v6553_v55 = vpop.f32.mrf.mxu0  ;;  %v1168_v48 = vrot.slane %v1167_v18, 1  ;;  %v1417_v52 = vmin.f32 %v1415_v19, %v1416_v41 }
 0x15c   :  { %v1183_v63 = vsel %vm1138_vm2, %v804_v50, -inf  ;;  %v1431_v0 = vsel %vm1138_vm2, %v804_v50, inf  ;;  %v815_v8 = vadd.f32 %v6553_v55, %v7784_v61 }
 0x15d   :  { %v1182_v58 = vmax.f32 %v1180_v53, %v1181_v56  ;;  %v1430_v59 = vmin.f32 %v1428_v54, %v1429_v57  ;;  %v806_v60 = vpop.f32.mrf.mxu0  ;;  %v1675_v4 = vpack.c.bf16 %v1417_v52, %v1417_v52 }
 0x15e   :  { %v807_v2 = vadd.f32 %v7784_v61, %v806_v60  ;;  %v1189_v23 = vsel %vm1138_vm2, %v815_v8, -inf  ;;  %v1437_v24 = vsel %vm1138_vm2, %v815_v8, inf }
 0x15f   :  { %v1184_v5 = vmax.f32 %v1182_v58, %v1183_v63  ;;  %v1432_v6 = vmin.f32 %v1430_v59, %v1431_v0  ;;  %v6556_v7 = vpop.f32.mrf.mxu0  ;;  %v1169_v63 = vmax.f32 %v1167_v18, %v1168_v48 }
 0x160   :  { %v1185_v9 = vsel %vm1138_vm2, %v807_v2, -inf  ;;  %v1433_v10 = vsel %vm1138_vm2, %v807_v2, inf  ;;  %v828_v11 = vadd.f32 %v6556_v7, %v7784_v61 }
 0x161   :  { %v1186_v12 = vmax.f32 %v1184_v5, %v1185_v9  ;;  %v1434_v13 = vmin.f32 %v1432_v6, %v1433_v10  ;;  %v819_v14 = vpop.f32.mrf.mxu0 }
 0x162   :  { %v820_v17 = vadd.f32 %v7784_v61, %v819_v14  ;;  %v1201_v25 = vsel %vm1138_vm2, %v828_v11, -inf  ;;  %v1449_v27 = vsel %vm1138_vm2, %v828_v11, inf }
 0x163   :  { %v1188_v20 = vmax.f32 %v1186_v12, %v1187_v15  ;;  %v1436_v21 = vmin.f32 %v1434_v13, %v1435_v16  ;;  %v6557_v22 = vpop.f32.mrf.mxu0 }
 0x164   :  { %v831_v26 = vadd.f32 %v6557_v22, %v7784_v61  ;;  %v1191_v29 = vsel %vm1138_vm2, %v820_v17, -inf  ;;  %v1439_v32 = vsel %vm1138_vm2, %v820_v17, inf  ;;  %v1723_v22 = vunpack.c.l.b16 %v1675_v4 }
 0x165   :  { %v1190_v28 = vmax.f32 %v1188_v20, %v1189_v23  ;;  %v1438_v30 = vmin.f32 %v1436_v21, %v1437_v24  ;;  %v822_v31 = vpop.f32.mrf.mxu0  ;;  %v1635_v21 = vpack.c.bf16 %v1169_v63, %v1169_v63 }
 0x166   :  { %v1202_v33 = vsel %vm1138_vm2, %v831_v26, -inf  ;;  %v1450_v34 = vsel %vm1138_vm2, %v831_v26, inf  ;;  %v823_v35 = vadd.f32 %v7784_v61, %v822_v31 }
 0x167   :  { %v1192_v36 = vmax.f32 %v1190_v28, %v1191_v29  ;;  %v1440_v37 = vmin.f32 %v1438_v30, %v1439_v32  ;;  %v1203_v38 = vmax.f32 %v1201_v25, %v1202_v33  ;;  %v1451_v39 = vmin.f32 %v1449_v27, %v1450_v34  ;;  %v6560_v40 = vpop.f32.mrf.mxu0 }
 0x168   :  { %v1193_v42 = vsel %vm1138_vm2, %v823_v35, -inf  ;;  %v1441_v43 = vsel %vm1138_vm2, %v823_v35, inf  ;;  %v844_v60 = vadd.f32 %v6560_v40, %v7784_v61 }
 0x169   :  { %v1194_v44 = vmax.f32 %v1192_v36, %v1193_v42  ;;  %v1442_v45 = vmin.f32 %v1440_v37, %v1441_v43  ;;  %v835_v46 = vpop.f32.mrf.mxu0 }
 0x16a   :  { %v836_v47 = vadd.f32 %v7784_v61, %v835_v46  ;;  %v1208_v13 = vsel %vm1138_vm2, %v844_v60, -inf  ;;  %v1456_v14 = vsel %vm1138_vm2, %v844_v60, inf }
 0x16b   :  { %v1195_v49 = vrot.slane %v1194_v44, 4  ;;  %v1443_v50 = vrot.slane %v1442_v45, 4  ;;  %v6561_v51 = vpop.f32.mrf.mxu0 }
 0x16c   :  { %v1204_v53 = vsel %vm1138_vm2, %v836_v47, -inf  ;;  %v1452_v54 = vsel %vm1138_vm2, %v836_v47, inf  ;;  %v847_v5 = vadd.f32 %v6561_v51, %v7784_v61 }
 0x16d   :  { %v1196_v55 = vmax.f32 %v1194_v44, %v1195_v49  ;;  %v1444_v56 = vmin.f32 %v1442_v45, %v1443_v50  ;;  %v1205_v57 = vmax.f32 %v1203_v38, %v1204_v53  ;;  %v1453_v58 = vmin.f32 %v1451_v39, %v1452_v54  ;;  %v838_v59 = vpop.f32.mrf.mxu0 }
 0x16e   :  { %v839_v62 = vadd.f32 %v7784_v61, %v838_v59  ;;  %v1210_v23 = vsel %vm1138_vm2, %v847_v5, -inf  ;;  %v1458_v24 = vsel %vm1138_vm2, %v847_v5, inf  ;;  %v2064_v39 = vunpack.c.l.b16 %v1635_v21 }
 0x16f   :  { %v1197_v0 = vrot.slane %v1196_v55, 2  ;;  %v1445_v2 = vrot.slane %v1444_v56, 2  ;;  %v6564_v3 = vpop.f32.mrf.mxu0 }
 0x170   :  { %v1206_v6 = vsel %vm1138_vm2, %v839_v62, -inf  ;;  %v1454_v7 = vsel %vm1138_vm2, %v839_v62, inf  ;;  %v860_v30 = vadd.f32 %v6564_v3, %v7784_v61 }
 0x171   :  { %v1198_v8 = vmax.f32 %v1196_v55, %v1197_v0  ;;  %v1446_v9 = vmin.f32 %v1444_v56, %v1445_v2  ;;  %v1207_v10 = vmax.f32 %v1205_v57, %v1206_v6  ;;  %v1455_v11 = vmin.f32 %v1453_v58, %v1454_v7  ;;  %v851_v12 = vpop.f32.mrf.mxu0 }
 0x172   :  { %v852_v15 = vadd.f32 %v7784_v61, %v851_v12  ;;  %v1216_v48 = vsel %vm1138_vm2, %v860_v30, -inf  ;;  %v1464_v49 = vsel %vm1138_vm2, %v860_v30, inf }
 0x173   :  { %v1199_v16 = vrot.slane %v1198_v8, 1  ;;  %v1447_v17 = vrot.slane %v1446_v9, 1  ;;  %v1209_v18 = vmax.f32 %v1207_v10, %v1208_v13  ;;  %v1457_v19 = vmin.f32 %v1455_v11, %v1456_v14  ;;  %v6565_v20 = vpop.f32.mrf.mxu0 }
 0x174   :  { %v1212_v31 = vsel %vm1138_vm2, %v852_v15, -inf  ;;  %v1460_v32 = vsel %vm1138_vm2, %v852_v15, inf  ;;  %v863_v40 = vadd.f32 %v6565_v20, %v7784_v61 }
 0x175   :  { %v1200_v25 = vmax.f32 %v1198_v8, %v1199_v16  ;;  %v1448_v26 = vmin.f32 %v1446_v9, %v1447_v17  ;;  %v1211_v27 = vmax.f32 %v1209_v18, %v1210_v23  ;;  %v1459_v28 = vmin.f32 %v1457_v19, %v1458_v24  ;;  %v854_v29 = vpop.f32.mrf.mxu0 }
 0x176   :  { %v855_v33 = vadd.f32 %v7784_v61, %v854_v29  ;;  %v1218_v56 = vsel %vm1138_vm2, %v863_v40, -inf  ;;  %v1466_v57 = vsel %vm1138_vm2, %v863_v40, inf }
 0x177   :  { %v1636_v34 = vpack.c.bf16 %v1200_v25, %v1200_v25  ;;  %v1676_v35 = vpack.c.bf16 %v1448_v26, %v1448_v26  ;;  %v1213_v36 = vmax.f32 %v1211_v27, %v1212_v31  ;;  %v1461_v37 = vmin.f32 %v1459_v28, %v1460_v32  ;;  %v6568_v38 = vpop.f32.mrf.mxu0  ;;  %v6747_v32 = vld [vmem:[#allocation8 + $0xac] ss:$28 sps:$4 sm:$0xff]  }
 0x178   :  { %v1214_v41 = vsel %vm1138_vm2, %v855_v33, -inf  ;;  %v1462_v42 = vsel %vm1138_vm2, %v855_v33, inf  ;;  %v876_v62 = vadd.f32 %v6568_v38, %v7784_v61  ;;  %1901 = vmatprep.subr.bf16.mxu1 %v6747_v32 }
 0x179   :  { %v1724_v43 = vunpack.c.l.b16 %v1676_v35  ;;  %v2065_v44 = vunpack.c.l.b16 %v1636_v34  ;;  %v1215_v45 = vmax.f32 %v1213_v36, %v1214_v41  ;;  %v1463_v46 = vmin.f32 %v1461_v37, %v1462_v42  ;;  %v867_v47 = vpop.f32.mrf.mxu0  ;;  %v6749_v36 = vld [vmem:[#allocation8 + $0xa8] ss:$28 sps:$4 sm:$0xff]  }
 0x17a   :  { %v868_v50 = vadd.f32 %v7784_v61, %v867_v47  ;;  %v1224_v12 = vsel %vm1138_vm2, %v876_v62, -inf  ;;  %v1472_v13 = vsel %vm1138_vm2, %v876_v62, inf  ;;  %1902 = vmatpush1.bf16.msra.mxu1 %v6749_v36 }
 0x17b   :  { %v7898_v51 = vsel %vm1731_vm3, %v1724_v43, %v1723_v22  ;;  %v7901_v52 = vsel %vm1731_vm3, %v2065_v44, %v2064_v39  ;;  %v1217_v53 = vmax.f32 %v1215_v45, %v1216_v48  ;;  %v1465_v54 = vmin.f32 %v1463_v46, %v1464_v49  ;;  %v6569_v55 = vpop.f32.mrf.mxu0 }
 0x17c   :  { %v1220_v63 = vsel %vm1138_vm2, %v868_v50, -inf  ;;  %v1468_v0 = vsel %vm1138_vm2, %v868_v50, inf  ;;  %v879_v6 = vadd.f32 %v6569_v55, %v7784_v61  ;;  %v6750_v50 = vld [vmem:[#allocation8 + $0x74] ss:$28 sps:$4 sm:$0xff]  }
 0x17d   :  { %v1219_v58 = vmax.f32 %v1217_v53, %v1218_v56  ;;  %v1467_v59 = vmin.f32 %v1465_v54, %v1466_v57  ;;  %v870_v60 = vpop.f32.mrf.mxu0  ;;  %v6752_v55 = vld [vmem:[#allocation8 + $0x70] ss:$28 sps:$4 sm:$0xff]   ;;  %1903 = vmatprep.subr.bf16.mxu1 %v6750_v50 }
 0x17e   :  { %v871_v2 = vadd.f32 %v7784_v61, %v870_v60  ;;  %v1232_v18 = vsel %vm1138_vm2, %v879_v6, -inf  ;;  %v1480_v19 = vsel %vm1138_vm2, %v879_v6, inf  ;;  %1904 = vmatpush1.bf16.msra.mxu1 %v6752_v55 }
 0x17f   :  { %v1221_v3 = vmax.f32 %v1219_v58, %v1220_v63  ;;  %v1469_v4 = vmin.f32 %v1467_v59, %v1468_v0  ;;  %v6572_v5 = vpop.f32.mrf.mxu0 }
 0x180   :  { %v1222_v7 = vsel %vm1138_vm2, %v871_v2, -inf  ;;  %v1470_v8 = vsel %vm1138_vm2, %v871_v2, inf  ;;  %v892_v27 = vadd.f32 %v6572_v5, %v7784_v61 }
 0x181   :  { %v1223_v9 = vmax.f32 %v1221_v3, %v1222_v7  ;;  %v1471_v10 = vmin.f32 %v1469_v4, %v1470_v8  ;;  %v883_v11 = vpop.f32.mrf.mxu0  ;;  %v6753_v8 = vld [vmem:[#allocation8 + $0x3c] ss:$28 sps:$4 sm:$0xff]  }
 0x182   :  { %v884_v14 = vadd.f32 %v7784_v61, %v883_v11  ;;  %v1237_v42 = vsel %vm1138_vm2, %v892_v27, -inf  ;;  %v1485_v43 = vsel %vm1138_vm2, %v892_v27, inf  ;;  %1905 = vmatprep.subr.bf16.mxu1 %v6753_v8 }
 0x183   :  { %v1225_v15 = vmax.f32 %v1223_v9, %v1224_v12  ;;  %v1473_v16 = vmin.f32 %v1471_v10, %v1472_v13  ;;  %v6573_v17 = vpop.f32.mrf.mxu0  ;;  %v6755_v12 = vld [vmem:[#allocation8 + $0x38] ss:$28 sps:$4 sm:$0xff]  }
 0x184   :  { %v1233_v20 = vsel %vm1138_vm2, %v884_v14, -inf  ;;  %v1481_v21 = vsel %vm1138_vm2, %v884_v14, inf  ;;  %v895_v33 = vadd.f32 %v6573_v17, %v7784_v61  ;;  %1906 = vmatpush1.bf16.msra.mxu1 %v6755_v12 }
 0x185   :  { %v1226_v22 = vrot.slane %v1225_v15, 4  ;;  %v1474_v23 = vrot.slane %v1473_v16, 4  ;;  %v1234_v24 = vmax.f32 %v1232_v18, %v1233_v20  ;;  %v1482_v25 = vmin.f32 %v1480_v19, %v1481_v21  ;;  %v886_v26 = vpop.f32.mrf.mxu0 }
 0x186   :  { %v887_v28 = vadd.f32 %v7784_v61, %v886_v26  ;;  %v1239_v53 = vsel %vm1138_vm2, %v895_v33, -inf  ;;  %v1487_v54 = vsel %vm1138_vm2, %v895_v33, inf  ;;  %v6756_v26 = vld [vmem:[#allocation8 + $0x4] ss:$28 sps:$4 sm:$0xff]  }
 0x187   :  { %v1227_v29 = vmax.f32 %v1225_v15, %v1226_v22  ;;  %v1475_v30 = vmin.f32 %v1473_v16, %v1474_v23  ;;  %v6576_v31 = vpop.f32.mrf.mxu0  ;;  %1907 = vmatprep.subr.bf16.mxu1 %v6756_v26 }
 0x188   :  { %v1235_v34 = vsel %vm1138_vm2, %v887_v28, -inf  ;;  %v1483_v35 = vsel %vm1138_vm2, %v887_v28, inf  ;;  %v908_v62 = vadd.f32 %v6576_v31, %v7784_v61 }
 0x189   :  { %v1228_v37 = vrot.slane %v1227_v29, 2  ;;  %v1476_v38 = vrot.slane %v1475_v30, 2  ;;  %v1236_v39 = vmax.f32 %v1234_v24, %v1235_v34  ;;  %v1484_v40 = vmin.f32 %v1482_v25, %v1483_v35  ;;  %v899_v41 = vpop.f32.mrf.mxu0  ;;  %v6761_v35 = vld [vmem:[#allocation8 + $0xb4] ss:$28 sps:$4 sm:$0xff]  }
 0x18a   :  { %v900_v44 = vadd.f32 %v7784_v61, %v899_v41  ;;  %v1245_v18 = vsel %vm1138_vm2, %v908_v62, -inf  ;;  %v1493_v19 = vsel %vm1138_vm2, %v908_v62, inf }
 0x18b   :  { %v1229_v45 = vmax.f32 %v1227_v29, %v1228_v37  ;;  %v1477_v46 = vmin.f32 %v1475_v30, %v1476_v38  ;;  %v1238_v47 = vmax.f32 %v1236_v39, %v1237_v42  ;;  %v1486_v48 = vmin.f32 %v1484_v40, %v1485_v43  ;;  %v6577_v49 = vpop.f32.mrf.mxu0  ;;  %v6758_v29 = vld [vmem:[#allocation8] ss:$28 sps:$4 sm:$0xff]  }
 0x18c   :  { %v1241_v63 = vsel %vm1138_vm2, %v900_v44, -inf  ;;  %v1489_v0 = vsel %vm1138_vm2, %v900_v44, inf  ;;  %v911_v9 = vadd.f32 %v6577_v49, %v7784_v61  ;;  %1908 = vmatpush1.bf16.msra.mxu1 %v6758_v29 }
 0x18d   :  { %v1230_v56 = vrot.slane %v1229_v45, 1  ;;  %v1478_v57 = vrot.slane %v1477_v46, 1  ;;  %v1240_v58 = vmax.f32 %v1238_v47, %v1239_v53  ;;  %v1488_v59 = vmin.f32 %v1486_v48, %v1487_v54  ;;  %v902_v60 = vpop.f32.mrf.mxu0  ;;  %1942 = vmatprep.subr.bf16.mxu1 %v6761_v35 }
 0x18e   :  { %v903_v2 = vadd.f32 %v7784_v61, %v902_v60  ;;  %v1247_v27 = vsel %vm1138_vm2, %v911_v9, -inf  ;;  %v1495_v28 = vsel %vm1138_vm2, %v911_v9, inf }
 0x18f   :  { %v1231_v3 = vmax.f32 %v1229_v45, %v1230_v56  ;;  %v1479_v4 = vmin.f32 %v1477_v46, %v1478_v57  ;;  %v1242_v5 = vmax.f32 %v1240_v58, %v1241_v63  ;;  %v1490_v6 = vmin.f32 %v1488_v59, %v1489_v0  ;;  %v6580_v7 = vpop.f32.mrf.mxu0 }
 0x190   :  { %v1243_v10 = vsel %vm1138_vm2, %v903_v2, -inf  ;;  %v1491_v11 = vsel %vm1138_vm2, %v903_v2, inf  ;;  %v924_v36 = vadd.f32 %v6580_v7, %v7784_v61 }
 0x191   :  { %v1637_v13 = vpack.c.bf16 %v1231_v3, %v1231_v3  ;;  %v1677_v14 = vpack.c.bf16 %v1479_v4, %v1479_v4  ;;  %v1244_v15 = vmax.f32 %v1242_v5, %v1243_v10  ;;  %v1492_v16 = vmin.f32 %v1490_v6, %v1491_v11  ;;  %v915_v17 = vpop.f32.mrf.mxu0 }
 0x192   :  { %v916_v20 = vadd.f32 %v7784_v61, %v915_v17  ;;  %v1253_v47 = vsel %vm1138_vm2, %v924_v36, -inf  ;;  %v1501_v48 = vsel %vm1138_vm2, %v924_v36, inf }
 0x193   :  { %v1725_v21 = vunpack.c.l.b16 %v1677_v14  ;;  %v2066_v22 = vunpack.c.l.b16 %v1637_v13  ;;  %v1246_v23 = vmax.f32 %v1244_v15, %v1245_v18  ;;  %v1494_v24 = vmin.f32 %v1492_v16, %v1493_v19  ;;  %v6581_v25 = vpop.f32.mrf.mxu0 }
 0x194   :  { %v1249_v37 = vsel %vm1138_vm2, %v916_v20, -inf  ;;  %v1497_v38 = vsel %vm1138_vm2, %v916_v20, inf }
 0x195   :  { %v7942_v30 = vsel %vm1733_vm4, %v1725_v21, %v7898_v51  ;;  %v7945_v31 = vsel %vm1733_vm4, %v2066_v22, %v7901_v52  ;;  %v1248_v32 = vmax.f32 %v1246_v23, %v1247_v27  ;;  %v1496_v33 = vmin.f32 %v1494_v24, %v1495_v28  ;;  %v918_v34 = vpop.f32.mrf.mxu0 }
 0x196   :  { %v919_v39 = vadd.f32 %v7784_v61, %v918_v34  ;;  %v927_v52 = vadd.f32 %v6581_v25, %v7784_v61 }
 0x197   :  { %v1250_v40 = vmax.f32 %v1248_v32, %v1249_v37  ;;  %v1498_v51 = vmin.f32 %v1496_v33, %v1497_v38  ;;  %v6584_v41 = vpop.f32.mrf.mxu0 }
 0x198   :  { %v1251_v42 = vsel %vm1138_vm2, %v919_v39, -inf  ;;  %v1499_v43 = vsel %vm1138_vm2, %v919_v39, inf  ;;  %v1255_v55 = vsel %vm1138_vm2, %v927_v52, -inf  ;;  %v1503_v56 = vsel %vm1138_vm2, %v927_v52, inf }
 0x199   :  { %v1252_v44 = vmax.f32 %v1250_v40, %v1251_v42  ;;  %v1500_v45 = vmin.f32 %v1498_v51, %v1499_v43  ;;  %v931_v46 = vpop.f32.mrf.mxu0  ;;  %v940_v60 = vadd.f32 %v6584_v41, %v7784_v61 }
 0x19a   :  { %v932_v53 = vadd.f32 %v7784_v61, %v931_v46 }
 0x19b   :  { %v1254_v49 = vmax.f32 %v1252_v44, %v1253_v47  ;;  %v1502_v50 = vmin.f32 %v1500_v45, %v1501_v48  ;;  %v6585_v54 = vpop.f32.mrf.mxu0  ;;  %v1266_v13 = vsel %vm1138_vm2, %v940_v60, -inf  ;;  %v1514_v14 = vsel %vm1138_vm2, %v940_v60, inf }
 0x19c   :  { %v1263_v2 = vsel %vm1138_vm2, %v932_v53, -inf  ;;  %v1511_v4 = vsel %vm1138_vm2, %v932_v53, inf  ;;  %v943_v5 = vadd.f32 %v6585_v54, %v7784_v61 }
 0x19d   :  { %v1256_v57 = vmax.f32 %v1254_v49, %v1255_v55  ;;  %v1504_v58 = vmin.f32 %v1502_v50, %v1503_v56  ;;  %v934_v59 = vpop.f32.mrf.mxu0 }
 0x19e   :  { %v935_v62 = vadd.f32 %v7784_v61, %v934_v59  ;;  %v1268_v21 = vsel %vm1138_vm2, %v943_v5, -inf  ;;  %v1516_v22 = vsel %vm1138_vm2, %v943_v5, inf }
 0x19f   :  { %v1257_v63 = vrot.slane %v1256_v57, 4  ;;  %v1505_v0 = vrot.slane %v1504_v58, 4  ;;  %v6588_v3 = vpop.f32.mrf.mxu0 }
 0x1a0   :  { %v1264_v6 = vsel %vm1138_vm2, %v935_v62, -inf  ;;  %v1512_v7 = vsel %vm1138_vm2, %v935_v62, inf  ;;  %v956_v28 = vadd.f32 %v6588_v3, %v7784_v61 }
 0x1a1   :  { %v1258_v8 = vmax.f32 %v1256_v57, %v1257_v63  ;;  %v1506_v9 = vmin.f32 %v1504_v58, %v1505_v0  ;;  %v1265_v10 = vmax.f32 %v1263_v2, %v1264_v6  ;;  %v1513_v11 = vmin.f32 %v1511_v4, %v1512_v7  ;;  %v947_v12 = vpop.f32.mrf.mxu0 }
 0x1a2   :  { %v948_v15 = vadd.f32 %v7784_v61, %v947_v12  ;;  %v1274_v45 = vsel %vm1138_vm2, %v956_v28, -inf  ;;  %v1522_v46 = vsel %vm1138_vm2, %v956_v28, inf }
 0x1a3   :  { %v1259_v16 = vrot.slane %v1258_v8, 2  ;;  %v1507_v17 = vrot.slane %v1506_v9, 2  ;;  %v1267_v18 = vmax.f32 %v1265_v10, %v1266_v13  ;;  %v1515_v19 = vmin.f32 %v1513_v11, %v1514_v14  ;;  %v6589_v20 = vpop.f32.mrf.mxu0 }
 0x1a4   :  { %v1270_v29 = vsel %vm1138_vm2, %v948_v15, -inf  ;;  %v1518_v32 = vsel %vm1138_vm2, %v948_v15, inf  ;;  %v959_v39 = vadd.f32 %v6589_v20, %v7784_v61 }
 0x1a5   :  { %v1260_v23 = vmax.f32 %v1258_v8, %v1259_v16  ;;  %v1508_v24 = vmin.f32 %v1506_v9, %v1507_v17  ;;  %v1269_v25 = vmax.f32 %v1267_v18, %v1268_v21  ;;  %v1517_v26 = vmin.f32 %v1515_v19, %v1516_v22  ;;  %v950_v27 = vpop.f32.mrf.mxu0 }
 0x1a6   :  { %v951_v33 = vadd.f32 %v7784_v61, %v950_v27  ;;  %v1276_v55 = vsel %vm1138_vm2, %v959_v39, -inf  ;;  %v1524_v56 = vsel %vm1138_vm2, %v959_v39, inf }
 0x1a7   :  { %v1261_v34 = vrot.slane %v1260_v23, 1  ;;  %v1509_v35 = vrot.slane %v1508_v24, 1  ;;  %v1271_v36 = vmax.f32 %v1269_v25, %v1270_v29  ;;  %v1519_v37 = vmin.f32 %v1517_v26, %v1518_v32  ;;  %v6592_v38 = vpop.f32.mrf.mxu0 }
 0x1a8   :  { %v1272_v40 = vsel %vm1138_vm2, %v951_v33, -inf  ;;  %v1520_v51 = vsel %vm1138_vm2, %v951_v33, inf  ;;  %v972_v63 = vadd.f32 %v6592_v38, %v7784_v61 }
 0x1a9   :  { %v1262_v41 = vmax.f32 %v1260_v23, %v1261_v34  ;;  %v1510_v52 = vmin.f32 %v1508_v24, %v1509_v35  ;;  %v1273_v42 = vmax.f32 %v1271_v36, %v1272_v40  ;;  %v1521_v43 = vmin.f32 %v1519_v37, %v1520_v51  ;;  %v963_v44 = vpop.f32.mrf.mxu0 }
 0x1aa   :  { %v964_v47 = vadd.f32 %v7784_v61, %v963_v44  ;;  %v1282_v15 = vsel %vm1138_vm2, %v972_v63, -inf  ;;  %v1530_v16 = vsel %vm1138_vm2, %v972_v63, inf }
 0x1ab   :  { %v1638_v48 = vpack.c.bf16 %v1262_v41, %v1262_v41  ;;  %v1678_v49 = vpack.c.bf16 %v1510_v52, %v1510_v52  ;;  %v1275_v50 = vmax.f32 %v1273_v42, %v1274_v45  ;;  %v1523_v53 = vmin.f32 %v1521_v43, %v1522_v46  ;;  %v6593_v54 = vpop.f32.mrf.mxu0 }
 0x1ac   :  { %v1278_v0 = vsel %vm1138_vm2, %v964_v47, -inf  ;;  %v1526_v2 = vsel %vm1138_vm2, %v964_v47, inf  ;;  %v975_v9 = vadd.f32 %v6593_v54, %v7784_v61 }
 0x1ad   :  { %v1726_v57 = vunpack.c.l.b16 %v1678_v49  ;;  %v2067_v58 = vunpack.c.l.b16 %v1638_v48  ;;  %v1277_v59 = vmax.f32 %v1275_v50, %v1276_v55  ;;  %v1525_v60 = vmin.f32 %v1523_v53, %v1524_v56  ;;  %v966_v62 = vpop.f32.mrf.mxu0 }
 0x1ae   :  { %v967_v3 = vadd.f32 %v7784_v61, %v966_v62  ;;  %v1532_v20 = vsel %vm1138_vm2, %v975_v9, inf }
 0x1af   :  { %v1279_v4 = vmax.f32 %v1277_v59, %v1278_v0  ;;  %v1527_v5 = vmin.f32 %v1525_v60, %v1526_v2  ;;  %v6596_v6 = vpop.f32.mrf.mxu0  ;;  %v7988_v7 = vsel %vm1735_vm5, %v2067_v58, %v7945_v31  ;;  %v7991_v8 = vsel %vm1735_vm5, %v1726_v57, %v7942_v30 }
 0x1b0   :  { %v1280_v10 = vsel %vm1138_vm2, %v967_v3, -inf  ;;  %v1528_v11 = vsel %vm1138_vm2, %v967_v3, inf  ;;  %v1284_v30 = vsel %vm1138_vm2, %v975_v9, -inf  ;;  %v988_v21 = vadd.f32 %v6596_v6, %v7784_v61 }
 0x1b1   :  { %v1281_v12 = vmax.f32 %v1279_v4, %v1280_v10  ;;  %v1529_v13 = vmin.f32 %v1527_v5, %v1528_v11  ;;  %v979_v14 = vpop.f32.mrf.mxu0 }
 0x1b2   :  { %v980_v17 = vadd.f32 %v7784_v61, %v979_v14  ;;  %v1295_v34 = vsel %vm1138_vm2, %v988_v21, -inf  ;;  %v1543_v9 = vsel %vm1138_vm2, %v988_v21, inf }
 0x1b3   :  { %v1283_v31 = vmax.f32 %v1281_v12, %v1282_v15  ;;  %v1531_v18 = vmin.f32 %v1529_v13, %v1530_v16  ;;  %v6597_v19 = vpop.f32.mrf.mxu0  ;;  %v8028_v16 = vld [vmem:[#allocation5] ss:$0 sm:$0xff] }
 0x1b4   :  { %v1286_v25 = vsel %vm1138_vm2, %v980_v17, -inf  ;;  %v1534_v26 = vsel %vm1138_vm2, %v980_v17, inf  ;;  %v991_v27 = vadd.f32 %v6597_v19, %v7784_v61 }
 0x1b5   :  { %v1285_v22 = vmax.f32 %v1283_v31, %v1284_v30  ;;  %v1533_v23 = vmin.f32 %v1531_v18, %v1532_v20  ;;  %v982_v24 = vpop.f32.mrf.mxu0 }
 0x1b6   :  { %v983_v28 = vadd.f32 %v7784_v61, %v982_v24  ;;  %v1297_v40 = vsel %vm1138_vm2, %v991_v27, -inf  ;;  %v1545_v21 = vsel %vm1138_vm2, %v991_v27, inf }
 0x1b7   :  { %v1287_v29 = vmax.f32 %v1285_v22, %v1286_v25  ;;  %v1535_v32 = vmin.f32 %v1533_v23, %v1534_v26  ;;  %v6600_v33 = vpop.f32.mrf.mxu0 }
 0x1b8   :  { %v1294_v35 = vsel %vm1138_vm2, %v983_v28, -inf  ;;  %v8012_v49 = vadd.f32 %v6600_v33, %v7784_v61  ;;  %v1542_v63 = vsel %vm1138_vm2, %v983_v28, inf }
 0x1b9   :  { %v1288_v36 = vrot.slane %v1287_v29, 4  ;;  %v1536_v37 = vrot.slane %v1535_v32, 4  ;;  %v1296_v38 = vmax.f32 %v1294_v35, %v1295_v34  ;;  %v995_v39 = vpop.f32.mrf.mxu0  ;;  %v1544_v13 = vmin.f32 %v1542_v63, %v1543_v9 }
 0x1ba   :  { %v996_v51 = vadd.f32 %v7784_v61, %v995_v39  ;;  %v1303_v0 = vsel %vm1138_vm2, %v8012_v49, -inf }
 0x1bb   :  { %v1289_v41 = vmax.f32 %v1287_v29, %v1288_v36  ;;  %v1537_v52 = vmin.f32 %v1535_v32, %v1536_v37  ;;  %v1298_v42 = vmax.f32 %v1296_v38, %v1297_v40  ;;  %v6601_v43 = vpop.f32.mrf.mxu0  ;;  %v1546_v25 = vmin.f32 %v1544_v13, %v1545_v21 }
 0x1bc   :  { %v1299_v44 = vsel %vm1138_vm2, %v996_v51, -inf  ;;  %v8016_v56 = vadd.f32 %v6601_v43, %v7784_v61  ;;  %v1547_v32 = vsel %vm1138_vm2, %v996_v51, inf }
 0x1bd   :  { %v1290_v45 = vrot.slane %v1289_v41, 2  ;;  %v1538_v46 = vrot.slane %v1537_v52, 2  ;;  %v1300_v47 = vmax.f32 %v1298_v42, %v1299_v44  ;;  %v998_v48 = vpop.f32.mrf.mxu0  ;;  %v1548_v38 = vmin.f32 %v1546_v25, %v1547_v32 }
 0x1be   :  { %v999_v50 = vadd.f32 %v7784_v61, %v998_v48  ;;  %v1305_v10 = vsel %vm1138_vm2, %v8016_v56, -inf }
 0x1bf   :  { %v1291_v53 = vmax.f32 %v1289_v41, %v1290_v45  ;;  %v1539_v54 = vmin.f32 %v1537_v52, %v1538_v46  ;;  %v6604_v55 = vpop.f32.mrf.mxu0 }
 0x1c0   :  { %v1301_v57 = vsel %vm1138_vm2, %v999_v50, -inf  ;;  %v1549_v36 = vsel %vm1138_vm2, %v999_v50, inf }
 0x1c1   :  { %v1292_v58 = vrot.slane %v1291_v53, 1  ;;  %v1540_v59 = vrot.slane %v1539_v54, 1  ;;  %v1302_v60 = vmax.f32 %v1300_v47, %v1301_v57  ;;  %v1011_v62 = vpop.f32.mrf.mxu0  ;;  %v1550_v43 = vmin.f32 %v1548_v38, %v1549_v36 }
 0x1c2   :  { %v8023_v2 = vadd.f32 %v7784_v61, %v1011_v62  ;;  %v8031_v61 = vadd.f32 %v8028_v16, %v6604_v55 }
 0x1c3   :  { %v1293_v3 = vmax.f32 %v1291_v53, %v1292_v58  ;;  %v1541_v4 = vmin.f32 %v1539_v54, %v1540_v59  ;;  %v1304_v5 = vmax.f32 %v1302_v60, %v1303_v0  ;;  %v6605_v6 = vpop.f32.mrf.mxu0  ;;  %v1551_v53 = vsel %vm1138_vm2, %v8012_v49, inf }
 0x1c4   :  { %v1307_v17 = vsel %vm1138_vm2, %v8023_v2, -inf  ;;  %v8040_v22 = vadd.f32 %v8028_v16, %v6605_v6  ;;  %v1311_v27 = vsel %vm1138_vm2, %v8031_v61, -inf  ;;  %v1552_v57 = vmin.f32 %v1550_v43, %v1551_v53 }
 0x1c5   :  { %v1639_v11 = vpack.c.bf16 %v1293_v3, %v1293_v3  ;;  %v1679_v12 = vpack.c.bf16 %v1541_v4, %v1541_v4  ;;  %v1306_v14 = vmax.f32 %v1304_v5, %v1305_v10  ;;  %v1014_v15 = vpop.f32.mrf.mxu0  ;;  %v1553_v49 = vsel %vm1138_vm2, %v8016_v56, inf }
 0x1c6   :  { %v8036_v31 = vadd.f32 %v8028_v16, %v1014_v15  ;;  %v1313_v37 = vsel %vm1138_vm2, %v8040_v22, -inf  ;;  %v1554_v10 = vmin.f32 %v1552_v57, %v1553_v49  ;;  %v1555_v56 = vsel %vm1138_vm2, %v8023_v2, inf }
 0x1c7   :  { %v1727_v18 = vunpack.c.l.b16 %v1679_v12  ;;  %v2068_v19 = vunpack.c.l.b16 %v1639_v11  ;;  %v1308_v30 = vmax.f32 %v1306_v14, %v1307_v17  ;;  %v6608_v20 = vpop.f32.mrf.mxu0  ;;  %v1559_v57 = vsel %vm1138_vm2, %v8031_v61, inf }
 0x1c8   :  { %v1309_v23 = vsel %vm1138_vm2, %v8036_v31, -inf  ;;  %v1036_v33 = vadd.f32 %v8028_v16, %v6608_v20 }
 0x1c9   :  { %v8046_v24 = vsel %vm1737_vm6, %v2068_v19, %v7988_v7  ;;  %v1310_v26 = vmax.f32 %v1308_v30, %v1309_v23  ;;  %v1027_v28 = vpop.f32.mrf.mxu0  ;;  %v8050_v29 = vsel %vm1737_vm6, %v1727_v18, %v7991_v8 }
 0x1ca   :  { %v8057_v34 = vadd.f32 %v8028_v16, %v1027_v28  ;;  %v1325_v51 = vsel %vm1138_vm2, %v1036_v33, -inf  ;;  %v1573_v60 = vsel %vm1138_vm2, %v1036_v33, inf }
 0x1cb   :  { %v1312_v35 = vmax.f32 %v1310_v26, %v1311_v27  ;;  %v6609_v7 = vpop.f32.mrf.mxu0  ;;  %v1556_v26 = vmin.f32 %v1554_v10, %v1555_v56  ;;  %v1561_v10 = vsel %vm1138_vm2, %v8040_v22, inf }
 0x1cc   :  { %v1039_v8 = vadd.f32 %v8028_v16, %v6609_v7  ;;  %v1315_v41 = vsel %vm1138_vm2, %v8057_v34, -inf  ;;  %v1563_v22 = vsel %vm1138_vm2, %v8057_v34, inf }
 0x1cd   :  { %v1314_v39 = vmax.f32 %v1312_v35, %v1313_v37  ;;  %v1030_v40 = vpop.f32.mrf.mxu0  ;;  %v1557_v35 = vsel %vm1138_vm2, %v8036_v31, inf }
 0x1ce   :  { %v1326_v52 = vsel %vm1138_vm2, %v1039_v8, -inf  ;;  %v8068_v42 = vadd.f32 %v8028_v16, %v1030_v40  ;;  %v1574_v54 = vsel %vm1138_vm2, %v1039_v8, inf }
 0x1cf   :  { %v1316_v44 = vmax.f32 %v1314_v39, %v1315_v41  ;;  %v1327_v45 = vmax.f32 %v1325_v51, %v1326_v52  ;;  %v6612_v46 = vpop.f32.mrf.mxu0  ;;  %v1575_v0 = vmin.f32 %v1573_v60, %v1574_v54  ;;  %v1558_v52 = vmin.f32 %v1556_v26, %v1557_v35 }
 0x1d0   :  { %v1317_v47 = vsel %vm1138_vm2, %v8068_v42, -inf  ;;  %v1052_v6 = vadd.f32 %v8028_v16, %v6612_v46 }
 0x1d1   :  { %v1318_v48 = vmax.f32 %v1316_v44, %v1317_v47  ;;  %v1043_v50 = vpop.f32.mrf.mxu0 }
 0x1d2   :  { %v1044_v55 = vadd.f32 %v8028_v16, %v1043_v50  ;;  %v1332_v21 = vsel %vm1138_vm2, %v1052_v6, -inf  ;;  %v1580_v23 = vsel %vm1138_vm2, %v1052_v6, inf }
 0x1d3   :  { %v1319_v58 = vrot.slane %v1318_v48, 4  ;;  %v6613_v59 = vpop.f32.mrf.mxu0 }
 0x1d4   :  { %v1328_v62 = vsel %vm1138_vm2, %v1044_v55, -inf  ;;  %v1576_v63 = vsel %vm1138_vm2, %v1044_v55, inf  ;;  %v1055_v14 = vadd.f32 %v8028_v16, %v6613_v59 }
 0x1d5   :  { %v1320_v3 = vmax.f32 %v1318_v48, %v1319_v58  ;;  %v1329_v4 = vmax.f32 %v1327_v45, %v1328_v62  ;;  %v1046_v5 = vpop.f32.mrf.mxu0  ;;  %v1577_v12 = vmin.f32 %v1575_v0, %v1576_v63  ;;  %v1560_v62 = vmin.f32 %v1558_v52, %v1559_v57 }
 0x1d6   :  { %v1047_v9 = vadd.f32 %v8028_v16, %v1046_v5  ;;  %v1334_v7 = vsel %vm1138_vm2, %v1055_v14, -inf  ;;  %v1582_v36 = vsel %vm1138_vm2, %v1055_v14, inf }
 0x1d7   :  { %v1321_v11 = vrot.slane %v1320_v3, 2  ;;  %v6616_v13 = vpop.f32.mrf.mxu0  ;;  %v1562_v14 = vmin.f32 %v1560_v62, %v1561_v10 }
 0x1d8   :  { %v1330_v15 = vsel %vm1138_vm2, %v1047_v9, -inf  ;;  %v1578_v17 = vsel %vm1138_vm2, %v1047_v9, inf  ;;  %v1068_v39 = vadd.f32 %v8028_v16, %v6616_v13 }
 0x1d9   :  { %v1322_v18 = vmax.f32 %v1320_v3, %v1321_v11  ;;  %v1331_v19 = vmax.f32 %v1329_v4, %v1330_v15  ;;  %v1579_v30 = vmin.f32 %v1577_v12, %v1578_v17  ;;  %v1059_v20 = vpop.f32.mrf.mxu0  ;;  %v1564_v26 = vmin.f32 %v1562_v14, %v1563_v22 }
 0x1da   :  { %v1060_v25 = vadd.f32 %v8028_v16, %v1059_v20  ;;  %v1340_v58 = vsel %vm1138_vm2, %v1068_v39, -inf  ;;  %v1588_v59 = vsel %vm1138_vm2, %v1068_v39, inf }
 0x1db   :  { %v1323_v28 = vrot.slane %v1322_v18, 1  ;;  %v1333_v32 = vmax.f32 %v1331_v19, %v1332_v21  ;;  %v1581_v27 = vmin.f32 %v1579_v30, %v1580_v23  ;;  %v6617_v33 = vpop.f32.mrf.mxu0 }
 0x1dc   :  { %v1336_v40 = vsel %vm1138_vm2, %v1060_v25, -inf  ;;  %v1584_v51 = vsel %vm1138_vm2, %v1060_v25, inf  ;;  %v1071_v46 = vadd.f32 %v8028_v16, %v6617_v33 }
 0x1dd   :  { %v1324_v37 = vmax.f32 %v1322_v18, %v1323_v28  ;;  %v1335_v2 = vmax.f32 %v1333_v32, %v1334_v7  ;;  %v1583_v8 = vmin.f32 %v1581_v27, %v1582_v36  ;;  %v1062_v38 = vpop.f32.mrf.mxu0  ;;  %v1565_v27 = vsel %vm1138_vm2, %v8068_v42, inf }
 0x1de   :  { %v1063_v41 = vadd.f32 %v8028_v16, %v1062_v38  ;;  %v1342_v5 = vsel %vm1138_vm2, %v1071_v46, -inf  ;;  %v1590_v49 = vsel %vm1138_vm2, %v1071_v46, inf }
 0x1df   :  { %v1640_v43 = vpack.c.bf16 %v1324_v37, %v1324_v37  ;;  %v1337_v44 = vmax.f32 %v1335_v2, %v1336_v40  ;;  %v1585_v31 = vmin.f32 %v1583_v8, %v1584_v51  ;;  %v6620_v45 = vpop.f32.mrf.mxu0  ;;  %v1566_v40 = vmin.f32 %v1564_v26, %v1565_v27 }
 0x1e0   :  { %v1338_v47 = vsel %vm1138_vm2, %v1063_v41, -inf  ;;  %v1586_v48 = vsel %vm1138_vm2, %v1063_v41, inf  ;;  %v1084_v11 = vadd.f32 %v8028_v16, %v6620_v45 }
 0x1e1   :  { %v2069_v50 = vunpack.c.l.b16 %v1640_v43  ;;  %v1339_v53 = vmax.f32 %v1337_v44, %v1338_v47  ;;  %v1587_v54 = vmin.f32 %v1585_v31, %v1586_v48  ;;  %v1075_v55 = vpop.f32.mrf.mxu0  ;;  %v1567_v62 = vrot.slane %v1566_v40, 4 }
 0x1e2   :  { %v1076_v60 = vadd.f32 %v8028_v16, %v1075_v55  ;;  %v1348_v21 = vsel %vm1138_vm2, %v1084_v11, -inf  ;;  %v1596_v52 = vsel %vm1138_vm2, %v1084_v11, inf }
 0x1e3   :  { %v1341_v63 = vmax.f32 %v1339_v53, %v1340_v58  ;;  %v1589_v0 = vmin.f32 %v1587_v54, %v1588_v59  ;;  %v6621_v3 = vpop.f32.mrf.mxu0  ;;  %v8109_v4 = vsel %vm1739_vm7, %v2069_v50, %v8046_v24 }
 0x1e4   :  { %v1344_v12 = vsel %vm1138_vm2, %v1076_v60, -inf  ;;  %v1592_v17 = vsel %vm1138_vm2, %v1076_v60, inf  ;;  %v1087_v18 = vadd.f32 %v8028_v16, %v6621_v3 }
 0x1e5   :  { %v1343_v6 = vmax.f32 %v1341_v63, %v1342_v5  ;;  %v1591_v61 = vmin.f32 %v1589_v0, %v1590_v49  ;;  %v1078_v9 = vpop.f32.mrf.mxu0 }
 0x1e6   :  { %v1079_v13 = vadd.f32 %v8028_v16, %v1078_v9  ;;  %v1356_v33 = vsel %vm1138_vm2, %v1087_v18, -inf  ;;  %v1604_v8 = vsel %vm1138_vm2, %v1087_v18, inf }
 0x1e7   :  { %v1345_v15 = vmax.f32 %v1343_v6, %v1344_v12  ;;  %v6624_v24 = vpop.f32.mrf.mxu0  ;;  %v1593_v30 = vmin.f32 %v1591_v61, %v1592_v17  ;;  %v1568_v17 = vmin.f32 %v1566_v40, %v1567_v62 }
 0x1e8   :  { %v1346_v19 = vsel %vm1138_vm2, %v1079_v13, -inf  ;;  %v1594_v23 = vsel %vm1138_vm2, %v1079_v13, inf  ;;  %v1100_v38 = vadd.f32 %v8028_v16, %v6624_v24 }
 0x1e9   :  { %v1347_v20 = vmax.f32 %v1345_v15, %v1346_v19  ;;  %v1091_v56 = vpop.f32.mrf.mxu0  ;;  %v1595_v34 = vmin.f32 %v1593_v30, %v1594_v23 }
 0x1ea   :  { %v1092_v25 = vadd.f32 %v8028_v16, %v1091_v56  ;;  %v1361_v53 = vsel %vm1138_vm2, %v1100_v38, -inf  ;;  %v1609_v54 = vsel %vm1138_vm2, %v1100_v38, inf }
 0x1eb   :  { %v1349_v28 = vmax.f32 %v1347_v20, %v1348_v21  ;;  %v6625_v32 = vpop.f32.mrf.mxu0  ;;  %v1597_v46 = vmin.f32 %v1595_v34, %v1596_v52 }
 0x1ec   :  { %v1357_v35 = vsel %vm1138_vm2, %v1092_v25, -inf  ;;  %v1605_v7 = vsel %vm1138_vm2, %v1092_v25, inf  ;;  %v1103_v43 = vadd.f32 %v8028_v16, %v6625_v32 }
 0x1ed   :  { %v1350_v36 = vrot.slane %v1349_v28, 4  ;;  %v1358_v37 = vmax.f32 %v1356_v33, %v1357_v35  ;;  %v1094_v2 = vpop.f32.mrf.mxu0  ;;  %v1606_v41 = vmin.f32 %v1604_v8, %v1605_v7  ;;  %v1598_v5 = vrot.slane %v1597_v46, 4 }
 0x1ee   :  { %v1095_v39 = vadd.f32 %v8028_v16, %v1094_v2  ;;  %v1363_v63 = vsel %vm1138_vm2, %v1103_v43, -inf  ;;  %v1611_v0 = vsel %vm1138_vm2, %v1103_v43, inf  ;;  %v1569_v7 = vrot.slane %v1568_v17, 2 }
 0x1ef   :  { %v1351_v51 = vmax.f32 %v1349_v28, %v1350_v36  ;;  %v6628_v42 = vpop.f32.mrf.mxu0  ;;  %v1599_v20 = vmin.f32 %v1597_v46, %v1598_v5 }
 0x1f0   :  { %v1359_v44 = vsel %vm1138_vm2, %v1095_v39, -inf  ;;  %v1607_v31 = vsel %vm1138_vm2, %v1095_v39, inf  ;;  %v1116_v9 = vadd.f32 %v8028_v16, %v6628_v42 }
 0x1f1   :  { %v1352_v45 = vrot.slane %v1351_v51, 2  ;;  %v1360_v47 = vmax.f32 %v1358_v37, %v1359_v44  ;;  %v1608_v48 = vmin.f32 %v1606_v41, %v1607_v31  ;;  %v1107_v50 = vpop.f32.mrf.mxu0  ;;  %v1600_v37 = vrot.slane %v1599_v20, 2  ;;  %v6825_v44 = vld [vmem:[#allocation11 + $0x508] ss:$28 sps:$4 sm:$0xff]  }
 0x1f2   :  { %v1108_v55 = vadd.f32 %v8028_v16, %v1107_v50  ;;  %v1369_v25 = vsel %vm1138_vm2, %v1116_v9, -inf  ;;  %v1617_v26 = vsel %vm1138_vm2, %v1116_v9, inf  ;;  %v6827_v31 = vld [vmem:[#allocation11 + $0x50c] ss:$28 sps:$4 sm:$0xff]  }
 0x1f3   :  { %v1353_v57 = vmax.f32 %v1351_v51, %v1352_v45  ;;  %v1362_v58 = vmax.f32 %v1360_v47, %v1361_v53  ;;  %v1610_v59 = vmin.f32 %v1608_v48, %v1609_v54  ;;  %v6629_v60 = vpop.f32.mrf.mxu0  ;;  %4730 = vmatprep.subr.bf16.mxu0 %v6827_v31  ;;  %v1601_v53 = vmin.f32 %v1599_v20, %v1600_v37  ;;  %v6844_v37 = vld [vmem:[#allocation11 + $0x3f4] ss:$28 sps:$4 sm:$0xff]   ;;  %v6768_v31 = vld [vmem:[#allocation8 + $0x8] ss:$28 sps:$4 sm:$0xff]  }
 0x1f4   :  { %v1365_v10 = vsel %vm1138_vm2, %v1108_v55, -inf  ;;  %v1613_v11 = vsel %vm1138_vm2, %v1108_v55, inf  ;;  %v1119_v18 = vadd.f32 %v8028_v16, %v6629_v60  ;;  %4731 = vmatpush1.bf16.msra.mxu0 %v6825_v44  ;;  %v6770_v44 = vld [vmem:[#allocation8 + $0xc] ss:$28 sps:$4 sm:$0xff]  }
 0x1f5   :  { %v1354_v3 = vrot.slane %v1353_v57, 1  ;;  %v1364_v49 = vmax.f32 %v1362_v58, %v1363_v63  ;;  %v1612_v6 = vmin.f32 %v1610_v59, %v1611_v0  ;;  %v1110_v61 = vpop.f32.mrf.mxu0  ;;  %v1602_v0 = vrot.slane %v1601_v53, 1 }
 0x1f6   :  { %v1111_v12 = vadd.f32 %v8028_v16, %v1110_v61  ;;  %v1371_v36 = vsel %vm1138_vm2, %v1119_v18, -inf  ;;  %v1619_v34 = vsel %vm1138_vm2, %v1119_v18, inf  ;;  %v6833_v18 = vld [vmem:[#allocation11 + $0x498] ss:$28 sps:$4 sm:$0xff]  }
 0x1f7   :  { %v1355_v13 = vmax.f32 %v1353_v57, %v1354_v3  ;;  %v1366_v14 = vmax.f32 %v1364_v49, %v1365_v10  ;;  %v1614_v15 = vmin.f32 %v1612_v6, %v1613_v11  ;;  %v6632_v24 = vpop.f32.mrf.mxu0  ;;  %v1603_v9 = vmin.f32 %v1601_v53, %v1602_v0  ;;  %v6830_v10 = vld [vmem:[#allocation11 + $0x4d0] ss:$28 sps:$4 sm:$0xff]   ;;  %v6790_v0 = vld [vmem:[#allocation7 + $0x70] ss:$28 sps:$4 sm:$0xff]  }
 0x1f8   :  { %v1367_v19 = vsel %vm1138_vm2, %v1111_v12, -inf  ;;  %v1615_v30 = vsel %vm1138_vm2, %v1111_v12, inf  ;;  %v1132_v40 = vadd.f32 %v8028_v16, %v6632_v24  ;;  %v6832_v11 = vld [vmem:[#allocation11 + $0x4d4] ss:$28 sps:$4 sm:$0xff]   ;;  %v6782_v53 = vld [vmem:[#allocation8 + $0x14] ss:$28 sps:$4 sm:$0xff]  }
 0x1f9   :  { %v1641_v56 = vpack.c.bf16 %v1355_v13, %v1355_v13  ;;  %v1368_v22 = vmax.f32 %v1366_v14, %v1367_v19  ;;  %v1616_v21 = vmin.f32 %v1614_v15, %v1615_v30  ;;  %v1123_v23 = vpop.f32.mrf.mxu0  ;;  %v6835_v14 = vld [vmem:[#allocation11 + $0x49c] ss:$28 sps:$4 sm:$0xff]   ;;  %4732 = vmatprep.subr.bf16.mxu0 %v6832_v11  ;;  %v1681_v19 = vpack.c.bf16 %v1603_v9, %v1603_v9  ;;  %v6838_v30 = vld [vmem:[#allocation11 + $0x464] ss:$28 sps:$4 sm:$0xff]   ;;  %v6804_v11 = vld [vmem:[#allocation7 + $0x7c] ss:$28 sps:$4 sm:$0xff]  }
 0x1fa   :  { %v1124_v28 = vadd.f32 %v8028_v16, %v1123_v23  ;;  %v1377_v54 = vsel %vm1138_vm2, %v1132_v40, -inf  ;;  %v1625_v55 = vsel %vm1138_vm2, %v1132_v40, inf  ;;  %4733 = vmatpush1.bf16.msra.mxu0 %v6830_v10  ;;  %v6799_v9 = vld [vmem:[#allocation7 + $0xb0] ss:$28 sps:$4 sm:$0xff]  }
 0x1fb   :  { %v2070_v32 = vunpack.c.l.b16 %v1641_v56  ;;  %v1370_v27 = vmax.f32 %v1368_v22, %v1369_v25  ;;  %v1618_v33 = vmin.f32 %v1616_v21, %v1617_v26  ;;  %v6633_v35 = vpop.f32.mrf.mxu0  ;;  %4734 = vmatprep.subr.bf16.mxu0 %v6835_v14  ;;  %v6836_v25 = vld [vmem:[#allocation11 + $0x460] ss:$28 sps:$4 sm:$0xff]   ;;  %v1729_v26 = vunpack.c.l.b16 %v1681_v19  ;;  %v6802_v14 = vld [vmem:[#allocation7 + $0x78] ss:$28 sps:$4 sm:$0xff]  }
 0x1fc   :  { %v1373_v51 = vsel %vm1138_vm2, %v1124_v28, -inf  ;;  %v1621_v41 = vsel %vm1138_vm2, %v1124_v28, inf  ;;  %v1135_v45 = vadd.f32 %v8028_v16, %v6633_v35  ;;  %v6841_v28 = vld [vmem:[#allocation11 + $0x42c] ss:$28 sps:$4 sm:$0xff]  }
 0x1fd   :  { %v1372_v2 = vmax.f32 %v1370_v27, %v1371_v36  ;;  %v1620_v8 = vmin.f32 %v1618_v33, %v1619_v34  ;;  %v1126_v38 = vpop.f32.mrf.mxu0  ;;  %v8157_v39 = vsel %vm1741_vm8, %v2070_v32, %v8109_v4  ;;  %v1570_v4 = vmin.f32 %v1568_v17, %v1569_v7  ;;  %v6839_v36 = vld [vmem:[#allocation11 + $0x428] ss:$28 sps:$4 sm:$0xff]  }
 0x1fe   :  { %v1127_v42 = vadd.f32 %v8028_v16, %v1126_v38  ;;  %v1379_v59 = vsel %vm1138_vm2, %v1135_v45, -inf  ;;  %v1627_v16 = vsel %vm1138_vm2, %v1135_v45, inf  ;;  %4735 = vmatpush1.bf16.msra.mxu0 %v6833_v18  ;;  %v6773_v45 = vld [vmem:[#allocation8 + $0xbc] ss:$28 sps:$4 sm:$0xff]   ;;  %v6854_v18 = vld [vmem:[#allocation11 + $0x6c8] ss:$28 sps:$4 sm:$0xff]  }
 0x1ff   :  { %v1374_v52 = vmax.f32 %v1372_v2, %v1373_v51  ;;  %v1622_v43 = vmin.f32 %v1620_v8, %v1621_v41  ;;  %v1571_v60 = vrot.slane %v1570_v4, 1  ;;  %4736 = vmatprep.subr.bf16.mxu0 %v6838_v30  ;;  %v6759_v2 = vld [vmem:[#allocation8 + $0xb0] ss:$28 sps:$4 sm:$0xff]   ;;  %v6764_v51 = vld [vmem:[#allocation8 + $0x7c] ss:$28 sps:$4 sm:$0xff]  }
 0x200   :  { %v1375_v46 = vsel %vm1138_vm2, %v1127_v42, -inf  ;;  %v1623_v47 = vsel %vm1138_vm2, %v1127_v42, inf  ;;  %v6842_v41 = vld [vmem:[#allocation11 + $0x3f0] ss:$28 sps:$4 sm:$0xff]   ;;  %v6847_v42 = vld [vmem:[#allocation11 + $0x3bc] ss:$28 sps:$4 sm:$0xff]  }
 0x201   :  { %v1376_v48 = vmax.f32 %v1374_v52, %v1375_v46  ;;  %v1624_v50 = vmin.f32 %v1622_v43, %v1623_v47  ;;  %v1572_v49 = vmin.f32 %v1570_v4, %v1571_v60  ;;  %v6767_v52 = vld [vmem:[#allocation8 + $0x44] ss:$28 sps:$4 sm:$0xff]   ;;  %v6771_v46 = vld [vmem:[#allocation8 + $0xb8] ss:$28 sps:$4 sm:$0xff]   ;;  %v6789_v60 = vld [vmem:[#allocation7 + $0xac] ss:$28 sps:$4 sm:$0xff]  }
 0x202   :  { %4737 = vmatpush1.bf16.msra.mxu0 %v6836_v25  ;;  %v6845_v43 = vld [vmem:[#allocation11 + $0x3b8] ss:$28 sps:$4 sm:$0xff]   ;;  %v6856_v19 = vld [vmem:[#allocation11 + $0x6cc] ss:$28 sps:$4 sm:$0xff]   ;;  %v6808_v30 = vld [vmem:[#allocation7 + $0x8] ss:$28 sps:$4 sm:$0xff]  }
 0x203   :  { %v1378_v57 = vmax.f32 %v1376_v48, %v1377_v54  ;;  %v1626_v58 = vmin.f32 %v1624_v50, %v1625_v55  ;;  %v1680_v15 = vpack.c.bf16 %v1572_v49, %v1572_v49  ;;  %4738 = vmatprep.subr.bf16.mxu0 %v6841_v28  ;;  %v6776_v47 = vld [vmem:[#allocation8 + $0x84] ss:$28 sps:$4 sm:$0xff]   ;;  %v6779_v48 = vld [vmem:[#allocation8 + $0x4c] ss:$28 sps:$4 sm:$0xff]   ;;  %v6869_v28 = vld [vmem:[#allocation11 + $0x690] ss:$28 sps:$4 sm:$0xff]  }
 0x204   :  { %v6774_v4 = vld [vmem:[#allocation8 + $0x80] ss:$28 sps:$4 sm:$0xff]   ;;  %v6777_v50 = vld [vmem:[#allocation8 + $0x48] ss:$28 sps:$4 sm:$0xff]   ;;  %v6780_v54 = vld [vmem:[#allocation8 + $0x10] ss:$28 sps:$4 sm:$0xff]  }
 0x205   :  { %v1380_v62 = vmax.f32 %v1378_v57, %v1379_v59  ;;  %v1628_v63 = vmin.f32 %v1626_v58, %v1627_v16  ;;  %v1728_v22 = vunpack.c.l.b16 %v1680_v15  ;;  %v6783_v55 = vld [vmem:[#allocation8 + $0xc0] ss:$28 sps:$4 sm:$0xff]   ;;  %v7488_v57 = vmov 0.0   ;;  %v6784_v58 = vld [vmem:[#allocation8 + $0x88] ss:$28 sps:$4 sm:$0xff]  }
 0x206   :  { %4739 = vmatpush1.bf16.msra.mxu0 %v6839_v36  ;;  %v6785_v59 = vld [vmem:[#allocation8 + $0x50] ss:$28 sps:$4 sm:$0xff]   ;;  %v6786_v16 = vld [vmem:[#allocation8 + $0x18] ss:$28 sps:$4 sm:$0xff]   ;;  %v6798_v49 = vld [vmem:[#allocation7 + $0x4] ss:$28 sps:$4 sm:$0xff]  }
 0x207   :  { %v1381_v3 = vrot.slane %v1380_v62, 4  ;;  %v1629_v5 = vrot.slane %v1628_v63, 4  ;;  %v1740_v7 = vsel %vm1739_vm7, %v1728_v22, %v8050_v29  ;;  %4740 = vmatprep.subr.bf16.mxu0 %v6844_v37  ;;  %v6762_v29 = vld [vmem:[#allocation8 + $0x78] ss:$28 sps:$4 sm:$0xff]   ;;  %v6807_v15 = vld [vmem:[#allocation7 + $0x44] ss:$28 sps:$4 sm:$0xff]  }
 0x208   :  { %v1742_v34 = vsel %vm1741_vm8, %v1729_v26, %v1740_v7  ;;  %v6816_v22 = vld [vmem:[#allocation7 + $0x84] ss:$28 sps:$4 sm:$0xff]   ;;  %v6822_v26 = vld [vmem:[#allocation7 + $0x14] ss:$28 sps:$4 sm:$0xff]  }
 0x209   :  { %v1382_v6 = vmax.f32 %v1380_v62, %v1381_v3  ;;  %v1630_v61 = vmin.f32 %v1628_v63, %v1629_v5  ;;  %v6787_v62 = vld [vmem:[#allocation7 + $0xa8] ss:$28 sps:$4 sm:$0xff]   ;;  %v6792_v63 = vld [vmem:[#allocation7 + $0x74] ss:$28 sps:$4 sm:$0xff]   ;;  %v6795_v3 = vld [vmem:[#allocation7 + $0x3c] ss:$28 sps:$4 sm:$0xff]  }
 0x20a   :  { %4741 = vmatpush1.bf16.msra.mxu0 %v6842_v41  ;;  %v6793_v5 = vld [vmem:[#allocation7 + $0x38] ss:$28 sps:$4 sm:$0xff]   ;;  %v6817_v25 = vld [vmem:[#allocation7 + $0x48] ss:$28 sps:$4 sm:$0xff]   ;;  %v6828_v7 = vld [vmem:[#allocation7 + $0x50] ss:$28 sps:$4 sm:$0xff]  }
 0x20b   :  { %v1383_v12 = vrot.slane %v1382_v6, 2  ;;  %v1631_v13 = vrot.slane %v1630_v61, 2  ;;  %4742 = vmatprep.subr.bf16.mxu0 %v6847_v42  ;;  %v6881_v36 = vld [vmem:[#allocation11 + $0x658] ss:$28 sps:$4 sm:$0xff]   ;;  %v6829_v37 = vld [vmem:[#allocation7 + $0x18] ss:$28 sps:$4 sm:$0xff]  }
 0x20c   :  { %v6893_v41 = vld [vmem:[#allocation11 + $0x620] ss:$28 sps:$4 sm:$0xff]  }
 0x20d   :  { %v1384_v24 = vmax.f32 %v1382_v6, %v1383_v12  ;;  %v1632_v17 = vmin.f32 %v1630_v61, %v1631_v13  ;;  %v6796_v6 = vld [vmem:[#allocation7] ss:$28 sps:$4 sm:$0xff]   ;;  %v6801_v61 = vld [vmem:[#allocation7 + $0xb4] ss:$28 sps:$4 sm:$0xff]   ;;  %v6848_v12 = vld [vmem:[#allocation11 + $0x380] ss:$28 sps:$4 sm:$0xff]  }
 0x20e   :  { %4743 = vmatpush1.bf16.msra.mxu0 %v6845_v43  ;;  %v6850_v13 = vld [vmem:[#allocation11 + $0x384] ss:$28 sps:$4 sm:$0xff]  }
 0x20f   :  { %v1385_v20 = vrot.slane %v1384_v24, 1  ;;  %v1633_v56 = vrot.slane %v1632_v17, 1  ;;  %4744 = vmatprep.subr.bf16.mxu0 %v6850_v13  ;;  %v6895_v42 = vld [vmem:[#allocation11 + $0x624] ss:$28 sps:$4 sm:$0xff]   ;;  %v6902_v13 = vld [vmem:[#allocation11 + $0x230] ss:$28 sps:$4 sm:$0xff]  }
 0x210   :  { %v6863_v43 = vld [vmem:[#allocation11 + $0xe0] ss:$28 sps:$4 sm:$0xff]  }
 0x211   :  { %v1386_v21 = vmax.f32 %v1384_v24, %v1385_v20  ;;  %v1634_v23 = vmin.f32 %v1632_v17, %v1633_v56  ;;  %v6805_v24 = vld [vmem:[#allocation7 + $0x40] ss:$28 sps:$4 sm:$0xff]   ;;  %v6810_v17 = vld [vmem:[#allocation7 + $0xc] ss:$28 sps:$4 sm:$0xff]   ;;  %v6811_v56 = vld [vmem:[#allocation7 + $0xb8] ss:$28 sps:$4 sm:$0xff]  }
 0x212   :  { %4745 = vmatpush1.bf16.msra.mxu0 %v6848_v12  ;;  %v6813_v20 = vld [vmem:[#allocation7 + $0xbc] ss:$28 sps:$4 sm:$0xff]  }
 0x213   :  { %v1642_v32 = vpack.c.bf16 %v1386_v21, %v1386_v21  ;;  %v1682_v27 = vpack.c.bf16 %v1634_v23, %v1634_v23  ;;  %4746 = vmatprep.subr.bf16.mxu0 %v6856_v19  ;;  %v6814_v21 = vld [vmem:[#allocation7 + $0x80] ss:$28 sps:$4 sm:$0xff]   ;;  %v6819_v23 = vld [vmem:[#allocation7 + $0x4c] ss:$28 sps:$4 sm:$0xff]  }
 0x214   :  { %v6904_v12 = vld [vmem:[#allocation11 + $0x234] ss:$28 sps:$4 sm:$0xff]  }
 0x215   :  { %v2071_v33 = vunpack.c.l.b16 %v1642_v32  ;;  %v1730_v35 = vunpack.c.l.b16 %v1682_v27  ;;  %v6871_v32 = vld [vmem:[#allocation11 + $0x694] ss:$28 sps:$4 sm:$0xff]   ;;  %v6820_v27 = vld [vmem:[#allocation7 + $0x10] ss:$28 sps:$4 sm:$0xff]  }
 0x216   :  { %4747 = vmatpush2.bf16.msra.mxu0 %v6854_v18  ;;  %v6916_v18 = vld [vmem:[#allocation11 + $0x88c] ss:$28 sps:$4 sm:$0xff]  }
 0x217   :  { %v1744_v8 = vsel %vm1743_vm9, %v1730_v35, %v1742_v34  ;;  %v8174_v38 = vsel %vm1743_vm9, %v2071_v33, %v8157_v39  ;;  %v6765_v39 = vld [vmem:[#allocation8 + $0x40] ss:$28 sps:$4 sm:$0xff]   ;;  %4748 = vmatprep.subr.bf16.mxu0 %v6871_v32  ;;  %v6824_v35 = vld [vmem:[#allocation7 + $0x88] ss:$28 sps:$4 sm:$0xff]  }
 0x218   :  { %v1745_v40 = vpack.c.b16 %v1744_v8, %v1744_v8  ;;  %v8191_v10 = vpack.c.b16 %v8174_v38, %v8174_v38  ;;  %v6823_v33 = vld [vmem:[#allocation7 + $0xc0] ss:$28 sps:$4 sm:$0xff]   ;;  %v6851_v8 = vld [vmem:[#allocation11 + $0x188] ss:$28 sps:$4 sm:$0xff]  }
 0x219   :  { %v6883_v34 = vld [vmem:[#allocation11 + $0x65c] ss:$28 sps:$4 sm:$0xff]   ;;  %v6859_v38 = vld [vmem:[#allocation11 + $0x154] ss:$28 sps:$4 sm:$0xff]  }
 0x21a   :  { %5885 = vmatmul.mubr.msk.bf16.vlgmr.msra.gmra.mxu1 %vm1138_vm2, %v1745_v40  ;;  %4749 = vmatpush2.bf16.msra.mxu0 %v6869_v28 }
 0x21b   :  { %1943 = vmatpush1.bf16.msra.mxu1 %v6759_v2  ;;  %1966 = vmatprep.mubr.bf16.mxu1 %v7487_v1  ;;  %v6853_v2 = vld [vmem:[#allocation11 + $0x18c] ss:$28 sps:$4 sm:$0xff]  }
 0x21c   :  { %1944 = vmatprep.subr.bf16.mxu1 %v6764_v51  ;;  %4750 = vmatprep.subr.bf16.mxu0 %v6883_v34  ;;  %v6862_v51 = vld [vmem:[#allocation11 + $0x11c] ss:$28 sps:$4 sm:$0xff]  }
 0x21e   :  { %4751 = vmatpush2.bf16.msra.mxu0 %v6881_v36 }
 0x21f   :  { %1945 = vmatpush1.bf16.msra.mxu1 %v6762_v29  ;;  %v6860_v29 = vld [vmem:[#allocation11 + $0x118] ss:$28 sps:$4 sm:$0xff]   ;;  %4752 = vmatprep.subr.bf16.mxu0 %v6895_v42 }
 0x220   :  { %1946 = vmatprep.subr.bf16.mxu1 %v6767_v52  ;;  %v6865_v52 = vld [vmem:[#allocation11 + $0xe4] ss:$28 sps:$4 sm:$0xff]  }
 0x222   :  { %4753 = vmatpush2.bf16.msra.mxu0 %v6893_v41 }
 0x223   :  { %1947 = vmatpush1.bf16.msra.mxu1 %v6765_v39  ;;  %v6868_v39 = vld [vmem:[#allocation11 + $0xac] ss:$28 sps:$4 sm:$0xff]  }
 0x224   :  { %1948 = vmatprep.subr.bf16.mxu1 %v6770_v44  ;;  %v6866_v44 = vld [vmem:[#allocation11 + $0xa8] ss:$28 sps:$4 sm:$0xff]  }
 0x227   :  { %1949 = vmatpush1.bf16.msra.mxu1 %v6768_v31  ;;  %v6874_v31 = vld [vmem:[#allocation11 + $0x74] ss:$28 sps:$4 sm:$0xff]  }
 0x228   :  { %1983 = vmatprep.subr.bf16.mxu1 %v6773_v45  ;;  %v6872_v45 = vld [vmem:[#allocation11 + $0x70] ss:$28 sps:$4 sm:$0xff]  }
 0x22a   :  { %5886 = vmatmul.mubr.msk.bf16.vlgmr.msra.gmra.mxu1 %vm1138_vm2, %v1745_v40 }
 0x22b   :  { %1984 = vmatpush1.bf16.msra.mxu1 %v6771_v46  ;;  %2007 = vmatprep.mubr.bf16.mxu1 %v7487_v1  ;;  %v6877_v46 = vld [vmem:[#allocation11 + $0x3c] ss:$28 sps:$4 sm:$0xff]  }
 0x22c   :  { %1985 = vmatprep.subr.bf16.mxu1 %v6776_v47  ;;  %v6875_v47 = vld [vmem:[#allocation11 + $0x38] ss:$28 sps:$4 sm:$0xff]  }
 0x22f   :  { %1986 = vmatpush1.bf16.msra.mxu1 %v6774_v4  ;;  %v6880_v4 = vld [vmem:[#allocation11 + $0x4] ss:$28 sps:$4 sm:$0xff]  }
 0x230   :  { %1987 = vmatprep.subr.bf16.mxu1 %v6779_v48  ;;  %v6878_v48 = vld [vmem:[#allocation11] ss:$28 sps:$4 sm:$0xff]  }
 0x233   :  { %1988 = vmatpush1.bf16.msra.mxu1 %v6777_v50  ;;  %v6905_v50 = vld [vmem:[#allocation11 + $0x5e8] ss:$28 sps:$4 sm:$0xff]  }
 0x234   :  { %1989 = vmatprep.subr.bf16.mxu1 %v6782_v53  ;;  %v6907_v53 = vld [vmem:[#allocation11 + $0x5ec] ss:$28 sps:$4 sm:$0xff]  }
 0x235   :  { %4754 = vmatprep.subr.bf16.mxu0 %v6907_v53 }
 0x236   :  { %4755 = vmatpush2.bf16.msra.mxu0 %v6905_v50  ;;  %v6922_v50 = vld [vmem:[#allocation11 + $0x854] ss:$28 sps:$4 sm:$0xff]  }
 0x237   :  { %1990 = vmatpush1.bf16.msra.mxu1 %v6780_v54  ;;  %v6886_v54 = vld [vmem:[#allocation11 + $0x34c] ss:$28 sps:$4 sm:$0xff]  }
 0x238   :  { %6634 = vmatprep.subr.bf16.mxu1 %v7488_v57 }
 0x23a   :  { %5887 = vmatmul.mubr.msk.bf16.vlgmr.msra.gmra.mxu1 %vm1138_vm2, %v1745_v40 }
 0x23b   :  { %6635 = vmatpush3.bf16.msra.mxu1 %v6783_v55  ;;  %6642 = vmatprep.mubr.msk.bf16.mxu1 %vm7489_vm10, %v7488_v57  ;;  %v6884_v55 = vld [vmem:[#allocation11 + $0x348] ss:$28 sps:$4 sm:$0xff]  }
 0x23c   :  { %6636 = vmatprep.subr.bf16.mxu1 %v7488_v57 }
 0x23f   :  { %6637 = vmatpush3.bf16.msra.mxu1 %v6784_v58  ;;  %v6917_v58 = vld [vmem:[#allocation11 + $0x5b0] ss:$28 sps:$4 sm:$0xff]  }
 0x240   :  { %6638 = vmatprep.subr.bf16.mxu1 %v7488_v57 }
 0x243   :  { %6639 = vmatpush3.bf16.msra.mxu1 %v6785_v59  ;;  %v6919_v59 = vld [vmem:[#allocation11 + $0x5b4] ss:$28 sps:$4 sm:$0xff]  }
 0x244   :  { %6640 = vmatprep.subr.bf16.mxu1 %v7488_v57  ;;  %4756 = vmatprep.subr.bf16.mxu0 %v6919_v59 }
 0x245   :  { %4757 = vmatpush2.bf16.msra.mxu0 %v6917_v58  ;;  %v6928_v58 = vld [vmem:[#allocation11 + $0x81c] ss:$28 sps:$4 sm:$0xff]  }
 0x247   :  { %6641 = vmatpush3.bf16.msra.mxu1 %v6786_v16  ;;  %v6889_v16 = vld [vmem:[#allocation11 + $0x314] ss:$28 sps:$4 sm:$0xff]  }
 0x248   :  { %2235 = vmatprep.subr.bf16.mxu1 %v6789_v60  ;;  %v6887_v60 = vld [vmem:[#allocation11 + $0x310] ss:$28 sps:$4 sm:$0xff]  }
 0x24a   :  { %6643 = vmatmul.mubr.msk.bf16.vlgmr.msra.gmra.mxu1 %vm1138_vm2, %v1745_v40  ;;  %v6857_v40 = vld [vmem:[#allocation11 + $0x150] ss:$28 sps:$4 sm:$0xff]  }
 0x24b   :  { %2236 = vmatpush1.bf16.msra.mxu1 %v6787_v62  ;;  %2259 = vmatprep.mubr.bf16.mxu1 %v7487_v1  ;;  %v6892_v62 = vld [vmem:[#allocation11 + $0x2dc] ss:$28 sps:$4 sm:$0xff]  }
 0x24c   :  { %2237 = vmatprep.subr.bf16.mxu1 %v6792_v63  ;;  %v6925_v63 = vld [vmem:[#allocation11 + $0x57c] ss:$28 sps:$4 sm:$0xff]  }
 0x24d   :  { %4758 = vmatprep.subr.bf16.mxu0 %v6925_v63  ;;  %v6926_v63 = vld [vmem:[#allocation11 + $0x818] ss:$28 sps:$4 sm:$0xff]  }
 0x24f   :  { %2238 = vmatpush1.bf16.msra.mxu1 %v6790_v0  ;;  %v6923_v0 = vld [vmem:[#allocation11 + $0x578] ss:$28 sps:$4 sm:$0xff]  }
 0x250   :  { %2239 = vmatprep.subr.bf16.mxu1 %v6795_v3  ;;  %v6890_v3 = vld [vmem:[#allocation11 + $0x2d8] ss:$28 sps:$4 sm:$0xff]   ;;  %4759 = vmatpush2.bf16.msra.mxu0 %v6923_v0 }
 0x253   :  { %2240 = vmatpush1.bf16.msra.mxu1 %v6793_v5  ;;  %v6898_v5 = vld [vmem:[#allocation11 + $0x2a4] ss:$28 sps:$4 sm:$0xff]  }
 0x254   :  { %2241 = vmatprep.subr.bf16.mxu1 %v6798_v49  ;;  %v6931_v49 = vld [vmem:[#allocation11 + $0x544] ss:$28 sps:$4 sm:$0xff]  }
 0x255   :  { %4760 = vmatprep.subr.bf16.mxu0 %v6931_v49 }
 0x257   :  { %2242 = vmatpush1.bf16.msra.mxu1 %v6796_v6  ;;  %v6929_v6 = vld [vmem:[#allocation11 + $0x540] ss:$28 sps:$4 sm:$0xff]  }
 0x258   :  { %2276 = vmatprep.subr.bf16.mxu1 %v6801_v61  ;;  %v6896_v61 = vld [vmem:[#allocation11 + $0x2a0] ss:$28 sps:$4 sm:$0xff]   ;;  %4761 = vmatpush2.bf16.msra.mxu0 %v6929_v6 }
 0x25a   :  { %5917 = vmatmul.mubr.msk.bf16.vlgmr.msra.gmra.mxu1 %vm1138_vm2, %v8191_v10 }
 0x25b   :  { %2277 = vmatpush1.bf16.msra.mxu1 %v6799_v9  ;;  %2300 = vmatprep.mubr.bf16.mxu1 %v7487_v1  ;;  %v6901_v9 = vld [vmem:[#allocation11 + $0x26c] ss:$28 sps:$4 sm:$0xff]  }
 0x25c   :  { %2278 = vmatprep.subr.bf16.mxu1 %v6804_v11  ;;  %v6899_v11 = vld [vmem:[#allocation11 + $0x268] ss:$28 sps:$4 sm:$0xff]  }
 0x25f   :  { %2279 = vmatpush1.bf16.msra.mxu1 %v6802_v14  ;;  %v6910_v14 = vld [vmem:[#allocation11 + $0x1fc] ss:$28 sps:$4 sm:$0xff]  }
 0x260   :  { %2280 = vmatprep.subr.bf16.mxu1 %v6807_v15  ;;  %v6908_v15 = vld [vmem:[#allocation11 + $0x1f8] ss:$28 sps:$4 sm:$0xff]  }
 0x263   :  { %2281 = vmatpush1.bf16.msra.mxu1 %v6805_v24  ;;  %v6913_v24 = vld [vmem:[#allocation11 + $0x1c4] ss:$28 sps:$4 sm:$0xff]  }
 0x264   :  { %2282 = vmatprep.subr.bf16.mxu1 %v6810_v17  ;;  %v6911_v17 = vld [vmem:[#allocation11 + $0x1c0] ss:$28 sps:$4 sm:$0xff]  }
 0x267   :  { %2283 = vmatpush1.bf16.msra.mxu1 %v6808_v30 }
 0x268   :  { %2317 = vmatprep.subr.bf16.mxu1 %v6813_v20 }
 0x26a   :  { %5918 = vmatmul.mubr.msk.bf16.vlgmr.msra.gmra.mxu1 %vm1138_vm2, %v8191_v10 }
 0x26b   :  { %2318 = vmatpush1.bf16.msra.mxu1 %v6811_v56  ;;  %2341 = vmatprep.mubr.bf16.mxu1 %v7487_v1 }
 0x26c   :  { %2319 = vmatprep.subr.bf16.mxu1 %v6816_v22 }
 0x26f   :  { %2320 = vmatpush1.bf16.msra.mxu1 %v6814_v21 }
 0x270   :  { %2321 = vmatprep.subr.bf16.mxu1 %v6819_v23 }
 0x273   :  { %2322 = vmatpush1.bf16.msra.mxu1 %v6817_v25 }
 0x274   :  { %2323 = vmatprep.subr.bf16.mxu1 %v6822_v26 }
 0x277   :  { %2324 = vmatpush1.bf16.msra.mxu1 %v6820_v27 }
 0x278   :  { %6646 = vmatprep.subr.bf16.mxu1 %v7488_v57 }
 0x27a   :  { %5919 = vmatmul.mubr.msk.bf16.vlgmr.msra.gmra.mxu1 %vm1138_vm2, %v8191_v10 }
 0x27b   :  { %6647 = vmatpush3.bf16.msra.mxu1 %v6823_v33  ;;  %6654 = vmatprep.mubr.msk.bf16.mxu1 %vm7489_vm10, %v7488_v57 }
 0x27c   :  { %6648 = vmatprep.subr.bf16.mxu1 %v7488_v57 }
 0x27f   :  { %6649 = vmatpush3.bf16.msra.mxu1 %v6824_v35 }
 0x280   :  { %6650 = vmatprep.subr.bf16.mxu1 %v7488_v57 }
 0x283   :  { %6651 = vmatpush3.bf16.msra.mxu1 %v6828_v7  ;;  %v2392_v7 = vlaneseq }
 0x284   :  { %6652 = vmatprep.subr.bf16.mxu1 %v7488_v57 }
 0x287   :  { %6653 = vmatpush3.bf16.msra.mxu1 %v6829_v37  ;;  %v8215_v37 = vshrl.u32 %v2392_v7, 7  ;;  %v6947_v7 = vld [vmem:[#allocation11 + $0x738] ss:$28 sps:$4 sm:$0xff]  }
 0x288   :  { %4689 = vmatprep.subr.bf16.mxu1 %v6853_v2 }
 0x289   :  { %v2394_v2 = vsub.s32 0, %v8215_v37  ;;  %v2402_v53 = vsub.s32 2, %v8215_v37 }
 0x28a   :  { %6655 = vmatmul.mubr.msk.bf16.vlgmr.msra.gmra.mxu1 %vm1138_vm2, %v8191_v10  ;;  %v6940_v10 = vld [vmem:[#allocation11 + $0x194] ss:$28 sps:$4 sm:$0xff]  }
 0x28b   :  { %4690 = vmatpush1.bf16.msra.mxu1 %v6851_v8  ;;  %4853 = vmatprep.subr.bf16.mxu0 %v6940_v10  ;;  %v8218_v8 = vld [vmem:[#allocation10] sm:$0x7f] }
 0x28c   :  { %4691 = vmatprep.subr.bf16.mxu1 %v6859_v38  ;;  %v2398_v38 = vsub.s32 1, %v8215_v37  ;;  %v2403_v59 = vrot.slane %v8218_v8, %v2402_v53 }
 0x28e   :  { %v2399_v42 = vrot.slane %v8218_v8, %v2398_v38 }
 0x28f   :  { %4692 = vmatpush1.bf16.msra.mxu1 %v6857_v40  ;;  %v2395_v40 = vrot.slane %v8218_v8, %v2394_v2 }
 0x290   :  { %4693 = vmatprep.subr.bf16.mxu1 %v6862_v51 }
 0x293   :  { %4694 = vmatpush1.bf16.msra.mxu1 %v6860_v29 }
 0x294   :  { %4695 = vmatprep.subr.bf16.mxu1 %v6865_v52 }
 0x297   :  { %4696 = vmatpush1.bf16.msra.mxu1 %v6863_v43 }
 0x298   :  { %4697 = vmatprep.subr.bf16.mxu1 %v6868_v39 }
 0x29b   :  { %4698 = vmatpush1.bf16.msra.mxu1 %v6866_v44 }
 0x29c   :  { %4699 = vmatprep.subr.bf16.mxu1 %v6874_v31 }
 0x29f   :  { %4700 = vmatpush1.bf16.msra.mxu1 %v6872_v45 }
 0x2a0   :  { %4701 = vmatprep.subr.bf16.mxu1 %v6877_v46 }
 0x2a3   :  { %4702 = vmatpush1.bf16.msra.mxu1 %v6875_v47 }
 0x2a4   :  { %4703 = vmatprep.subr.bf16.mxu1 %v6880_v4  ;;  %v6914_v4 = vld [vmem:[#allocation11 + $0x888] ss:$28 sps:$4 sm:$0xff]  }
 0x2a7   :  { %4704 = vmatpush1.bf16.msra.mxu1 %v6878_v48 }
 0x2a8   :  { %4705 = vmatprep.subr.bf16.mxu1 %v6886_v54  ;;  %v6920_v54 = vld [vmem:[#allocation11 + $0x850] ss:$28 sps:$4 sm:$0xff]  }
 0x2ab   :  { %4706 = vmatpush2.bf16.msra.mxu1 %v6884_v55  ;;  %v2406_v55 = vsub.s32 3, %v8215_v37 }
 0x2ac   :  { %4707 = vmatprep.subr.bf16.mxu1 %v6889_v16 }
 0x2af   :  { %4708 = vmatpush2.bf16.msra.mxu1 %v6887_v60 }
 0x2b0   :  { %4709 = vmatprep.subr.bf16.mxu1 %v6892_v62  ;;  %v2407_v62 = vrot.slane %v8218_v8, %v2406_v55 }
 0x2b3   :  { %4710 = vmatpush2.bf16.msra.mxu1 %v6890_v3  ;;  %v6934_v3 = vld [vmem:[#allocation11 + $0x7e4] ss:$28 sps:$4 sm:$0xff]  }
 0x2b4   :  { %4711 = vmatprep.subr.bf16.mxu1 %v6898_v5 }
 0x2b7   :  { %4712 = vmatpush2.bf16.msra.mxu1 %v6896_v61 }
 0x2b8   :  { %4713 = vmatprep.subr.bf16.mxu1 %v6901_v9  ;;  %v6932_v9 = vld [vmem:[#allocation11 + $0x7e0] ss:$28 sps:$4 sm:$0xff]  }
 0x2bb   :  { %4714 = vmatpush2.bf16.msra.mxu1 %v6899_v11 }
 0x2bc   :  { %4715 = vmatprep.subr.bf16.mxu1 %v6904_v12  ;;  %v6937_v12 = vld [vmem:[#allocation11 + $0x7ac] ss:$28 sps:$4 sm:$0xff]  }
 0x2bf   :  { %4716 = vmatpush2.bf16.msra.mxu1 %v6902_v13 }
 0x2c0   :  { %4717 = vmatprep.subr.bf16.mxu1 %v6910_v14 }
 0x2c3   :  { %4718 = vmatpush2.bf16.msra.mxu1 %v6908_v15  ;;  %v6935_v15 = vld [vmem:[#allocation11 + $0x7a8] ss:$28 sps:$4 sm:$0xff]  }
 0x2c4   :  { %4719 = vmatprep.subr.bf16.mxu1 %v6913_v24  ;;  %v6938_v24 = vld [vmem:[#allocation11 + $0x190] ss:$28 sps:$4 sm:$0xff]  }
 0x2c7   :  { %4720 = vmatpush2.bf16.msra.mxu1 %v6911_v17 }
 0x2c8   :  { %4771 = vmatprep.subr.bf16.mxu1 %v6916_v18  ;;  %v6943_v18 = vld [vmem:[#allocation11 + $0x774] ss:$28 sps:$4 sm:$0xff]  }
 0x2da   :  { %v1927_v19 = vpop.f32.mrf.mxu1 }
 0x2dc   :  { %v1929_v30 = vpop.f32.mrf.mxu1 }
 0x2de   :  { %v1931_v20 = vpop.f32.mrf.mxu1 }
 0x2df   :  { %v6941_v20 = vld [vmem:[#allocation11 + $0x770] ss:$28 sps:$4 sm:$0xff]  }
 0x2e0   :  { %v1932_v56 = vpop.f32.mrf.mxu1 }
 0x2e1   :  { %v6944_v56 = vld [vmem:[#allocation11 + $0x158] ss:$28 sps:$4 sm:$0xff]  }
 0x2ea   :  { %v1968_v22 = vpop.f32.mrf.mxu1 }
 0x2ec   :  { %v1970_v21 = vpop.f32.mrf.mxu1 }
 0x2ee   :  { %v1972_v23 = vpop.f32.mrf.mxu1 }
 0x2ef   :  { %v6952_v23 = vld [vmem:[#allocation11 + $0x124] ss:$28 sps:$4 sm:$0xff]  }
 0x2f0   :  { %v1973_v25 = vpop.f32.mrf.mxu1 }
 0x2fa   :  { %v8209_v26 = vpop.f32.mrf.mxu1 }
 0x2fc   :  { %v8211_v28 = vpop.f32.mrf.mxu1 }
 0x2fe   :  { %v2013_v32 = vpop.f32.mrf.mxu1 }
 0x300   :  { %v2014_v27 = vpop.f32.mrf.mxu1 }
 0x30a   :  { %v8213_v33 = vpop.f32.mrf.mxu1 }
 0x30c   :  { %v6644_v35 = vpop.f32.mrf.mxu1 }
 0x30e   :  { %v2053_v36 = vpop.f32.mrf.mxu1 }
 0x30f   :  { %v6950_v36 = vld [vmem:[#allocation11 + $0x120] ss:$28 sps:$4 sm:$0xff]  }
 0x310   :  { %v6645_v34 = vpop.f32.mrf.mxu1 }
 0x31a   :  { %v2261_v51 = vpop.f32.mrf.mxu1 }
 0x31b   :  { %v2262_v41 = vadd.f32 %v2261_v51, %v1927_v19  ;;  %v6946_v19 = vld [vmem:[#allocation11 + $0x15c] ss:$28 sps:$4 sm:$0xff]   ;;  %v6958_v51 = vld [vmem:[#allocation11 + $0xec] ss:$28 sps:$4 sm:$0xff]  }
 0x31c   :  { %v2263_v29 = vpop.f32.mrf.mxu1 }
 0x31d   :  { %v2427_v52 = vadd.f32 %v2395_v40, %v2262_v41  ;;  %v2264_v43 = vadd.f32 %v2263_v29, %v1929_v30  ;;  %v2410_v30 = vsub.s32 4, %v8215_v37  ;;  %v6955_v40 = vld [vmem:[#allocation11 + $0x704] ss:$28 sps:$4 sm:$0xff]  }
 0x31e   :  { %v2265_v39 = vpop.f32.mrf.mxu1 }
 0x31f   :  { %v2428_v44 = vadd.f32 %v2399_v42, %v2264_v43  ;;  %v2434_v31 = vmax.f32 %v2427_v52, 0.0  ;;  %v2411_v25 = vrot.slane %v8218_v8, %v2410_v30  ;;  %v6956_v43 = vld [vmem:[#allocation11 + $0xe8] ss:$28 sps:$4 sm:$0xff]  }
 0x320   :  { %v2266_v45 = vpop.f32.mrf.mxu1 }
 0x321   :  { %v2435_v46 = vmax.f32 %v2428_v44, 0.0  ;;  %v8229_v48 = vpack.c.bf16 %v2434_v31, %v2434_v31  ;;  %v6961_v44 = vld [vmem:[#allocation11 + $0xa4c] ss:$28 sps:$4 sm:$0xff]   ;;  %v6964_v31 = vld [vmem:[#allocation11 + $0xb4] ss:$28 sps:$4 sm:$0xff]  }
 0x323   :  { %v8227_v47 = vpack.c.bf16 %v2435_v46, %v2435_v46 }
 0x325   :  { %4721 = vmatprep.mubr.bf16.mxu1 %v8227_v47 }
 0x326   :  { %4722 = vmatmul.mubr.bf16.vlgmr.msra.gmra.mxu1 %v8229_v48 }
 0x327   :  { %4772 = vmatpush1.bf16.msra.mxu1 %v6914_v4  ;;  %v6959_v4 = vld [vmem:[#allocation11 + $0xa48] ss:$28 sps:$4 sm:$0xff]  }
 0x328   :  { %4773 = vmatprep.subr.bf16.mxu1 %v6922_v50  ;;  %v6962_v50 = vld [vmem:[#allocation11 + $0xb0] ss:$28 sps:$4 sm:$0xff]  }
 0x32a   :  { %v2302_v16 = vpop.f32.mrf.mxu1 }
 0x32b   :  { %v2303_v60 = vadd.f32 %v2302_v16, %v1968_v22  ;;  %4774 = vmatpush1.bf16.msra.mxu1 %v6920_v54  ;;  %v2414_v22 = vsub.s32 5, %v8215_v37  ;;  %v6970_v54 = vld [vmem:[#allocation11 + $0x7c] ss:$28 sps:$4 sm:$0xff]  }
 0x32c   :  { %v2304_v0 = vpop.f32.mrf.mxu1  ;;  %4775 = vmatprep.subr.bf16.mxu1 %v6928_v58  ;;  %v2418_v58 = vsub.s32 6, %v8215_v37  ;;  %v6968_v16 = vld [vmem:[#allocation11 + $0x78] ss:$28 sps:$4 sm:$0xff]  }
 0x32d   :  { %v2429_v5 = vadd.f32 %v2403_v59, %v2303_v60  ;;  %v2305_v49 = vadd.f32 %v2304_v0, %v1970_v21  ;;  %v6949_v21 = vld [vmem:[#allocation11 + $0x73c] ss:$28 sps:$4 sm:$0xff]   ;;  %v2415_v35 = vrot.slane %v8218_v8, %v2414_v22  ;;  %v6965_v59 = vld [vmem:[#allocation11 + $0xa10] ss:$28 sps:$4 sm:$0xff]  }
 0x32e   :  { %v2306_v6 = vpop.f32.mrf.mxu1  ;;  %v6973_v60 = vld [vmem:[#allocation11 + $0x9dc] ss:$28 sps:$4 sm:$0xff]  }
 0x32f   :  { %v2430_v61 = vadd.f32 %v2407_v62, %v2305_v49  ;;  %4776 = vmatpush1.bf16.msra.mxu1 %v6926_v63  ;;  %v2436_v10 = vmax.f32 %v2429_v5, 0.0  ;;  %v6976_v62 = vld [vmem:[#allocation11 + $0x44] ss:$28 sps:$4 sm:$0xff]   ;;  %v2419_v63 = vrot.slane %v8218_v8, %v2418_v58  ;;  %v6971_v5 = vld [vmem:[#allocation11 + $0x9d8] ss:$28 sps:$4 sm:$0xff]  }
 0x330   :  { %v2307_v11 = vpop.f32.mrf.mxu1  ;;  %4777 = vmatprep.subr.bf16.mxu1 %v6934_v3  ;;  %v6974_v49 = vld [vmem:[#allocation11 + $0x40] ss:$28 sps:$4 sm:$0xff]  }
 0x331   :  { %v2437_v13 = vmax.f32 %v2430_v61, 0.0  ;;  %v8243_v17 = vpack.c.bf16 %v2436_v10, %v2436_v10  ;;  %v6979_v61 = vld [vmem:[#allocation11 + $0x9a4] ss:$28 sps:$4 sm:$0xff]  }
 0x333   :  { %v8241_v14 = vpack.c.bf16 %v2437_v13, %v2437_v13  ;;  %4778 = vmatpush1.bf16.msra.mxu1 %v6932_v9  ;;  %v6982_v9 = vld [vmem:[#allocation11 + $0xc] ss:$28 sps:$4 sm:$0xff]  }
 0x334   :  { %4779 = vmatprep.subr.bf16.mxu1 %v6937_v12  ;;  %v6977_v12 = vld [vmem:[#allocation11 + $0x9a0] ss:$28 sps:$4 sm:$0xff]   ;;  %v6980_v13 = vld [vmem:[#allocation11 + $0x8] ss:$28 sps:$4 sm:$0xff]  }
 0x335   :  { %4762 = vmatprep.mubr.bf16.mxu0 %v8241_v14 }
 0x336   :  { %4763 = vmatmul.mubr.bf16.vlgmr.msra.gmra.mxu0 %v8243_v17 }
 0x337   :  { %4780 = vmatpush1.bf16.msra.mxu1 %v6935_v15  ;;  %4854 = vmatpush1.bf16.msra.mxu0 %v6938_v24  ;;  %v6988_v15 = vld [vmem:[#allocation11 + $0x354] ss:$28 sps:$4 sm:$0xff]   ;;  %v6983_v24 = vld [vmem:[#allocation11 + $0x968] ss:$28 sps:$4 sm:$0xff]  }
 0x338   :  { %4885 = vmatprep.mubr.bf16.mxu0 %v8227_v47  ;;  %4781 = vmatprep.subr.bf16.mxu1 %v6943_v18  ;;  %v6986_v18 = vld [vmem:[#allocation11 + $0x350] ss:$28 sps:$4 sm:$0xff]  }
 0x339   :  { %4855 = vmatprep.subr.bf16.mxu0 %v6946_v19  ;;  %v6991_v19 = vld [vmem:[#allocation11 + $0x934] ss:$28 sps:$4 sm:$0xff]  }
 0x33a   :  { %v2343_v32 = vpop.f32.mrf.mxu1 }
 0x33b   :  { %v2344_v27 = vadd.f32 %v2343_v32, %v8209_v26  ;;  %4782 = vmatpush1.bf16.msra.mxu1 %v6941_v20  ;;  %4856 = vmatpush1.bf16.msra.mxu0 %v6944_v56  ;;  %v6953_v26 = vld [vmem:[#allocation11 + $0x700] ss:$28 sps:$4 sm:$0xff]   ;;  %v6989_v56 = vld [vmem:[#allocation11 + $0x930] ss:$28 sps:$4 sm:$0xff]   ;;  %v6995_v32 = vld [vmem:[#allocation11 + $0x8f8] ss:$28 sps:$4 sm:$0xff]  }
 0x33c   :  { %v2345_v34 = vpop.f32.mrf.mxu1  ;;  %4783 = vmatprep.subr.bf16.mxu1 %v6949_v21  ;;  %4857 = vmatprep.subr.bf16.mxu0 %v6952_v23  ;;  %v6994_v20 = vld [vmem:[#allocation11 + $0x31c] ss:$28 sps:$4 sm:$0xff]  }
 0x33d   :  { %v8257_v41 = vadd.f32 %v2411_v25, %v2344_v27  ;;  %v2346_v42 = vadd.f32 %v2345_v34, %v8211_v28  ;;  %v6967_v28 = vld [vmem:[#allocation11 + $0xa14] ss:$28 sps:$4 sm:$0xff]   ;;  %v6997_v23 = vld [vmem:[#allocation11 + $0x8fc] ss:$28 sps:$4 sm:$0xff]   ;;  %v7000_v25 = vld [vmem:[#allocation11 + $0x2e4] ss:$28 sps:$4 sm:$0xff]  }
 0x33e   :  { %v2347_v29 = vpop.f32.mrf.mxu1  ;;  %v6992_v21 = vld [vmem:[#allocation11 + $0x318] ss:$28 sps:$4 sm:$0xff]   ;;  %v6998_v27 = vld [vmem:[#allocation11 + $0x2e0] ss:$28 sps:$4 sm:$0xff]   ;;  %v7004_v34 = vld [vmem:[#allocation11 + $0x2a8] ss:$28 sps:$4 sm:$0xff]  }
 0x33f   :  { %v2432_v52 = vadd.f32 %v2415_v35, %v2346_v42  ;;  %4784 = vmatpush1.bf16.msra.mxu1 %v6947_v7  ;;  %4858 = vmatpush1.bf16.msra.mxu0 %v6950_v36  ;;  %v7003_v35 = vld [vmem:[#allocation11 + $0x8c4] ss:$28 sps:$4 sm:$0xff]   ;;  %v7006_v7 = vld [vmem:[#allocation11 + $0x2ac] ss:$28 sps:$4 sm:$0xff]   ;;  %v7012_v42 = vld [vmem:[#allocation11 + $0x274] ss:$28 sps:$4 sm:$0xff]  }
 0x340   :  { %v2348_v39 = vpop.f32.mrf.mxu1  ;;  %4785 = vmatprep.subr.bf16.mxu1 %v6955_v40  ;;  %4859 = vmatprep.subr.bf16.mxu0 %v6958_v51  ;;  %v7001_v36 = vld [vmem:[#allocation11 + $0x8c0] ss:$28 sps:$4 sm:$0xff]   ;;  %v2438_v40 = vmax.f32 %v8257_v41, 0.0  ;;  %v7007_v29 = vld [vmem:[#allocation11 + $0xab8] ss:$28 sps:$4 sm:$0xff]  }
 0x341   :  { %v2439_v45 = vmax.f32 %v2432_v52, 0.0  ;;  %v7009_v51 = vld [vmem:[#allocation11 + $0xabc] ss:$28 sps:$4 sm:$0xff]   ;;  %v7010_v52 = vld [vmem:[#allocation11 + $0x270] ss:$28 sps:$4 sm:$0xff]  }
 0x342   :  { %v7018_v39 = vld [vmem:[#allocation11 + $0x23c] ss:$28 sps:$4 sm:$0xff]  }
 0x343   :  { %v8260_v46 = vpack.c.bf16 %v2439_v45, %v2439_v45  ;;  %4786 = vmatpush1.bf16.msra.mxu1 %v6953_v26  ;;  %4860 = vmatpush1.bf16.msra.mxu0 %v6956_v43  ;;  %v8271_v26 = vpack.c.bf16 %v2438_v40, %v2438_v40  ;;  %v7015_v43 = vld [vmem:[#allocation11 + $0xa84] ss:$28 sps:$4 sm:$0xff]   ;;  %v7016_v41 = vld [vmem:[#allocation11 + $0x238] ss:$28 sps:$4 sm:$0xff]   ;;  %v7078_v40 = vld [vmem:[#allocation11 + $0x70c] ss:$28 sps:$4 sm:$0xff]  }
 0x344   :  { %4787 = vmatprep.subr.bf16.mxu1 %v6961_v44  ;;  %4861 = vmatprep.subr.bf16.mxu0 %v6964_v31  ;;  %v7013_v44 = vld [vmem:[#allocation11 + $0xa80] ss:$28 sps:$4 sm:$0xff]  }
 0x345   :  { %4803 = vmatprep.mubr.bf16.mxu1 %v8260_v46  ;;  %v7021_v45 = vld [vmem:[#allocation11 + $0x204] ss:$28 sps:$4 sm:$0xff]  }
 0x347   :  { %4788 = vmatpush2.bf16.msra.mxu1 %v6959_v4  ;;  %4862 = vmatpush1.bf16.msra.mxu0 %v6962_v50  ;;  %v7024_v4 = vld [vmem:[#allocation11 + $0x514] ss:$28 sps:$4 sm:$0xff]   ;;  %v7019_v50 = vld [vmem:[#allocation11 + $0x200] ss:$28 sps:$4 sm:$0xff]  }
 0x348   :  { %4789 = vmatprep.subr.bf16.mxu1 %v6967_v28  ;;  %4863 = vmatprep.subr.bf16.mxu0 %v6970_v54  ;;  %v7022_v28 = vld [vmem:[#allocation11 + $0x510] ss:$28 sps:$4 sm:$0xff]  }
 0x34a   :  { %v2384_v0 = vpop.f32.mrf.mxu1 }
 0x34b   :  { %v2385_v3 = vadd.f32 %v2384_v0, %v8213_v33  ;;  %4790 = vmatpush2.bf16.msra.mxu1 %v6965_v59  ;;  %4864 = vmatpush1.bf16.msra.mxu0 %v6968_v16  ;;  %v6985_v33 = vld [vmem:[#allocation11 + $0x96c] ss:$28 sps:$4 sm:$0xff]   ;;  %v7030_v16 = vld [vmem:[#allocation11 + $0x4dc] ss:$28 sps:$4 sm:$0xff]   ;;  %v7036_v0 = vld [vmem:[#allocation11 + $0x894] ss:$28 sps:$4 sm:$0xff]  }
 0x34c   :  { %v6656_v6 = vpop.f32.mrf.mxu1  ;;  %4791 = vmatprep.subr.bf16.mxu1 %v6973_v60  ;;  %4865 = vmatprep.subr.bf16.mxu0 %v6976_v62  ;;  %v7027_v59 = vld [vmem:[#allocation11 + $0x1cc] ss:$28 sps:$4 sm:$0xff]   ;;  %v7028_v62 = vld [vmem:[#allocation11 + $0x4d8] ss:$28 sps:$4 sm:$0xff]  }
 0x34d   :  { %v8268_v10 = vadd.f32 %v2419_v63, %v2385_v3  ;;  %v7025_v60 = vld [vmem:[#allocation11 + $0x1c8] ss:$28 sps:$4 sm:$0xff]   ;;  %v7031_v3 = vld [vmem:[#allocation11 + $0x4a0] ss:$28 sps:$4 sm:$0xff]  }
 0x34e   :  { %v2387_v11 = vpop.f32.mrf.mxu1  ;;  %v7033_v63 = vld [vmem:[#allocation11 + $0x4a4] ss:$28 sps:$4 sm:$0xff]   ;;  %v7042_v6 = vld [vmem:[#allocation11 + $0x85c] ss:$28 sps:$4 sm:$0xff]  }
 0x34f   :  { %4792 = vmatpush2.bf16.msra.mxu1 %v6971_v5  ;;  %4866 = vmatpush1.bf16.msra.mxu0 %v6974_v49  ;;  %v2440_v31 = vmax.f32 %v8268_v10, 0.0  ;;  %v7034_v5 = vld [vmem:[#allocation11 + $0x890] ss:$28 sps:$4 sm:$0xff]   ;;  %v7048_v11 = vld [vmem:[#allocation11 + $0x824] ss:$28 sps:$4 sm:$0xff]  }
 0x350   :  { %v6657_v8 = vpop.f32.mrf.mxu1  ;;  %4793 = vmatprep.subr.bf16.mxu1 %v6979_v61  ;;  %4867 = vmatprep.subr.bf16.mxu0 %v6982_v9  ;;  %v7039_v49 = vld [vmem:[#allocation11 + $0x46c] ss:$28 sps:$4 sm:$0xff]   ;;  %v7040_v9 = vld [vmem:[#allocation11 + $0x858] ss:$28 sps:$4 sm:$0xff]  }
 0x351   :  { %v8276_v54 = vpack.c.bf16 %v2440_v31, %v2440_v31  ;;  %v7037_v61 = vld [vmem:[#allocation11 + $0x468] ss:$28 sps:$4 sm:$0xff]   ;;  %v7045_v10 = vld [vmem:[#allocation11 + $0x434] ss:$28 sps:$4 sm:$0xff]   ;;  %v7051_v8 = vld [vmem:[#allocation11 + $0x3fc] ss:$28 sps:$4 sm:$0xff]  }
 0x352   :  { %v7085_v31 = vld [vmem:[#allocation11 + $0x628] ss:$28 sps:$4 sm:$0xff]  }
 0x353   :  { %4794 = vmatpush2.bf16.msra.mxu1 %v6977_v12  ;;  %4868 = vmatpush1.bf16.msra.mxu0 %v6980_v13  ;;  %v7043_v12 = vld [vmem:[#allocation11 + $0x430] ss:$28 sps:$4 sm:$0xff]   ;;  %v7046_v13 = vld [vmem:[#allocation11 + $0x820] ss:$28 sps:$4 sm:$0xff]  }
 0x354   :  { %4795 = vmatprep.subr.bf16.mxu1 %v6985_v33  ;;  %4869 = vmatprep.subr.bf16.mxu0 %v6988_v15  ;;  %v7054_v33 = vld [vmem:[#allocation11 + $0x7ec] ss:$28 sps:$4 sm:$0xff]   ;;  %v7049_v15 = vld [vmem:[#allocation11 + $0x3f8] ss:$28 sps:$4 sm:$0xff]  }
 0x357   :  { %4796 = vmatpush2.bf16.msra.mxu1 %v6983_v24  ;;  %4870 = vmatpush2.bf16.msra.mxu0 %v6986_v18  ;;  %v7052_v24 = vld [vmem:[#allocation11 + $0x7e8] ss:$28 sps:$4 sm:$0xff]  }
 0x358   :  { %4797 = vmatprep.subr.bf16.mxu1 %v6991_v19  ;;  %4871 = vmatprep.subr.bf16.mxu0 %v6994_v20  ;;  %v7057_v18 = vld [vmem:[#allocation11 + $0x3c4] ss:$28 sps:$4 sm:$0xff]   ;;  %v7060_v19 = vld [vmem:[#allocation11 + $0x7b4] ss:$28 sps:$4 sm:$0xff]  }
 0x359   :  { %v7055_v20 = vld [vmem:[#allocation11 + $0x3c0] ss:$28 sps:$4 sm:$0xff]  }
 0x35b   :  { %4798 = vmatpush2.bf16.msra.mxu1 %v6989_v56  ;;  %4872 = vmatpush2.bf16.msra.mxu0 %v6992_v21  ;;  %v7058_v56 = vld [vmem:[#allocation11 + $0x7b0] ss:$28 sps:$4 sm:$0xff]  }
 0x35c   :  { %4799 = vmatprep.subr.bf16.mxu1 %v6997_v23  ;;  %4873 = vmatprep.subr.bf16.mxu0 %v7000_v25  ;;  %v7063_v21 = vld [vmem:[#allocation11 + $0x38c] ss:$28 sps:$4 sm:$0xff]   ;;  %v7066_v23 = vld [vmem:[#allocation11 + $0x77c] ss:$28 sps:$4 sm:$0xff]  }
 0x35d   :  { %v7061_v25 = vld [vmem:[#allocation11 + $0x388] ss:$28 sps:$4 sm:$0xff]  }
 0x35f   :  { %4800 = vmatpush2.bf16.msra.mxu1 %v6995_v32  ;;  %4874 = vmatpush2.bf16.msra.mxu0 %v6998_v27  ;;  %v7064_v32 = vld [vmem:[#allocation11 + $0x778] ss:$28 sps:$4 sm:$0xff]  }
 0x360   :  { %4801 = vmatprep.subr.bf16.mxu1 %v7003_v35  ;;  %4875 = vmatprep.subr.bf16.mxu0 %v7006_v7  ;;  %v7069_v27 = vld [vmem:[#allocation11 + $0x6d4] ss:$28 sps:$4 sm:$0xff]   ;;  %v7072_v35 = vld [vmem:[#allocation11 + $0x744] ss:$28 sps:$4 sm:$0xff]  }
 0x361   :  { %v7067_v7 = vld [vmem:[#allocation11 + $0x6d0] ss:$28 sps:$4 sm:$0xff]  }
 0x363   :  { %4802 = vmatpush2.bf16.msra.mxu1 %v7001_v36  ;;  %4876 = vmatpush2.bf16.msra.mxu0 %v7004_v34  ;;  %v7070_v36 = vld [vmem:[#allocation11 + $0x740] ss:$28 sps:$4 sm:$0xff]  }
 0x364   :  { %4824 = vmatprep.subr.bf16.mxu1 %v7009_v51  ;;  %4877 = vmatprep.subr.bf16.mxu0 %v7012_v42  ;;  %v7075_v34 = vld [vmem:[#allocation11 + $0x69c] ss:$28 sps:$4 sm:$0xff]   ;;  %v7076_v42 = vld [vmem:[#allocation11 + $0x708] ss:$28 sps:$4 sm:$0xff]  }
 0x365   :  { %v7073_v51 = vld [vmem:[#allocation11 + $0x698] ss:$28 sps:$4 sm:$0xff]  }
 0x366   :  { %4804 = vmatmul.mubr.bf16.vlgmr.msra.gmra.mxu1 %v8271_v26 }
 0x367   :  { %4825 = vmatpush1.bf16.msra.mxu1 %v7007_v29  ;;  %4878 = vmatpush2.bf16.msra.mxu0 %v7010_v52  ;;  %v7081_v29 = vld [vmem:[#allocation11 + $0x664] ss:$28 sps:$4 sm:$0xff]   ;;  %v7084_v52 = vld [vmem:[#allocation11 + $0xa54] ss:$28 sps:$4 sm:$0xff]  }
 0x368   :  { %4826 = vmatprep.subr.bf16.mxu1 %v7015_v43  ;;  %4879 = vmatprep.subr.bf16.mxu0 %v7018_v39  ;;  %v7079_v43 = vld [vmem:[#allocation11 + $0x660] ss:$28 sps:$4 sm:$0xff]   ;;  %v7082_v39 = vld [vmem:[#allocation11 + $0xa50] ss:$28 sps:$4 sm:$0xff]  }
 0x369   :  { %4844 = vmatprep.mubr.bf16.mxu1 %v7487_v1 }
 0x36b   :  { %4827 = vmatpush1.bf16.msra.mxu1 %v7013_v44  ;;  %4880 = vmatpush2.bf16.msra.mxu0 %v7016_v41  ;;  %v7087_v44 = vld [vmem:[#allocation11 + $0x62c] ss:$28 sps:$4 sm:$0xff]   ;;  %v7090_v41 = vld [vmem:[#allocation11 + $0xa1c] ss:$28 sps:$4 sm:$0xff]  }
 0x36c   :  { %4881 = vmatprep.subr.bf16.mxu0 %v7021_v45  ;;  %4894 = vmatprep.subr.bf16.mxu1 %v7024_v4  ;;  %v7088_v45 = vld [vmem:[#allocation11 + $0xa18] ss:$28 sps:$4 sm:$0xff]  }
 0x36d   :  { %v7093_v4 = vld [vmem:[#allocation11 + $0x5f4] ss:$28 sps:$4 sm:$0xff]  }
 0x36e   :  { %6271 = vmatmul.mubr.msk.bf16.vlgmr.msra.gmra.mxu1 %vm4685_vm11, %v8276_v54 }
 0x36f   :  { %4882 = vmatpush2.bf16.msra.mxu0 %v7019_v50  ;;  %4895 = vmatpush1.bf16.msra.mxu1 %v7022_v28  ;;  %v7096_v50 = vld [vmem:[#allocation11 + $0x9e4] ss:$28 sps:$4 sm:$0xff]   ;;  %v7091_v28 = vld [vmem:[#allocation11 + $0x5f0] ss:$28 sps:$4 sm:$0xff]  }
 0x370   :  { %4926 = vmatprep.mubr.bf16.mxu1 %v8241_v14  ;;  %4883 = vmatprep.subr.bf16.mxu0 %v7027_v59  ;;  %v7094_v59 = vld [vmem:[#allocation11 + $0x9e0] ss:$28 sps:$4 sm:$0xff]  }
 0x371   :  { %4896 = vmatprep.subr.bf16.mxu1 %v7030_v16  ;;  %v7099_v16 = vld [vmem:[#allocation11 + $0x5bc] ss:$28 sps:$4 sm:$0xff]  }
 0x373   :  { %4884 = vmatpush2.bf16.msra.mxu0 %v7025_v60  ;;  %4897 = vmatpush1.bf16.msra.mxu1 %v7028_v62  ;;  %v7102_v60 = vld [vmem:[#allocation11 + $0x9ac] ss:$28 sps:$4 sm:$0xff]   ;;  %v7097_v62 = vld [vmem:[#allocation11 + $0x5b8] ss:$28 sps:$4 sm:$0xff]  }
 0x374   :  { %4898 = vmatprep.subr.bf16.mxu1 %v7033_v63  ;;  %4935 = vmatprep.subr.bf16.mxu0 %v7036_v0  ;;  %v7100_v63 = vld [vmem:[#allocation11 + $0x9a8] ss:$28 sps:$4 sm:$0xff]  }
 0x375   :  { %v7105_v0 = vld [vmem:[#allocation11 + $0x584] ss:$28 sps:$4 sm:$0xff]  }
 0x376   :  { %4886 = vmatmul.mubr.bf16.vlgmr.msra.gmra.mxu0 %v8229_v48 }
 0x377   :  { %4899 = vmatpush1.bf16.msra.mxu1 %v7031_v3  ;;  %4936 = vmatpush1.bf16.msra.mxu0 %v7034_v5  ;;  %v7108_v3 = vld [vmem:[#allocation11 + $0x974] ss:$28 sps:$4 sm:$0xff]   ;;  %v7103_v5 = vld [vmem:[#allocation11 + $0x580] ss:$28 sps:$4 sm:$0xff]  }
 0x378   :  { %4967 = vmatprep.mubr.bf16.mxu0 %v8260_v46  ;;  %4900 = vmatprep.subr.bf16.mxu1 %v7039_v49  ;;  %v7106_v49 = vld [vmem:[#allocation11 + $0x970] ss:$28 sps:$4 sm:$0xff]  }
 0x379   :  { %4937 = vmatprep.subr.bf16.mxu0 %v7042_v6  ;;  %v7111_v6 = vld [vmem:[#allocation11 + $0x54c] ss:$28 sps:$4 sm:$0xff]  }
 0x37b   :  { %4901 = vmatpush1.bf16.msra.mxu1 %v7037_v61  ;;  %4938 = vmatpush1.bf16.msra.mxu0 %v7040_v9  ;;  %v7114_v61 = vld [vmem:[#allocation11 + $0x93c] ss:$28 sps:$4 sm:$0xff]   ;;  %v7109_v9 = vld [vmem:[#allocation11 + $0x548] ss:$28 sps:$4 sm:$0xff]  }
 0x37c   :  { %4902 = vmatprep.subr.bf16.mxu1 %v7045_v10  ;;  %4939 = vmatprep.subr.bf16.mxu0 %v7048_v11  ;;  %v7112_v10 = vld [vmem:[#allocation11 + $0x938] ss:$28 sps:$4 sm:$0xff]   ;;  %v7117_v11 = vld [vmem:[#allocation11 + $0x904] ss:$28 sps:$4 sm:$0xff]  }
 0x37f   :  { %4903 = vmatpush1.bf16.msra.mxu1 %v7043_v12  ;;  %4940 = vmatpush1.bf16.msra.mxu0 %v7046_v13  ;;  %v7120_v12 = vld [vmem:[#allocation11 + $0xac4] ss:$28 sps:$4 sm:$0xff]  }
 0x380   :  { %4904 = vmatprep.subr.bf16.mxu1 %v7051_v8  ;;  %4941 = vmatprep.subr.bf16.mxu0 %v7054_v33  ;;  %v7115_v13 = vld [vmem:[#allocation11 + $0x900] ss:$28 sps:$4 sm:$0xff]   ;;  %v7123_v33 = vld [vmem:[#allocation11 + $0x8cc] ss:$28 sps:$4 sm:$0xff]  }
 0x381   :  { %v7118_v8 = vld [vmem:[#allocation11 + $0xac0] ss:$28 sps:$4 sm:$0xff]  }
 0x383   :  { %4905 = vmatpush1.bf16.msra.mxu1 %v7049_v15  ;;  %4942 = vmatpush1.bf16.msra.mxu0 %v7052_v24  ;;  %v7126_v15 = vld [vmem:[#allocation11 + $0xa8c] ss:$28 sps:$4 sm:$0xff]  }
 0x384   :  { %4906 = vmatprep.subr.bf16.mxu1 %v7057_v18  ;;  %4943 = vmatprep.subr.bf16.mxu0 %v7060_v19  ;;  %v7121_v24 = vld [vmem:[#allocation11 + $0x8c8] ss:$28 sps:$4 sm:$0xff]   ;;  %v7129_v19 = vld [vmem:[#allocation11 + $0x19c] ss:$28 sps:$4 sm:$0xff]  }
 0x385   :  { %v7124_v18 = vld [vmem:[#allocation11 + $0xa88] ss:$28 sps:$4 sm:$0xff]  }
 0x387   :  { %4907 = vmatpush1.bf16.msra.mxu1 %v7055_v20  ;;  %4944 = vmatpush1.bf16.msra.mxu0 %v7058_v56  ;;  %v7132_v20 = vld [vmem:[#allocation11 + $0x51c] ss:$28 sps:$4 sm:$0xff]  }
 0x388   :  { %4908 = vmatprep.subr.bf16.mxu1 %v7063_v21  ;;  %4945 = vmatprep.subr.bf16.mxu0 %v7066_v23  ;;  %v7127_v56 = vld [vmem:[#allocation11 + $0x198] ss:$28 sps:$4 sm:$0xff]   ;;  %v7135_v23 = vld [vmem:[#allocation11 + $0x164] ss:$28 sps:$4 sm:$0xff]  }
 0x389   :  { %v7130_v21 = vld [vmem:[#allocation11 + $0x518] ss:$28 sps:$4 sm:$0xff]  }
 0x38b   :  { %4909 = vmatpush1.bf16.msra.mxu1 %v7061_v25  ;;  %4946 = vmatpush1.bf16.msra.mxu0 %v7064_v32  ;;  %v7138_v25 = vld [vmem:[#allocation11 + $0x4e4] ss:$28 sps:$4 sm:$0xff]  }
 0x38c   :  { %4910 = vmatprep.subr.bf16.mxu1 %v7069_v27  ;;  %4947 = vmatprep.subr.bf16.mxu0 %v7072_v35  ;;  %v7133_v32 = vld [vmem:[#allocation11 + $0x160] ss:$28 sps:$4 sm:$0xff]   ;;  %v7141_v35 = vld [vmem:[#allocation11 + $0x12c] ss:$28 sps:$4 sm:$0xff]  }
 0x38d   :  { %v7136_v27 = vld [vmem:[#allocation11 + $0x4e0] ss:$28 sps:$4 sm:$0xff]  }
 0x38f   :  { %4911 = vmatpush2.bf16.msra.mxu1 %v7067_v7  ;;  %4948 = vmatpush1.bf16.msra.mxu0 %v7070_v36  ;;  %v7144_v7 = vld [vmem:[#allocation11 + $0x4ac] ss:$28 sps:$4 sm:$0xff]  }
 0x390   :  { %4912 = vmatprep.subr.bf16.mxu1 %v7075_v34  ;;  %4949 = vmatprep.subr.bf16.mxu0 %v7078_v40  ;;  %v7139_v36 = vld [vmem:[#allocation11 + $0x128] ss:$28 sps:$4 sm:$0xff]   ;;  %v7147_v40 = vld [vmem:[#allocation11 + $0xf4] ss:$28 sps:$4 sm:$0xff]  }
 0x391   :  { %v7142_v34 = vld [vmem:[#allocation11 + $0x4a8] ss:$28 sps:$4 sm:$0xff]  }
 0x393   :  { %4913 = vmatpush2.bf16.msra.mxu1 %v7073_v51  ;;  %4950 = vmatpush1.bf16.msra.mxu0 %v7076_v42  ;;  %v7150_v51 = vld [vmem:[#allocation11 + $0x474] ss:$28 sps:$4 sm:$0xff]  }
 0x394   :  { %4914 = vmatprep.subr.bf16.mxu1 %v7081_v29  ;;  %4951 = vmatprep.subr.bf16.mxu0 %v7084_v52  ;;  %v7145_v42 = vld [vmem:[#allocation11 + $0xf0] ss:$28 sps:$4 sm:$0xff]   ;;  %v7153_v52 = vld [vmem:[#allocation11 + $0xbc] ss:$28 sps:$4 sm:$0xff]  }
 0x395   :  { %v7148_v29 = vld [vmem:[#allocation11 + $0x470] ss:$28 sps:$4 sm:$0xff]  }
 0x397   :  { %4915 = vmatpush2.bf16.msra.mxu1 %v7079_v43  ;;  %4952 = vmatpush2.bf16.msra.mxu0 %v7082_v39  ;;  %v7156_v43 = vld [vmem:[#allocation11 + $0x43c] ss:$28 sps:$4 sm:$0xff]  }
 0x398   :  { %4916 = vmatprep.subr.bf16.mxu1 %v7087_v44  ;;  %4953 = vmatprep.subr.bf16.mxu0 %v7090_v41  ;;  %v7151_v39 = vld [vmem:[#allocation11 + $0xb8] ss:$28 sps:$4 sm:$0xff]   ;;  %v7159_v41 = vld [vmem:[#allocation11 + $0x84] ss:$28 sps:$4 sm:$0xff]  }
 0x399   :  { %v7154_v44 = vld [vmem:[#allocation11 + $0x438] ss:$28 sps:$4 sm:$0xff]  }
 0x39b   :  { %4917 = vmatpush2.bf16.msra.mxu1 %v7085_v31  ;;  %4954 = vmatpush2.bf16.msra.mxu0 %v7088_v45  ;;  %v7162_v31 = vld [vmem:[#allocation11 + $0x404] ss:$28 sps:$4 sm:$0xff]  }
 0x39c   :  { %4918 = vmatprep.subr.bf16.mxu1 %v7093_v4  ;;  %4955 = vmatprep.subr.bf16.mxu0 %v7096_v50  ;;  %v7157_v45 = vld [vmem:[#allocation11 + $0x80] ss:$28 sps:$4 sm:$0xff]   ;;  %v7165_v50 = vld [vmem:[#allocation11 + $0x4c] ss:$28 sps:$4 sm:$0xff]  }
 0x39d   :  { %v7160_v4 = vld [vmem:[#allocation11 + $0x400] ss:$28 sps:$4 sm:$0xff]  }
 0x39f   :  { %4919 = vmatpush2.bf16.msra.mxu1 %v7091_v28  ;;  %4956 = vmatpush2.bf16.msra.mxu0 %v7094_v59  ;;  %v7168_v28 = vld [vmem:[#allocation11 + $0x3cc] ss:$28 sps:$4 sm:$0xff]  }
 0x3a0   :  { %4920 = vmatprep.subr.bf16.mxu1 %v7099_v16  ;;  %4957 = vmatprep.subr.bf16.mxu0 %v7102_v60  ;;  %v7163_v59 = vld [vmem:[#allocation11 + $0x48] ss:$28 sps:$4 sm:$0xff]   ;;  %v7171_v60 = vld [vmem:[#allocation11 + $0x14] ss:$28 sps:$4 sm:$0xff]  }
 0x3a1   :  { %v7166_v16 = vld [vmem:[#allocation11 + $0x3c8] ss:$28 sps:$4 sm:$0xff]  }
 0x3a3   :  { %4921 = vmatpush2.bf16.msra.mxu1 %v7097_v62  ;;  %4958 = vmatpush2.bf16.msra.mxu0 %v7100_v63  ;;  %v7174_v62 = vld [vmem:[#allocation11 + $0x394] ss:$28 sps:$4 sm:$0xff]  }
 0x3a4   :  { %4922 = vmatprep.subr.bf16.mxu1 %v7105_v0  ;;  %4959 = vmatprep.subr.bf16.mxu0 %v7108_v3  ;;  %v7169_v63 = vld [vmem:[#allocation11 + $0x10] ss:$28 sps:$4 sm:$0xff]   ;;  %v7177_v3 = vld [vmem:[#allocation11 + $0x35c] ss:$28 sps:$4 sm:$0xff]  }
 0x3a5   :  { %v7172_v0 = vld [vmem:[#allocation11 + $0x390] ss:$28 sps:$4 sm:$0xff]  }
 0x3a7   :  { %4923 = vmatpush2.bf16.msra.mxu1 %v7103_v5  ;;  %4960 = vmatpush2.bf16.msra.mxu0 %v7106_v49  ;;  %v7180_v5 = vld [vmem:[#allocation11 + $0x6dc] ss:$28 sps:$4 sm:$0xff]  }
 0x3a8   :  { %4924 = vmatprep.subr.bf16.mxu1 %v7111_v6  ;;  %4961 = vmatprep.subr.bf16.mxu0 %v7114_v61  ;;  %v7175_v49 = vld [vmem:[#allocation11 + $0x358] ss:$28 sps:$4 sm:$0xff]   ;;  %v7183_v61 = vld [vmem:[#allocation11 + $0x324] ss:$28 sps:$4 sm:$0xff]  }
 0x3a9   :  { %v7178_v6 = vld [vmem:[#allocation11 + $0x6d8] ss:$28 sps:$4 sm:$0xff]  }
 0x3ab   :  { %4925 = vmatpush2.bf16.msra.mxu1 %v7109_v9  ;;  %4962 = vmatpush2.bf16.msra.mxu0 %v7112_v10  ;;  %v7186_v9 = vld [vmem:[#allocation11 + $0x6a4] ss:$28 sps:$4 sm:$0xff]  }
 0x3ac   :  { %4963 = vmatprep.subr.bf16.mxu0 %v7117_v11  ;;  %4988 = vmatprep.subr.bf16.mxu1 %v7120_v12  ;;  %v7181_v10 = vld [vmem:[#allocation11 + $0x320] ss:$28 sps:$4 sm:$0xff]   ;;  %v7189_v12 = vld [vmem:[#allocation11 + $0x2ec] ss:$28 sps:$4 sm:$0xff]  }
 0x3ad   :  { %v7184_v11 = vld [vmem:[#allocation11 + $0x6a0] ss:$28 sps:$4 sm:$0xff]  }
 0x3ae   :  { %4927 = vmatmul.mubr.bf16.vlgmr.msra.gmra.mxu1 %v8243_v17 }
 0x3af   :  { %4964 = vmatpush2.bf16.msra.mxu0 %v7115_v13  ;;  %4989 = vmatpush1.bf16.msra.mxu1 %v7118_v8  ;;  %v7192_v13 = vld [vmem:[#allocation11 + $0x66c] ss:$28 sps:$4 sm:$0xff]  }
 0x3b0   :  { %4965 = vmatprep.subr.bf16.mxu0 %v7123_v33  ;;  %4990 = vmatprep.subr.bf16.mxu1 %v7126_v15  ;;  %v7187_v8 = vld [vmem:[#allocation11 + $0x2e8] ss:$28 sps:$4 sm:$0xff]   ;;  %v7195_v15 = vld [vmem:[#allocation11 + $0x2b4] ss:$28 sps:$4 sm:$0xff]  }
 0x3b1   :  { %5008 = vmatprep.mubr.bf16.mxu1 %v7487_v1  ;;  %v7190_v33 = vld [vmem:[#allocation11 + $0x668] ss:$28 sps:$4 sm:$0xff]  }
 0x3b3   :  { %4966 = vmatpush2.bf16.msra.mxu0 %v7121_v24  ;;  %4991 = vmatpush1.bf16.msra.mxu1 %v7124_v18  ;;  %v7198_v24 = vld [vmem:[#allocation11 + $0x634] ss:$28 sps:$4 sm:$0xff]  }
 0x3b4   :  { %5017 = vmatprep.subr.bf16.mxu1 %v7129_v19  ;;  %5058 = vmatprep.subr.bf16.mxu0 %v7132_v20  ;;  %v7193_v18 = vld [vmem:[#allocation11 + $0x2b0] ss:$28 sps:$4 sm:$0xff]   ;;  %v7201_v20 = vld [vmem:[#allocation11 + $0x27c] ss:$28 sps:$4 sm:$0xff]  }
 0x3b5   :  { %v7196_v19 = vld [vmem:[#allocation11 + $0x630] ss:$28 sps:$4 sm:$0xff]  }
 0x3b6   :  { %4968 = vmatmul.mubr.bf16.vlgmr.msra.gmra.mxu0 %v8271_v26  ;;  %6272 = vmatmul.mubr.msk.bf16.vlgmr.msra.gmra.mxu1 %vm4685_vm11, %v8276_v54 }
 0x3b7   :  { %5018 = vmatpush1.bf16.msra.mxu1 %v7127_v56  ;;  %5049 = vmatprep.mubr.bf16.mxu1 %v8227_v47  ;;  %v7204_v56 = vld [vmem:[#allocation11 + $0x5fc] ss:$28 sps:$4 sm:$0xff]  }
 0x3b8   :  { %5059 = vmatpush1.bf16.msra.mxu0 %v7130_v21  ;;  %5090 = vmatprep.mubr.bf16.mxu0 %v8241_v14  ;;  %v7199_v21 = vld [vmem:[#allocation11 + $0x278] ss:$28 sps:$4 sm:$0xff]  }
 0x3b9   :  { %5019 = vmatprep.subr.bf16.mxu1 %v7135_v23  ;;  %5060 = vmatprep.subr.bf16.mxu0 %v7138_v25  ;;  %v7202_v23 = vld [vmem:[#allocation11 + $0x5f8] ss:$28 sps:$4 sm:$0xff]   ;;  %v7207_v25 = vld [vmem:[#allocation11 + $0x244] ss:$28 sps:$4 sm:$0xff]  }
 0x3bb   :  { %5020 = vmatpush1.bf16.msra.mxu1 %v7133_v32  ;;  %v7210_v32 = vld [vmem:[#allocation11 + $0x5c4] ss:$28 sps:$4 sm:$0xff]  }
 0x3bc   :  { %5061 = vmatpush1.bf16.msra.mxu0 %v7136_v27  ;;  %5021 = vmatprep.subr.bf16.mxu1 %v7141_v35  ;;  %v7205_v35 = vld [vmem:[#allocation11 + $0x240] ss:$28 sps:$4 sm:$0xff]  }
 0x3bd   :  { %5062 = vmatprep.subr.bf16.mxu0 %v7144_v7 }
 0x3bf   :  { %5022 = vmatpush1.bf16.msra.mxu1 %v7139_v36  ;;  %v7208_v36 = vld [vmem:[#allocation11 + $0x5c0] ss:$28 sps:$4 sm:$0xff]  }
 0x3c0   :  { %5063 = vmatpush1.bf16.msra.mxu0 %v7142_v34  ;;  %5023 = vmatprep.subr.bf16.mxu1 %v7147_v40  ;;  %v7213_v34 = vld [vmem:[#allocation11 + $0x20c] ss:$28 sps:$4 sm:$0xff]  }
 0x3c1   :  { %5064 = vmatprep.subr.bf16.mxu0 %v7150_v51  ;;  %v7216_v40 = vld [vmem:[#allocation11 + $0x58c] ss:$28 sps:$4 sm:$0xff]  }
 0x3c3   :  { %5024 = vmatpush1.bf16.msra.mxu1 %v7145_v42  ;;  %v7211_v42 = vld [vmem:[#allocation11 + $0x208] ss:$28 sps:$4 sm:$0xff]  }
 0x3c4   :  { %5065 = vmatpush1.bf16.msra.mxu0 %v7148_v29  ;;  %5025 = vmatprep.subr.bf16.mxu1 %v7153_v52  ;;  %v7214_v52 = vld [vmem:[#allocation11 + $0x588] ss:$28 sps:$4 sm:$0xff]  }
 0x3c5   :  { %5066 = vmatprep.subr.bf16.mxu0 %v7156_v43  ;;  %v7219_v43 = vld [vmem:[#allocation11 + $0x1d4] ss:$28 sps:$4 sm:$0xff]  }
 0x3c7   :  { %5026 = vmatpush1.bf16.msra.mxu1 %v7151_v39  ;;  %v7222_v39 = vld [vmem:[#allocation11 + $0x554] ss:$28 sps:$4 sm:$0xff]  }
 0x3c8   :  { %5067 = vmatpush1.bf16.msra.mxu0 %v7154_v44  ;;  %5027 = vmatprep.subr.bf16.mxu1 %v7159_v41  ;;  %v8292_v44 = vld [vmem:[#allocation13] sm:$0x7f] }
 0x3c9   :  { %5068 = vmatprep.subr.bf16.mxu0 %v7162_v31  ;;  %v7217_v41 = vld [vmem:[#allocation11 + $0x1d0] ss:$28 sps:$4 sm:$0xff]  }
 0x3ca   :  { %v7220_v31 = vld [vmem:[#allocation11 + $0x550] ss:$28 sps:$4 sm:$0xff]  }
 0x3cb   :  { %5028 = vmatpush1.bf16.msra.mxu1 %v7157_v45  ;;  %v7225_v45 = vld [vmem:[#allocation11 + $0x89c] ss:$28 sps:$4 sm:$0xff]  }
 0x3cc   :  { %5069 = vmatpush1.bf16.msra.mxu0 %v7160_v4  ;;  %5029 = vmatprep.subr.bf16.mxu1 %v7165_v50  ;;  %v2853_v4 = vrot.slane %v8292_v44, %v2394_v2  ;;  %v7228_v50 = vld [vmem:[#allocation11 + $0xacc] ss:$28 sps:$4 sm:$0xff]   ;;  %v7229_v2 = vld [vmem:[#allocation11 + $0x860] ss:$28 sps:$4 sm:$0xff]  }
 0x3cd   :  { %5070 = vmatprep.subr.bf16.mxu0 %v7168_v28  ;;  %v7223_v28 = vld [vmem:[#allocation11 + $0x898] ss:$28 sps:$4 sm:$0xff]  }
 0x3cf   :  { %5030 = vmatpush1.bf16.msra.mxu1 %v7163_v59  ;;  %v7226_v59 = vld [vmem:[#allocation11 + $0xac8] ss:$28 sps:$4 sm:$0xff]  }
 0x3d0   :  { %5071 = vmatpush1.bf16.msra.mxu0 %v7166_v16  ;;  %5031 = vmatprep.subr.bf16.mxu1 %v7171_v60  ;;  %v7231_v60 = vld [vmem:[#allocation11 + $0x864] ss:$28 sps:$4 sm:$0xff]  }
 0x3d1   :  { %5072 = vmatprep.subr.bf16.mxu0 %v7174_v62  ;;  %v7234_v62 = vld [vmem:[#allocation11 + $0xa94] ss:$28 sps:$4 sm:$0xff]  }
 0x3d3   :  { %5032 = vmatpush1.bf16.msra.mxu1 %v7169_v63 }
 0x3d4   :  { %5073 = vmatpush1.bf16.msra.mxu0 %v7172_v0  ;;  %5033 = vmatprep.subr.bf16.mxu1 %v7177_v3 }
 0x3d5   :  { %5074 = vmatprep.subr.bf16.mxu0 %v7180_v5  ;;  %v7232_v5 = vld [vmem:[#allocation11 + $0xa90] ss:$28 sps:$4 sm:$0xff]  }
 0x3d7   :  { %5034 = vmatpush2.bf16.msra.mxu1 %v7175_v49  ;;  %v7237_v49 = vld [vmem:[#allocation11 + $0x82c] ss:$28 sps:$4 sm:$0xff]  }
 0x3d8   :  { %5075 = vmatpush2.bf16.msra.mxu0 %v7178_v6  ;;  %5035 = vmatprep.subr.bf16.mxu1 %v7183_v61  ;;  %v7238_v6 = vld [vmem:[#allocation11 + $0x360] ss:$28 sps:$4 sm:$0xff]  }
 0x3d9   :  { %5076 = vmatprep.subr.bf16.mxu0 %v7186_v9  ;;  %v7235_v9 = vld [vmem:[#allocation11 + $0x828] ss:$28 sps:$4 sm:$0xff]  }
 0x3db   :  { %5036 = vmatpush2.bf16.msra.mxu1 %v7181_v10 }
 0x3dc   :  { %5077 = vmatpush2.bf16.msra.mxu0 %v7184_v11  ;;  %5037 = vmatprep.subr.bf16.mxu1 %v7189_v12  ;;  %v7239_v11 = vld [vmem:[#allocation11 + $0x1a0] ss:$28 sps:$4 sm:$0xff]   ;;  %v7242_v12 = vld [vmem:[#allocation11 + $0x7f4] ss:$28 sps:$4 sm:$0xff]  }
 0x3dd   :  { %5078 = vmatprep.subr.bf16.mxu0 %v7192_v13  ;;  %v7243_v13 = vld [vmem:[#allocation11 + $0x328] ss:$28 sps:$4 sm:$0xff]  }
 0x3df   :  { %5038 = vmatpush2.bf16.msra.mxu1 %v7187_v8  ;;  %v7240_v8 = vld [vmem:[#allocation11 + $0x7f0] ss:$28 sps:$4 sm:$0xff]  }
 0x3e0   :  { %5079 = vmatpush2.bf16.msra.mxu0 %v7190_v33  ;;  %5039 = vmatprep.subr.bf16.mxu1 %v7195_v15  ;;  %v7244_v33 = vld [vmem:[#allocation11 + $0x168] ss:$28 sps:$4 sm:$0xff]   ;;  %v7247_v15 = vld [vmem:[#allocation11 + $0x7bc] ss:$28 sps:$4 sm:$0xff]  }
 0x3e1   :  { %5080 = vmatprep.subr.bf16.mxu0 %v7198_v24  ;;  %v7245_v24 = vld [vmem:[#allocation11 + $0x7b8] ss:$28 sps:$4 sm:$0xff]  }
 0x3e3   :  { %5040 = vmatpush2.bf16.msra.mxu1 %v7193_v18  ;;  %v7249_v18 = vld [vmem:[#allocation11 + $0x130] ss:$28 sps:$4 sm:$0xff]  }
 0x3e4   :  { %5081 = vmatpush2.bf16.msra.mxu0 %v7196_v19  ;;  %5041 = vmatprep.subr.bf16.mxu1 %v7201_v20  ;;  %v7252_v19 = vld [vmem:[#allocation11 + $0x784] ss:$28 sps:$4 sm:$0xff]   ;;  %v7253_v20 = vld [vmem:[#allocation11 + $0x2b8] ss:$28 sps:$4 sm:$0xff]  }
 0x3e5   :  { %5082 = vmatprep.subr.bf16.mxu0 %v7204_v56  ;;  %v7250_v56 = vld [vmem:[#allocation11 + $0x780] ss:$28 sps:$4 sm:$0xff]  }
 0x3e6   :  { %v4723_v27 = vpop.f32.mrf.mxu1 }
 0x3e7   :  { %5042 = vmatpush2.bf16.msra.mxu1 %v7199_v21  ;;  %v4724_v16 = vadd.f32 %v4723_v27, %v2853_v4  ;;  %v7254_v21 = vld [vmem:[#allocation11 + $0xf8] ss:$28 sps:$4 sm:$0xff]   ;;  %v7275_v4 = vld [vmem:[#allocation11 + $0x9e8] ss:$28 sps:$4 sm:$0xff]  }
 0x3e8   :  { %5083 = vmatpush2.bf16.msra.mxu0 %v7202_v23  ;;  %v8290_v7 = vpop.f32.mrf.mxu1  ;;  %5043 = vmatprep.subr.bf16.mxu1 %v7207_v25  ;;  %v7257_v23 = vld [vmem:[#allocation11 + $0x74c] ss:$28 sps:$4 sm:$0xff]   ;;  %v7262_v27 = vld [vmem:[#allocation11 + $0x714] ss:$28 sps:$4 sm:$0xff]  }
 0x3e9   :  { %5084 = vmatprep.subr.bf16.mxu0 %v7210_v32  ;;  %v7255_v25 = vld [vmem:[#allocation11 + $0x748] ss:$28 sps:$4 sm:$0xff]   ;;  %v7259_v32 = vld [vmem:[#allocation11 + $0xc0] ss:$28 sps:$4 sm:$0xff]  }
 0x3ea   :  { %v4727_v51 = vpop.f32.mrf.mxu1 }
 0x3eb   :  { %5044 = vmatpush2.bf16.msra.mxu1 %v7205_v35  ;;  %v7263_v35 = vld [vmem:[#allocation11 + $0x248] ss:$28 sps:$4 sm:$0xff]   ;;  %v7268_v51 = vld [vmem:[#allocation11 + $0x210] ss:$28 sps:$4 sm:$0xff]  }
 0x3ec   :  { %5085 = vmatpush2.bf16.msra.mxu0 %v7208_v36  ;;  %v4728_v29 = vpop.f32.mrf.mxu1  ;;  %5045 = vmatprep.subr.bf16.mxu1 %v7213_v34  ;;  %v7260_v36 = vld [vmem:[#allocation11 + $0x710] ss:$28 sps:$4 sm:$0xff]   ;;  %v7264_v34 = vld [vmem:[#allocation11 + $0x88] ss:$28 sps:$4 sm:$0xff]  }
 0x3ed   :  { %5086 = vmatprep.subr.bf16.mxu0 %v7216_v40  ;;  %v7267_v40 = vld [vmem:[#allocation11 + $0xa5c] ss:$28 sps:$4 sm:$0xff]   ;;  %v7269_v29 = vld [vmem:[#allocation11 + $0x50] ss:$28 sps:$4 sm:$0xff]  }
 0x3ef   :  { %5046 = vmatpush2.bf16.msra.mxu1 %v7211_v42  ;;  %v7265_v42 = vld [vmem:[#allocation11 + $0xa58] ss:$28 sps:$4 sm:$0xff]  }
 0x3f0   :  { %5087 = vmatpush2.bf16.msra.mxu0 %v7214_v52  ;;  %5047 = vmatprep.subr.bf16.mxu1 %v7219_v43  ;;  %v7272_v52 = vld [vmem:[#allocation11 + $0xa24] ss:$28 sps:$4 sm:$0xff]   ;;  %v7273_v43 = vld [vmem:[#allocation11 + $0x1d8] ss:$28 sps:$4 sm:$0xff]  }
 0x3f1   :  { %5088 = vmatprep.subr.bf16.mxu0 %v7222_v39  ;;  %v7270_v39 = vld [vmem:[#allocation11 + $0xa20] ss:$28 sps:$4 sm:$0xff]  }
 0x3f3   :  { %5048 = vmatpush2.bf16.msra.mxu1 %v7217_v41  ;;  %v7274_v41 = vld [vmem:[#allocation11 + $0x18] ss:$28 sps:$4 sm:$0xff]  }
 0x3f4   :  { %5089 = vmatpush2.bf16.msra.mxu0 %v7220_v31  ;;  %5099 = vmatprep.subr.bf16.mxu1 %v7225_v45  ;;  %v7277_v31 = vld [vmem:[#allocation11 + $0x9ec] ss:$28 sps:$4 sm:$0xff]   ;;  %v7278_v45 = vld [vmem:[#allocation11 + $0xa60] ss:$28 sps:$4 sm:$0xff]  }
 0x3f5   :  { %5152 = vmatprep.subr.bf16.mxu0 %v7228_v50  ;;  %v7279_v50 = vld [vmem:[#allocation11 + $0x8a0] ss:$28 sps:$4 sm:$0xff]  }
 0x3f6   :  { %5050 = vmatmul.mubr.bf16.vlgmr.msra.gmra.mxu1 %v8229_v48  ;;  %v4764_v63 = vpop.f32.mrf.mxu0 }
 0x3f7   :  { %5091 = vmatmul.mubr.bf16.vlgmr.msra.gmra.mxu0 %v8243_v17  ;;  %v8299_v0 = vadd.f32 %v4764_v63, %v4724_v16  ;;  %5100 = vmatpush1.bf16.msra.mxu1 %v7223_v28  ;;  %v7282_v28 = vld [vmem:[#allocation11 + $0x9b4] ss:$28 sps:$4 sm:$0xff]  }
 0x3f8   :  { %5131 = vmatprep.mubr.bf16.mxu1 %v8260_v46  ;;  %5153 = vmatpush1.bf16.msra.mxu0 %v7226_v59  ;;  %v8302_v3 = vpop.f32.mrf.mxu0  ;;  %v7283_v59 = vld [vmem:[#allocation11 + $0xa28] ss:$28 sps:$4 sm:$0xff]   ;;  %v7280_v16 = vld [vmem:[#allocation11 + $0x9b0] ss:$28 sps:$4 sm:$0xff]  }
 0x3f9   :  { %5101 = vmatprep.subr.bf16.mxu1 %v7231_v60  ;;  %5154 = vmatprep.subr.bf16.mxu0 %v7234_v62  ;;  %v7284_v60 = vld [vmem:[#allocation11 + $0x868] ss:$28 sps:$4 sm:$0xff]   ;;  %v7287_v62 = vld [vmem:[#allocation11 + $0x97c] ss:$28 sps:$4 sm:$0xff]   ;;  %v7288_v63 = vld [vmem:[#allocation11 + $0x9f0] ss:$28 sps:$4 sm:$0xff]  }
 0x3fa   :  { %v4768_v61 = vpop.f32.mrf.mxu0  ;;  %5172 = vmatprep.mubr.bf16.mxu0 %v7487_v1  ;;  %v7248_v1 = vld [vmem:[#allocation11 + $0x2f0] ss:$28 sps:$4 sm:$0xff]  }
 0x3fb   :  { %5102 = vmatpush1.bf16.msra.mxu1 %v7229_v2  ;;  %v7285_v2 = vld [vmem:[#allocation11 + $0x978] ss:$28 sps:$4 sm:$0xff]  }
 0x3fc   :  { %5155 = vmatpush1.bf16.msra.mxu0 %v7232_v5  ;;  %v4769_v10 = vpop.f32.mrf.mxu0  ;;  %5103 = vmatprep.subr.bf16.mxu1 %v7237_v49  ;;  %v7289_v5 = vld [vmem:[#allocation11 + $0x830] ss:$28 sps:$4 sm:$0xff]   ;;  %v7292_v49 = vld [vmem:[#allocation11 + $0x944] ss:$28 sps:$4 sm:$0xff]  }
 0x3fd   :  { %6343 = vmatprep.subr.bf16.mxu0 %v7238_v6  ;;  %v7293_v6 = vld [vmem:[#allocation11 + $0x9b8] ss:$28 sps:$4 sm:$0xff]   ;;  %v7297_v10 = vld [vmem:[#allocation11 + $0x90c] ss:$28 sps:$4 sm:$0xff]  }
 0x3ff   :  { %6273 = vmatmul.mubr.msk.bf16.vlgmr.msra.gmra.mxu0 %vm4685_vm11, %v8276_v54  ;;  %5104 = vmatpush1.bf16.msra.mxu1 %v7235_v9 }
 0x400   :  { %6344 = vmatpush3.bf16.msra.mxu0 %v7239_v11  ;;  %5213 = vmatprep.mubr.bf16.mxu0 %v8227_v47  ;;  %v7258_v47 = vld [vmem:[#allocation11 + $0x280] ss:$28 sps:$4 sm:$0xff]  }
 0x401   :  { %5105 = vmatprep.subr.bf16.mxu1 %v7242_v12  ;;  %6345 = vmatprep.subr.bf16.mxu0 %v7243_v13  ;;  %v7298_v11 = vld [vmem:[#allocation11 + $0x980] ss:$28 sps:$4 sm:$0xff]   ;;  %v7295_v13 = vld [vmem:[#allocation11 + $0x908] ss:$28 sps:$4 sm:$0xff]  }
 0x403   :  { %5106 = vmatpush1.bf16.msra.mxu1 %v7240_v8 }
 0x404   :  { %6346 = vmatpush3.bf16.msra.mxu0 %v7244_v33  ;;  %5107 = vmatprep.subr.bf16.mxu1 %v7247_v15  ;;  %v7299_v33 = vld [vmem:[#allocation11 + $0x7c0] ss:$28 sps:$4 sm:$0xff]   ;;  %v7302_v15 = vld [vmem:[#allocation11 + $0x8d4] ss:$28 sps:$4 sm:$0xff]  }
 0x405   :  { %6347 = vmatprep.subr.bf16.mxu0 %v7248_v1  ;;  %v7303_v1 = vld [vmem:[#allocation11 + $0x948] ss:$28 sps:$4 sm:$0xff]  }
 0x407   :  { %5108 = vmatpush1.bf16.msra.mxu1 %v7245_v24 }
 0x408   :  { %6348 = vmatpush3.bf16.msra.mxu0 %v7249_v18  ;;  %5109 = vmatprep.subr.bf16.mxu1 %v7252_v19  ;;  %v7300_v18 = vld [vmem:[#allocation11 + $0x8d0] ss:$28 sps:$4 sm:$0xff]   ;;  %v2857_v19 = vrot.slane %v8292_v44, %v2398_v38 }
 0x409   :  { %6349 = vmatprep.subr.bf16.mxu0 %v7253_v20 }
 0x40b   :  { %5110 = vmatpush1.bf16.msra.mxu1 %v7250_v56  ;;  %v7304_v56 = vld [vmem:[#allocation11 + $0x788] ss:$28 sps:$4 sm:$0xff]  }
 0x40c   :  { %6350 = vmatpush3.bf16.msra.mxu0 %v7254_v21  ;;  %5111 = vmatprep.subr.bf16.mxu1 %v7257_v23  ;;  %v7305_v21 = vld [vmem:[#allocation11 + $0x6e0] ss:$28 sps:$4 sm:$0xff]   ;;  %v7306_v23 = vld [vmem:[#allocation11 + $0x910] ss:$28 sps:$4 sm:$0xff]  }
 0x40d   :  { %6351 = vmatprep.subr.bf16.mxu0 %v7258_v47 }
 0x40f   :  { %5112 = vmatpush1.bf16.msra.mxu1 %v7255_v25  ;;  %v7307_v25 = vld [vmem:[#allocation11 + $0x520] ss:$28 sps:$4 sm:$0xff]  }
 0x410   :  { %6352 = vmatpush3.bf16.msra.mxu0 %v7259_v32  ;;  %5113 = vmatprep.subr.bf16.mxu1 %v7262_v27  ;;  %v4726_v32 = vadd.f32 %v8290_v7, %v2857_v19  ;;  %v5370_v19 = vld [vmem:[%s8671_s8 + $0xb0] sm:$0xff] }
 0x411   :  { %6353 = vmatprep.subr.bf16.mxu0 %v7263_v35  ;;  %v7308_v35 = vld [vmem:[#allocation11 + $0x750] ss:$28 sps:$4 sm:$0xff]  }
 0x412   :  { %v4767_v38 = vadd.f32 %v8302_v3, %v4726_v32  ;;  %v5379_v3 = vld [vmem:[%s8671_s8 + $0xf8] sm:$0xff] }
 0x413   :  { %5114 = vmatpush1.bf16.msra.mxu1 %v7260_v36  ;;  %v7309_v36 = vld [vmem:[#allocation11 + $0x6a8] ss:$28 sps:$4 sm:$0xff]   ;;  %v7325_v32 = vld [vmem:[#allocation11 + $0xad0] ss:$28 sps:$4 sm:$0xff]  }
 0x414   :  { %6354 = vmatpush3.bf16.msra.mxu0 %v7264_v34  ;;  %5115 = vmatprep.subr.bf16.mxu1 %v7267_v40  ;;  %v7310_v34 = vld [vmem:[#allocation11 + $0x8d8] ss:$28 sps:$4 sm:$0xff]  }
 0x415   :  { %6355 = vmatprep.subr.bf16.mxu0 %v7268_v51  ;;  %v7311_v51 = vld [vmem:[#allocation11 + $0x4e8] ss:$28 sps:$4 sm:$0xff]  }
 0x417   :  { %5116 = vmatpush2.bf16.msra.mxu1 %v7265_v42 }
 0x418   :  { %6356 = vmatpush3.bf16.msra.mxu0 %v7269_v29  ;;  %5117 = vmatprep.subr.bf16.mxu1 %v7272_v52  ;;  %v7312_v29 = vld [vmem:[#allocation11 + $0x718] ss:$28 sps:$4 sm:$0xff]   ;;  %v7313_v52 = vld [vmem:[#allocation11 + $0x670] ss:$28 sps:$4 sm:$0xff]  }
 0x419   :  { %6357 = vmatprep.subr.bf16.mxu0 %v7273_v43 }
 0x41b   :  { %5118 = vmatpush2.bf16.msra.mxu1 %v7270_v39 }
 0x41c   :  { %6358 = vmatpush3.bf16.msra.mxu0 %v7274_v41  ;;  %5119 = vmatprep.subr.bf16.mxu1 %v7277_v31  ;;  %v7314_v41 = vld [vmem:[#allocation11 + $0x4b0] ss:$28 sps:$4 sm:$0xff]  }
 0x41d   :  { %6387 = vmatprep.subr.bf16.mxu0 %v7278_v45  ;;  %v7315_v45 = vld [vmem:[#allocation11 + $0x638] ss:$28 sps:$4 sm:$0xff]  }
 0x41f   :  { %5214 = vmatmul.mubr.bf16.vlgmr.msra.gmra.mxu0 %v8229_v48  ;;  %5120 = vmatpush2.bf16.msra.mxu1 %v7275_v4  ;;  %v7290_v48 = vld [vmem:[#allocation11 + $0x940] ss:$28 sps:$4 sm:$0xff]  }
 0x420   :  { %6388 = vmatpush3.bf16.msra.mxu0 %v7279_v50  ;;  %5293 = vmatprep.mubr.bf16.mxu0 %v8260_v46  ;;  %v7294_v46 = vld [vmem:[#allocation11 + $0x7f8] ss:$28 sps:$4 sm:$0xff]   ;;  %v5378_v50 = vld [vmem:[%s8671_s8 + $0xf0] sm:$0xff] }
 0x421   :  { %5121 = vmatprep.subr.bf16.mxu1 %v7282_v28  ;;  %6389 = vmatprep.subr.bf16.mxu0 %v7283_v59  ;;  %v5362_v28 = vld [vmem:[%s8671_s8 + $0x70] sm:$0xff]  ;;  %v7316_v59 = vld [vmem:[#allocation11 + $0x478] ss:$28 sps:$4 sm:$0xff]  }
 0x423   :  { %5122 = vmatpush2.bf16.msra.mxu1 %v7280_v16  ;;  %v5377_v16 = vld [vmem:[%s8671_s8 + $0xe8] sm:$0xff] }
 0x424   :  { %6390 = vmatpush3.bf16.msra.mxu0 %v7284_v60  ;;  %5123 = vmatprep.subr.bf16.mxu1 %v7287_v62  ;;  %v7317_v60 = vld [vmem:[#allocation11 + $0x600] ss:$28 sps:$4 sm:$0xff]  }
 0x425   :  { %6391 = vmatprep.subr.bf16.mxu0 %v7288_v63  ;;  %v5361_v62 = vld [vmem:[%s8671_s8 + $0x68] sm:$0xff]  ;;  %v5360_v63 = vld [vmem:[%s8671_s8 + $0x60] sm:$0xff] }
 0x426   :  { %v8310_v61 = vpop.f32.mrf.mxu1 }
 0x427   :  { %5124 = vmatpush2.bf16.msra.mxu1 %v7285_v2  ;;  %v7318_v2 = vld [vmem:[#allocation11 + $0x440] ss:$28 sps:$4 sm:$0xff]  }
 0x428   :  { %6392 = vmatpush3.bf16.msra.mxu0 %v7289_v5  ;;  %v4807_v9 = vpop.f32.mrf.mxu1  ;;  %5125 = vmatprep.subr.bf16.mxu1 %v7292_v49  ;;  %v5375_v5 = vld [vmem:[%s8671_s8 + $0xd8] sm:$0xff]  ;;  %v7319_v49 = vld [vmem:[#allocation11 + $0x5c8] ss:$28 sps:$4 sm:$0xff]  }
 0x429   :  { %6393 = vmatprep.subr.bf16.mxu0 %v7293_v6  ;;  %v4808_v42 = vadd.f32 %v4807_v9, %v4767_v38  ;;  %v5359_v6 = vld [vmem:[%s8671_s8 + $0x58] sm:$0xff]  ;;  %v5358_v9 = vld [vmem:[%s8671_s8 + $0x50] sm:$0xff] }
 0x42a   :  { %v4809_v12 = vpop.f32.mrf.mxu1  ;;  %v5350_v38 = vld [vmem:[%s8671_s8 + $0x10] sm:$0xff] }
 0x42b   :  { %5126 = vmatpush2.bf16.msra.mxu1 %v7290_v48  ;;  %v5374_v48 = vld [vmem:[%s8671_s8 + $0xd0] sm:$0xff]  ;;  %v5357_v12 = vld [vmem:[%s8671_s8 + $0x48] sm:$0xff] }
 0x42c   :  { %6394 = vmatpush3.bf16.msra.mxu0 %v7294_v46  ;;  %v4810_v8 = vpop.f32.mrf.mxu1  ;;  %5127 = vmatprep.subr.bf16.mxu1 %v7297_v10  ;;  %v7320_v46 = vld [vmem:[#allocation11 + $0x408] ss:$28 sps:$4 sm:$0xff]  }
 0x42d   :  { %6395 = vmatprep.subr.bf16.mxu0 %v7298_v11  ;;  %v5373_v10 = vld [vmem:[%s8671_s8 + $0xc8] sm:$0xff]  ;;  %v7321_v11 = vld [vmem:[#allocation11 + $0x590] ss:$28 sps:$4 sm:$0xff]   ;;  %v5356_v8 = vld [vmem:[%s8671_s8 + $0x40] sm:$0xff] }
 0x42e   :  { %v8312_v24 = vpop.f32.mrf.mxu1 }
 0x42f   :  { %5128 = vmatpush2.bf16.msra.mxu1 %v7295_v13  ;;  %v5372_v13 = vld [vmem:[%s8671_s8 + $0xc0] sm:$0xff] }
 0x430   :  { %6396 = vmatpush3.bf16.msra.mxu0 %v7299_v33  ;;  %v4848_v20 = vpop.f32.mrf.mxu1  ;;  %5129 = vmatprep.subr.bf16.mxu1 %v7302_v15  ;;  %v7322_v33 = vld [vmem:[#allocation11 + $0x3d0] ss:$28 sps:$4 sm:$0xff]  }
 0x431   :  { %6397 = vmatprep.subr.bf16.mxu0 %v7303_v1  ;;  %v4849_v43 = vadd.f32 %v4848_v20, %v4808_v42  ;;  %v5371_v15 = vld [vmem:[%s8671_s8 + $0xb8] sm:$0xff]  ;;  %v5354_v20 = vld [vmem:[%s8671_s8 + $0x30] sm:$0xff] }
 0x432   :  { %v4850_v47 = vpop.f32.mrf.mxu1  ;;  %v7323_v1 = vld [vmem:[#allocation11 + $0x558] ss:$28 sps:$4 sm:$0xff]  }
 0x433   :  { %5130 = vmatpush2.bf16.msra.mxu1 %v7300_v18  ;;  %v5342_v4 = vmax.f32 %v4849_v43, 0.0  ;;  %v5355_v18 = vld [vmem:[%s8671_s8 + $0x38] sm:$0xff]  ;;  %v5368_v47 = vld [vmem:[%s8671_s8 + $0xa0] sm:$0xff] }
 0x434   :  { %6398 = vmatpush3.bf16.msra.mxu0 %v7304_v56  ;;  %v4851_v27 = vpop.f32.mrf.mxu1  ;;  %6365 = vmatprep.subr.bf16.mxu1 %v7305_v21  ;;  %v7324_v56 = vld [vmem:[#allocation11 + $0x398] ss:$28 sps:$4 sm:$0xff]   ;;  %v5369_v21 = vld [vmem:[%s8671_s8 + $0xa8] sm:$0xff] }
 0x435   :  { %6399 = vmatprep.subr.bf16.mxu0 %v7306_v23  ;;  %v5353_v23 = vld [vmem:[%s8671_s8 + $0x28] sm:$0xff]  ;;  %v5367_v27 = vld [vmem:[%s8671_s8 + $0x98] sm:$0xff] }
 0x436   :  { %v8319_v40 = vpop.f32.mrf.mxu0  ;;  %5132 = vmatmul.mubr.bf16.vlgmr.msra.gmra.mxu1 %v8271_v26 }
 0x437   :  { %6366 = vmatpush3.bf16.msra.mxu1 %v7307_v25  ;;  %5253 = vmatprep.mubr.bf16.mxu1 %v8241_v14  ;;  %v5363_v14 = vld [vmem:[%s8671_s8 + $0x78] sm:$0xff]  ;;  %v5352_v25 = vld [vmem:[%s8671_s8 + $0x20] sm:$0xff] }
 0x438   :  { %6400 = vmatpush3.bf16.msra.mxu0 %v7308_v35  ;;  %v8323_v7 = vpop.f32.mrf.mxu0  ;;  %6367 = vmatprep.subr.bf16.mxu1 %v7309_v36  ;;  %v5351_v35 = vld [vmem:[%s8671_s8 + $0x18] sm:$0xff]  ;;  %v5366_v36 = vld [vmem:[%s8671_s8 + $0x90] sm:$0xff] }
 0x439   :  { %6401 = vmatprep.subr.bf16.mxu0 %v7310_v34  ;;  %v4806_v34 = vadd.f32 %v8310_v61, %v8299_v0  ;;  %v5349_v0 = vld [vmem:[%s8671_s8 + $0x8] sm:$0xff]  ;;  %v5411_v61 = vld [vmem:[%s8671_s8 + $0x1f8] sm:$0xff] }
 0x43a   :  { %v4891_v39 = vpop.f32.mrf.mxu0 }
 0x43b   :  { %6368 = vmatpush3.bf16.msra.mxu1 %v7311_v51  ;;  %v7326_v51 = vld [vmem:[#allocation11 + $0xa98] ss:$28 sps:$4 sm:$0xff]   ;;  %v4847_v42 = vadd.f32 %v8312_v24, %v4806_v34  ;;  %v5410_v39 = vld [vmem:[%s8671_s8 + $0x1f0] sm:$0xff] }
 0x43c   :  { %6402 = vmatpush3.bf16.msra.mxu0 %v7312_v29  ;;  %v4892_v31 = vpop.f32.mrf.mxu0  ;;  %6369 = vmatprep.subr.bf16.mxu1 %v7313_v52  ;;  %v5364_v29 = vld [vmem:[%s8671_s8 + $0x80] sm:$0xff]  ;;  %v5395_v52 = vld [vmem:[%s8671_s8 + $0x178] sm:$0xff]  ;;  %v5418_v34 = vld [vmem:[%s8671_s8 + $0x230] sm:$0xff] }
 0x43d   :  { %6412 = vmatprep.subr.mxu0 %v5379_v3  ;;  %v5348_v24 = vld [vmem:[%s8671_s8] sm:$0xff]  ;;  %v5341_v43 = vmax.f32 %v4847_v42, 0.0  ;;  %v5394_v3 = vld [vmem:[%s8671_s8 + $0x170] sm:$0xff]  ;;  %v5393_v31 = vld [vmem:[%s8671_s8 + $0x168] sm:$0xff] }
 0x43e   :  { %v5399_v42 = vld [vmem:[%s8671_s8 + $0x198] sm:$0xff] }
 0x43f   :  { %5294 = vmatmul.mubr.bf16.vlgmr.msra.gmra.mxu0 %v8271_v26  ;;  %6370 = vmatpush3.bf16.msra.mxu1 %v7314_v41  ;;  %v5376_v26 = vld [vmem:[%s8671_s8 + $0xe0] sm:$0xff]  ;;  %v5409_v41 = vld [vmem:[%s8671_s8 + $0x1e8] sm:$0xff] }
 0x440   :  { %6413 = vmatpush3.msra.mxu0 %v5363_v14  ;;  %5522 = vmatprep.mubr.f32.mxu0 %v5342_v4  ;;  %v5443_v14 = vld [vmem:[%s8671_s8 + $0x2f8] sm:$0xff]  ;;  %v5392_v4 = vld [vmem:[%s8671_s8 + $0x160] sm:$0xff] }
 0x441   :  { %6414 = vmatprep.subr.mxu0 %v5378_v50  ;;  %6371 = vmatprep.subr.bf16.mxu1 %v7315_v45  ;;  %v5427_v45 = vld [vmem:[%s8671_s8 + $0x278] sm:$0xff]  ;;  %v5442_v50 = vld [vmem:[%s8671_s8 + $0x2f0] sm:$0xff] }
 0x442   :  { %6415 = vmatpush3.msra.mxu0 %v5362_v28  ;;  %v5407_v28 = vld [vmem:[%s8671_s8 + $0x1d8] sm:$0xff] }
 0x443   :  { %6416 = vmatprep.subr.mxu0 %v5377_v16  ;;  %6372 = vmatpush3.bf16.msra.mxu1 %v7316_v59  ;;  %v5426_v59 = vld [vmem:[%s8671_s8 + $0x270] sm:$0xff]  ;;  %v5391_v16 = vld [vmem:[%s8671_s8 + $0x158] sm:$0xff] }
 0x444   :  { %6417 = vmatpush3.msra.mxu0 %v5361_v62  ;;  %6373 = vmatprep.subr.bf16.mxu1 %v7317_v60  ;;  %v5406_v60 = vld [vmem:[%s8671_s8 + $0x1d0] sm:$0xff]  ;;  %v5441_v62 = vld [vmem:[%s8671_s8 + $0x2e8] sm:$0xff] }
 0x445   :  { %6418 = vmatprep.subr.mxu0 %v5376_v26  ;;  %v5425_v26 = vld [vmem:[%s8671_s8 + $0x268] sm:$0xff] }
 0x446   :  { %6419 = vmatpush3.msra.mxu0 %v5360_v63  ;;  %v5440_v63 = vld [vmem:[%s8671_s8 + $0x2e0] sm:$0xff] }
 0x447   :  { %6420 = vmatprep.subr.mxu0 %v5375_v5  ;;  %6374 = vmatpush3.bf16.msra.mxu1 %v7318_v2  ;;  %v5424_v2 = vld [vmem:[%s8671_s8 + $0x260] sm:$0xff]  ;;  %v5390_v5 = vld [vmem:[%s8671_s8 + $0x150] sm:$0xff] }
 0x448   :  { %6421 = vmatpush3.msra.mxu0 %v5359_v6  ;;  %6375 = vmatprep.subr.bf16.mxu1 %v7319_v49  ;;  %v5439_v49 = vld [vmem:[%s8671_s8 + $0x2d8] sm:$0xff]  ;;  %v5405_v6 = vld [vmem:[%s8671_s8 + $0x1c8] sm:$0xff] }
 0x449   :  { %6422 = vmatprep.subr.mxu0 %v5374_v48  ;;  %v5423_v48 = vld [vmem:[%s8671_s8 + $0x258] sm:$0xff] }
 0x44a   :  { %6423 = vmatpush3.msra.mxu0 %v5358_v9  ;;  %v5389_v9 = vld [vmem:[%s8671_s8 + $0x148] sm:$0xff] }
 0x44b   :  { %6424 = vmatprep.subr.mxu0 %v5373_v10  ;;  %6376 = vmatpush3.bf16.msra.mxu1 %v7320_v46  ;;  %v5438_v46 = vld [vmem:[%s8671_s8 + $0x2d0] sm:$0xff]  ;;  %v5404_v10 = vld [vmem:[%s8671_s8 + $0x1c0] sm:$0xff] }
 0x44c   :  { %6425 = vmatpush3.msra.mxu0 %v5357_v12  ;;  %6377 = vmatprep.subr.bf16.mxu1 %v7321_v11  ;;  %v5422_v11 = vld [vmem:[%s8671_s8 + $0x250] sm:$0xff]  ;;  %v5388_v12 = vld [vmem:[%s8671_s8 + $0x140] sm:$0xff] }
 0x44d   :  { %6426 = vmatprep.subr.mxu0 %v5372_v13  ;;  %v5437_v13 = vld [vmem:[%s8671_s8 + $0x2c8] sm:$0xff] }
 0x44e   :  { %6427 = vmatpush3.msra.mxu0 %v5356_v8  ;;  %v5403_v8 = vld [vmem:[%s8671_s8 + $0x1b8] sm:$0xff] }
 0x44f   :  { %6428 = vmatprep.subr.mxu0 %v5371_v15  ;;  %6378 = vmatpush3.bf16.msra.mxu1 %v7322_v33  ;;  %v5421_v33 = vld [vmem:[%s8671_s8 + $0x248] sm:$0xff]  ;;  %v5387_v15 = vld [vmem:[%s8671_s8 + $0x138] sm:$0xff] }
 0x450   :  { %6429 = vmatpush3.msra.mxu0 %v5355_v18  ;;  %6379 = vmatprep.subr.bf16.mxu1 %v7323_v1  ;;  %v5436_v1 = vld [vmem:[%s8671_s8 + $0x2c0] sm:$0xff]  ;;  %v5402_v18 = vld [vmem:[%s8671_s8 + $0x1b0] sm:$0xff] }
 0x451   :  { %6430 = vmatprep.subr.mxu0 %v5370_v19  ;;  %v5420_v19 = vld [vmem:[%s8671_s8 + $0x240] sm:$0xff] }
 0x452   :  { %6431 = vmatpush3.msra.mxu0 %v5354_v20 }
 0x453   :  { %6432 = vmatprep.subr.mxu0 %v5369_v21  ;;  %6380 = vmatpush3.bf16.msra.mxu1 %v7324_v56  ;;  %v5386_v56 = vld [vmem:[%s8671_s8 + $0x130] sm:$0xff]  ;;  %v5435_v21 = vld [vmem:[%s8671_s8 + $0x2b8] sm:$0xff] }
 0x454   :  { %6433 = vmatpush3.msra.mxu0 %v5353_v23  ;;  %6658 = vmatprep.subr.bf16.mxu1 %v7488_v57  ;;  %v2861_v23 = vrot.slane %v8292_v44, %v2402_v53  ;;  %v5434_v53 = vld [vmem:[%s8671_s8 + $0x2b0] sm:$0xff] }
 0x455   :  { %6434 = vmatprep.subr.mxu0 %v5368_v47  ;;  %v5401_v47 = vld [vmem:[%s8671_s8 + $0x1a8] sm:$0xff] }
 0x456   :  { %6435 = vmatpush3.msra.mxu0 %v5352_v25  ;;  %5254 = vmatmul.mubr.bf16.vlgmr.msra.gmra.mxu1 %v8243_v17  ;;  %v5365_v17 = vld [vmem:[%s8671_s8 + $0x88] sm:$0xff]  ;;  %v5419_v25 = vld [vmem:[%s8671_s8 + $0x238] sm:$0xff] }
 0x457   :  { %6436 = vmatprep.subr.mxu0 %v5367_v27  ;;  %6659 = vmatpush3.bf16.msra.mxu1 %v7325_v32  ;;  %v5385_v27 = vld [vmem:[%s8671_s8 + $0x128] sm:$0xff] }
 0x458   :  { %6437 = vmatpush3.msra.mxu0 %v5351_v35  ;;  %6660 = vmatprep.subr.bf16.mxu1 %v7488_v57  ;;  %v2865_v35 = vrot.slane %v8292_v44, %v2406_v55  ;;  %v5433_v55 = vld [vmem:[%s8671_s8 + $0x2a8] sm:$0xff] }
 0x459   :  { %6438 = vmatprep.subr.mxu0 %v5366_v36  ;;  %6662 = vmatprep.mubr.msk.bf16.mxu1 %vm7489_vm10, %v7488_v57  ;;  %v5400_v36 = vld [vmem:[%s8671_s8 + $0x1a0] sm:$0xff] }
 0x45a   :  { %6439 = vmatpush3.msra.mxu0 %v5350_v38 }
 0x45b   :  { %6440 = vmatprep.subr.mxu0 %v5365_v17  ;;  %6661 = vmatpush3.bf16.msra.mxu1 %v7326_v51  ;;  %v5384_v51 = vld [vmem:[%s8671_s8 + $0x120] sm:$0xff]  ;;  %v4888_v17 = vadd.f32 %v8319_v40, %v2861_v23 }
 0x45c   :  { %6441 = vmatpush3.msra.mxu0 %v5349_v0  ;;  %6447 = vmatprep.subr.mxu1 %v5411_v61  ;;  %v5417_v0 = vld [vmem:[%s8671_s8 + $0x228] sm:$0xff] }
 0x45d   :  { %6442 = vmatprep.subr.mxu0 %v5364_v29  ;;  %v5383_v29 = vld [vmem:[%s8671_s8 + $0x118] sm:$0xff] }
 0x45e   :  { %6443 = vmatpush3.msra.mxu0 %v5348_v24  ;;  %6663 = vmatmul.mubr.msk.bf16.vlgmr.msra.gmra.mxu1 %vm4685_vm11, %v8276_v54  ;;  %v5408_v54 = vld [vmem:[%s8671_s8 + $0x1e0] sm:$0xff]  ;;  %v4890_v24 = vadd.f32 %v8323_v7, %v2865_v35 }
 0x45f   :  { %5523 = vmatmul.mubr.f32.vlgmr.msra.gmra.mxu0 %v5341_v43  ;;  %6448 = vmatpush3.msra.mxu1 %v5395_v52  ;;  %v5398_v52 = vld [vmem:[%s8671_s8 + $0x190] sm:$0xff] }
 0x460   :  { %6449 = vmatprep.subr.mxu1 %v5410_v39  ;;  %6482 = vmatprep.subr.mxu0 %v5443_v14  ;;  %v5397_v14 = vld [vmem:[%s8671_s8 + $0x188] sm:$0xff] }
 0x461   :  { %6450 = vmatpush3.msra.mxu1 %v5394_v3  ;;  %6483 = vmatpush3.msra.mxu0 %v5427_v45  ;;  %v5382_v3 = vld [vmem:[%s8671_s8 + $0x110] sm:$0xff] }
 0x462   :  { %6451 = vmatprep.subr.mxu1 %v5409_v41  ;;  %6484 = vmatprep.subr.mxu0 %v5442_v50  ;;  %v5432_v41 = vld [vmem:[%s8671_s8 + $0x2a0] sm:$0xff]  ;;  %v5381_v50 = vld [vmem:[%s8671_s8 + $0x108] sm:$0xff] }
 0x463   :  { %6452 = vmatpush3.msra.mxu1 %v5393_v31  ;;  %6485 = vmatpush3.msra.mxu0 %v5426_v59 }
 0x464   :  { %6453 = vmatprep.subr.mxu1 %v5408_v54  ;;  %6486 = vmatprep.subr.mxu0 %v5441_v62  ;;  %v5416_v54 = vld [vmem:[%s8671_s8 + $0x220] sm:$0xff] }
 0x465   :  { %6454 = vmatpush3.msra.mxu1 %v5392_v4  ;;  %6487 = vmatpush3.msra.mxu0 %v5425_v26 }
 0x466   :  { %6455 = vmatprep.subr.mxu1 %v5407_v28  ;;  %6488 = vmatprep.subr.mxu0 %v5440_v63  ;;  %v5431_v28 = vld [vmem:[%s8671_s8 + $0x298] sm:$0xff] }
 0x467   :  { %6456 = vmatpush3.msra.mxu1 %v5391_v16  ;;  %6489 = vmatpush3.msra.mxu0 %v5424_v2  ;;  %v5396_v16 = vld [vmem:[%s8671_s8 + $0x180] sm:$0xff] }
 0x468   :  { %6457 = vmatprep.subr.mxu1 %v5406_v60  ;;  %6490 = vmatprep.subr.mxu0 %v5439_v49  ;;  %v5415_v60 = vld [vmem:[%s8671_s8 + $0x218] sm:$0xff]  ;;  %v5380_v2 = vld [vmem:[%s8671_s8 + $0x100] sm:$0xff] }
 0x469   :  { %6458 = vmatpush3.msra.mxu1 %v5390_v5  ;;  %6491 = vmatpush3.msra.mxu0 %v5423_v48  ;;  %v5430_v5 = vld [vmem:[%s8671_s8 + $0x290] sm:$0xff] }
 0x46a   :  { %6459 = vmatprep.subr.mxu1 %v5405_v6  ;;  %6492 = vmatprep.subr.mxu0 %v5438_v46  ;;  %v5414_v6 = vld [vmem:[%s8671_s8 + $0x210] sm:$0xff]  ;;  %v5429_v46 = vld [vmem:[%s8671_s8 + $0x288] sm:$0xff] }
 0x46b   :  { %6460 = vmatpush3.msra.mxu1 %v5389_v9  ;;  %6493 = vmatpush3.msra.mxu0 %v5422_v11  ;;  %v5413_v11 = vld [vmem:[%s8671_s8 + $0x208] sm:$0xff] }
 0x46c   :  { %6461 = vmatprep.subr.mxu1 %v5404_v10  ;;  %6494 = vmatprep.subr.mxu0 %v5437_v13  ;;  %v5428_v13 = vld [vmem:[%s8671_s8 + $0x280] sm:$0xff] }
 0x46d   :  { %6462 = vmatpush3.msra.mxu1 %v5388_v12  ;;  %6495 = vmatpush3.msra.mxu0 %v5421_v33  ;;  %v5447_v33 = vld [vmem:[%s8671_s8 + $0x318] sm:$0xff] }
 0x46e   :  { %v4928_v20 = vpop.f32.mrf.mxu1  ;;  %6463 = vmatprep.subr.mxu1 %v5403_v8  ;;  %6496 = vmatprep.subr.mxu0 %v5436_v1  ;;  %v5412_v8 = vld [vmem:[%s8671_s8 + $0x200] sm:$0xff]  ;;  %v5445_v1 = vld [vmem:[%s8671_s8 + $0x308] sm:$0xff] }
 0x46f   :  { %6464 = vmatpush3.msra.mxu1 %v5387_v15  ;;  %6497 = vmatpush3.msra.mxu0 %v5420_v19  ;;  %v4929_v40 = vadd.f32 %v4928_v20, %v4888_v17  ;;  %v5446_v15 = vld [vmem:[%s8671_s8 + $0x310] sm:$0xff]  ;;  %v2873_v17 = vrot.slane %v8292_v44, %v2414_v22 }
 0x470   :  { %v4930_v32 = vpop.f32.mrf.mxu1  ;;  %6465 = vmatprep.subr.mxu1 %v5402_v18  ;;  %6498 = vmatprep.subr.mxu0 %v5435_v21  ;;  %v5444_v18 = vld [vmem:[%s8671_s8 + $0x300] sm:$0xff] }
 0x471   :  { %6466 = vmatpush3.msra.mxu1 %v5386_v56  ;;  %6499 = vmatpush3.msra.mxu0 %v5419_v25  ;;  %v4931_v7 = vadd.f32 %v4930_v32, %v4890_v24 }
 0x472   :  { %v4932_v38 = vpop.f32.mrf.mxu1  ;;  %6467 = vmatprep.subr.mxu1 %v5401_v47  ;;  %6500 = vmatprep.subr.mxu0 %v5434_v53 }
 0x473   :  { %6468 = vmatpush3.msra.mxu1 %v5385_v27  ;;  %6501 = vmatpush3.msra.mxu0 %v5418_v34 }
 0x474   :  { %v4933_v61 = vpop.f32.mrf.mxu1  ;;  %6469 = vmatprep.subr.mxu1 %v5400_v36  ;;  %6502 = vmatprep.subr.mxu0 %v5433_v55  ;;  %v2869_v55 = vrot.slane %v8292_v44, %v2410_v30 }
 0x475   :  { %6470 = vmatpush3.msra.mxu1 %v5384_v51  ;;  %6503 = vmatpush3.msra.mxu0 %v5417_v0 }
 0x476   :  { %v4969_v43 = vpop.f32.mrf.mxu0  ;;  %v5010_v39 = vpop.f32.mrf.mxu1  ;;  %6471 = vmatprep.subr.mxu1 %v5399_v42  ;;  %6504 = vmatprep.subr.mxu0 %v5432_v41 }
 0x477   :  { %v4970_v31 = vadd.f32 %v4969_v43, %v4929_v40  ;;  %6472 = vmatpush3.msra.mxu1 %v5383_v29  ;;  %6505 = vmatpush3.msra.mxu0 %v5416_v54 }
 0x478   :  { %v4971_v45 = vpop.f32.mrf.mxu0  ;;  %v5012_v4 = vpop.f32.mrf.mxu1  ;;  %6473 = vmatprep.subr.mxu1 %v5398_v52  ;;  %6506 = vmatprep.subr.mxu0 %v5431_v28 }
 0x479   :  { %v4972_v59 = vadd.f32 %v4971_v45, %v4931_v7  ;;  %6474 = vmatpush3.msra.mxu1 %v5382_v3  ;;  %v5011_v62 = vadd.f32 %v5010_v39, %v4970_v31  ;;  %6507 = vmatpush3.msra.mxu0 %v5415_v60 }
 0x47a   :  { %v4973_v26 = vpop.f32.mrf.mxu0  ;;  %v5014_v63 = vpop.f32.mrf.mxu1  ;;  %6475 = vmatprep.subr.mxu1 %v5397_v14  ;;  %6508 = vmatprep.subr.mxu0 %v5430_v5 }
 0x47b   :  { %v5013_v49 = vadd.f32 %v5012_v4, %v4972_v59  ;;  %6476 = vmatpush3.msra.mxu1 %v5381_v50  ;;  %6509 = vmatpush3.msra.mxu0 %v5414_v6  ;;  %v5343_v12 = vmax.f32 %v5011_v62, 0.0  ;;  %v2877_v4 = vrot.slane %v8292_v44, %v2418_v58 }
 0x47c   :  { %v4974_v48 = vpop.f32.mrf.mxu0  ;;  %v5015_v9 = vpop.f32.mrf.mxu1  ;;  %6477 = vmatprep.subr.mxu1 %v5396_v16  ;;  %6510 = vmatprep.subr.mxu0 %v5429_v46 }
 0x47d   :  { %v5344_v10 = vmax.f32 %v5013_v49, 0.0  ;;  %6478 = vmatpush3.msra.mxu1 %v5380_v2  ;;  %6511 = vmatpush3.msra.mxu0 %v5413_v11 }
 0x47e   :  { %6666 = vmatprep.subr.mxu1 %v7488_v57  ;;  %6512 = vmatprep.subr.mxu0 %v5428_v13 }
 0x47f   :  { %5592 = vmatprep.mubr.f32.mxu1 %v5344_v10  ;;  %6513 = vmatpush3.msra.mxu0 %v5412_v8  ;;  %v6275_v8 = vld [vmem:[#allocation2] ss:$0 sm:$0xff] }
 0x480   :  { %5593 = vmatmul.mubr.f32.vlgmr.msra.gmra.mxu1 %v5343_v12 }
 0x481   :  { %6674 = vmatprep.mubr.msk.f32.mxu1 %vm7489_vm10, %v7488_v57  ;;  %6667 = vmatpush3.msra.mxu1 %v5447_v33 }
 0x482   :  { %6668 = vmatprep.subr.mxu1 %v7488_v57 }
 0x483   :  { %6669 = vmatpush3.msra.mxu1 %v5446_v15 }
 0x484   :  { %6670 = vmatprep.subr.mxu1 %v7488_v57 }
 0x485   :  { %6671 = vmatpush3.msra.mxu1 %v5445_v1 }
 0x486   :  { %6672 = vmatprep.subr.mxu1 %v7488_v57 }
 0x487   :  { %6673 = vmatpush3.msra.mxu1 %v5444_v18 }
 0x4b6   :  { %v5051_v19 = vpop.f32.mrf.mxu1 }
 0x4b7   :  { %v5092_v20 = vpop.f32.mrf.mxu0  ;;  %v5052_v42 = vadd.f32 %v5051_v19, %v2869_v55 }
 0x4b8   :  { %v5053_v56 = vpop.f32.mrf.mxu1 }
 0x4b9   :  { %v5094_v21 = vpop.f32.mrf.mxu0  ;;  %v5054_v0 = vadd.f32 %v5053_v56, %v2873_v17  ;;  %v5093_v61 = vadd.f32 %v5092_v20, %v5052_v42 }
 0x4ba   :  { %v5055_v23 = vpop.f32.mrf.mxu1 }
 0x4bb   :  { %v5096_v47 = vpop.f32.mrf.mxu0  ;;  %v5095_v24 = vadd.f32 %v5094_v21, %v5054_v0 }
 0x4bc   :  { %v5056_v25 = vpop.f32.mrf.mxu1 }
 0x4bd   :  { %v5097_v32 = vpop.f32.mrf.mxu0 }
 0x4bf   :  { %v5174_v27 = vpop.f32.mrf.mxu0 }
 0x4c1   :  { %v5176_v53 = vpop.f32.mrf.mxu0 }
 0x4c3   :  { %v5178_v35 = vpop.f32.mrf.mxu0 }
 0x4c5   :  { %v5179_v36 = vpop.f32.mrf.mxu0 }
 0x4df   :  { %v6359_v34 = vpop.f32.mrf.mxu0 }
 0x4e1   :  { %v6360_v38 = vpop.f32.mrf.mxu0 }
 0x4e2   :  { %v6361_v50 = vadd.f32 %v6360_v38, %v6359_v34 }
 0x4e3   :  { %v6362_v57 = vpop.f32.mrf.mxu0 }
 0x4e4   :  { %v5216_v16 = vadd.f32 %v6361_v50, %v2877_v4 }
 0x4e5   :  { %v6363_v51 = vpop.f32.mrf.mxu0 }
 0x4f6   :  { %v5133_v29 = vpop.f32.mrf.mxu1 }
 0x4f7   :  { %v5134_v40 = vadd.f32 %v5133_v29, %v5093_v61 }
 0x4f8   :  { %v5135_v52 = vpop.f32.mrf.mxu1 }
 0x4f9   :  { %v5136_v43 = vadd.f32 %v5135_v52, %v5095_v24  ;;  %v5175_v39 = vadd.f32 %v5174_v27, %v5134_v40 }
 0x4fa   :  { %v5137_v3 = vpop.f32.mrf.mxu1 }
 0x4fb   :  { %v5177_v41 = vadd.f32 %v5176_v53, %v5136_v43  ;;  %v5345_v14 = vmax.f32 %v5175_v39, 0.0 }
 0x4fc   :  { %v5138_v7 = vpop.f32.mrf.mxu1 }
 0x4fd   :  { %v5346_v31 = vmax.f32 %v5177_v41, 0.0 }
 0x4ff   :  { %v6403_v54 = vpop.f32.mrf.mxu0  ;;  %5662 = vmatprep.mubr.f32.mxu0 %v5346_v31 }
 0x500   :  { %5663 = vmatmul.mubr.f32.vlgmr.msra.gmra.mxu0 %v5345_v14 }
 0x501   :  { %v6404_v30 = vpop.f32.mrf.mxu0 }
 0x502   :  { %v6405_v26 = vadd.f32 %v6404_v30, %v6403_v54 }
 0x503   :  { %v6406_v45 = vpop.f32.mrf.mxu0 }
 0x505   :  { %v6407_v22 = vpop.f32.mrf.mxu0 }
 0x516   :  { %v6381_v28 = vpop.f32.mrf.mxu1 }
 0x518   :  { %v6382_v59 = vpop.f32.mrf.mxu1 }
 0x519   :  { %v6383_v60 = vadd.f32 %v6382_v59, %v6381_v28 }
 0x51a   :  { %v6384_v62 = vpop.f32.mrf.mxu1 }
 0x51b   :  { %v5256_v63 = vadd.f32 %v6383_v60, %v5216_v16 }
 0x51c   :  { %v6385_v2 = vpop.f32.mrf.mxu1 }
 0x51d   :  { %v5296_v5 = vadd.f32 %v6405_v26, %v5256_v63 }
 0x51e   :  { %v5335_v49 = vpop.f32.mrf.mxu1 }
 0x51f   :  { %v5336_v6 = vadd.f32 %v5335_v49, %v5296_v5  ;;  %v6444_v10 = vpop.f32.mrf.mxu0 }
 0x520   :  { %v6664_v48 = vpop.f32.mrf.mxu1 }
 0x521   :  { %v5347_v9 = vmax.f32 %v5336_v6, 0.0  ;;  %v6445_v58 = vpop.f32.mrf.mxu0 }
 0x522   :  { %v5338_v46 = vpop.f32.mrf.mxu1  ;;  %v6446_v13 = vadd.f32 %v6445_v58, %v6444_v10 }
 0x523   :  { %6675 = vmatmul.mubr.msk.f32.vlgmr.msra.gmra.mxu1 %vm4685_vm11, %v5347_v9 }
 0x524   :  { %v6665_v37 = vpop.f32.mrf.mxu1  ;;  %v5525_v1 = vadd.f32 %v6446_v13, %v6275_v8 }
 0x540   :  { %v6479_v44 = vpop.f32.mrf.mxu1 }
 0x542   :  { %v6480_v12 = vpop.f32.mrf.mxu1 }
 0x543   :  { %v6481_v15 = vadd.f32 %v6480_v12, %v6479_v44 }
 0x545   :  { %v5595_v19 = vadd.f32 %v6481_v15, %v5525_v1 }
 0x5c0   :  { %v6514_v11 = vpop.f32.mrf.mxu0 }
 0x5c2   :  { %v6515_v33 = vpop.f32.mrf.mxu0 }
 0x5c3   :  { %v6516_v18 = vadd.f32 %v6515_v33, %v6514_v11 }
 0x5c5   :  { %v5665_v20 = vadd.f32 %v6516_v18, %v5595_v19 }
 0x5e3   :  { %v5734_v56 = vpop.f32.mrf.mxu1 }
 0x5e4   :  { %v5735_v21 = vadd.f32 %v5734_v56, %v5665_v20 }
 0x5e5   :  { %v6676_v23 = vpop.f32.mrf.mxu1 }
 0x5e6   :  { %5739 = vst.msk [vmem:[%s8673_s10] sm:$0xff] %vm5738_vm12, %v5735_v21 }
 0x5e7   :  { %5744 = vsyncpa [#allocation4], 1 }
 0x5e8   :  { %5745 = vsyncpa [#allocation6], 1 }
 0x5e9   :  { %5746 = vsyncpa [#allocation9], 1 }
 0x5ea   :  { %5747 = vsyncpa [#allocation12], 1 }

</bundles_post_ra>
